<compile_context>
chip_gen: v7x
topology: tpu7x:2x2x1
jax: 0.10.0
libtpu: 0.0.40
codegen_flags: <defaults>
</compile_context>

<pallas_src>
import functools

import jax
import jax.numpy as jnp
from jax.experimental import pallas as pl
from jax.experimental.pallas import tpu as pltpu

LN_EPS = 1e-5


# --------------------------- shared math helpers ---------------------------

def _ln(x, g, b):
    x = x.astype(jnp.float32)
    mu = jnp.mean(x, axis=-1, keepdims=True)
    var = jnp.mean((x - mu) ** 2, axis=-1, keepdims=True)
    return (x - mu) * jax.lax.rsqrt(var + LN_EPS) * g + b


def _gelu(x):
    # TODO(synk): torch nn.GELU default is exact-erf GELU; tanh approximation used here.
    return 0.5 * x * (1.0 + jnp.tanh(0.7978845608028654 * (x + 0.044715 * x * x * x)))


def _mm(a, b):
    # (M, K) @ (K, N) -> (M, N), f32 accumulation on the MXU.
    return jax.lax.dot_general(a, b, (((1,), (0,)), ((), ())),
                               preferred_element_type=jnp.float32)


def _mm_nt(a, b):
    # (M, K) @ (N, K)^T -> (M, N) without materializing a transpose.
    return jax.lax.dot_general(a, b, (((1,), (1,)), ((), ())),
                               preferred_element_type=jnp.float32)


def _mha(xq, xkv, w_in_t, b_in, w_out_t, b_out, num_heads, fused_qkv):
    """nn.MultiheadAttention (batch_first) for one batch element, dropout = identity.

    w_in_t: (E, 3E) pre-transposed in_proj_weight; w_out_t: (E, E) pre-transposed
    out_proj_weight.  Only called inside Pallas kernels.
    """
    E = w_out_t.shape[0]
    dh = E // num_heads
    scale = 1.0 / float(dh) ** 0.5
    if fused_qkv:
        qkv = _mm(xq, w_in_t) + b_in                  # one (L,E)x(E,3E) MXU pass
        q, k, v = qkv[:, :E], qkv[:, E:2 * E], qkv[:, 2 * E:]
    else:
        q = _mm(xq, w_in_t[:, :E]) + b_in[:, :E]
        kv = _mm(xkv, w_in_t[:, E:]) + b_in[:, E:]    # fused K/V projection
        k, v = kv[:, :E], kv[:, E:]
    acc = jnp.zeros((xq.shape[0], E), jnp.float32)
    for h in range(num_heads):                        # static unroll over heads
        sl = slice(h * dh, (h + 1) * dh)
        s = _mm_nt(q[:, sl], k[:, sl]) * scale        # (Lq, Lk)
        s = s - jnp.max(s, axis=-1, keepdims=True)
        p = jnp.exp(s)
        p = p * pl.reciprocal(jnp.sum(p, axis=-1, keepdims=True), approx=True)
        # Fold the output projection per head (== concat-of-heads @ Wout^T).
        acc = acc + _mm(_mm(p, v[:, sl]), w_out_t[sl, :])
    return acc + b_out


def _mlp_body(x, w1_t, b1, w2_t, b2):
    return _mm(_gelu(_mm(x, w1_t) + b1), w2_t) + b2


# ------------------------------ fused kernels ------------------------------

def _encoder_block_kernel(x_ref, g1_ref, b1_ref,
                          w_in_ref, bin_ref, w_out_ref, bout_ref,
                          g2_ref, b2_ref,
                          w1_ref, bm1_ref, w2_ref, bm2_ref,
                          o_ref, *, num_heads):
    x = x_ref[0].astype(jnp.float32)
    xn = _ln(x, g1_ref[...], b1_ref[...])
    x = x + _mha(xn, xn, w_in_ref[...], bin_ref[...],
                 w_out_ref[...], bout_ref[...], num_heads, fused_qkv=True)
    xn = _ln(x, g2_ref[...], b2_ref[...])
    x = x + _mlp_body(xn, w1_ref[...], bm1_ref[...], w2_ref[...], bm2_ref[...])
    o_ref[0] = x.astype(o_ref.dtype)


def _fusion_block_kernel(xi_ref, xh_ref,
                         g_iq_ref, b_iq_ref, g_hk_ref, b_hk_ref,
                         wi_in_ref, bi_in_ref, wi_out_ref, bi_out_ref,
                         g_hq_ref, b_hq_ref, g_ik_ref, b_ik_ref,
                         wh_in_ref, bh_in_ref, wh_out_ref, bh_out_ref,
                         g_im_ref, b_im_ref, wim1_ref, bim1_ref, wim2_ref, bim2_ref,
                         g_hm_ref, b_hm_ref, whm1_ref, bhm1_ref, whm2_ref, bhm2_ref,
                         oi_ref, oh_ref, *, num_heads):
    xi = xi_ref[0].astype(jnp.float32)
    xh = xh_ref[0].astype(jnp.float32)

    img_q = _ln(xi, g_iq_ref[...], b_iq_ref[...])
    hm_kv = _ln(xh, g_hk_ref[...], b_hk_ref[...])
    xi = xi + _mha(img_q, hm_kv, wi_in_ref[...], bi_in_ref[...],
                   wi_out_ref[...], bi_out_ref[...], num_heads, fused_qkv=False)

    hm_q = _ln(xh, g_hq_ref[...], b_hq_ref[...])
    img_kv = _ln(xi, g_ik_ref[...], b_ik_ref[...])   # uses the UPDATED x_img
    xh = xh + _mha(hm_q, img_kv, wh_in_ref[...], bh_in_ref[...],
                   wh_out_ref[...], bh_out_ref[...], num_heads, fused_qkv=False)

    xi = xi + _mlp_body(_ln(xi, g_im_ref[...], b_im_ref[...]),
                        wim1_ref[...], bim1_ref[...], wim2_ref[...], bim2_ref[...])
    xh = xh + _mlp_body(_ln(xh, g_hm_ref[...], b_hm_ref[...]),
                        whm1_ref[...], bhm1_ref[...], whm2_ref[...], bhm2_ref[...])

    oi_ref[0] = xi.astype(oi_ref.dtype)
    oh_ref[0] = xh.astype(oh_ref.dtype)


# --------------------------- pallas_call wrappers ---------------------------

def _tok_spec(L, E):
    return pl.BlockSpec((1, L, E), lambda b: (b, 0, 0))


def _rep_spec(r, c):
    return pl.BlockSpec((r, c), lambda b: (0, 0))


def _row(v):
    return v.reshape(1, -1)


def encoder_block(x, p, num_heads):
    """Whole TransformerEncoderBlock in one fused Pallas kernel, grid over batch."""
    B, L, E = x.shape
    a, m = p["attn"], p["mlp"]
    E3 = a["in_proj_weight"].shape[0]
    Hm = m["fc1_w"].shape[0]
    return pl.pallas_call(
        functools.partial(_encoder_block_kernel, num_heads=num_heads),
        grid=(B,),
        in_specs=[
            _tok_spec(L, E),
            _rep_spec(1, E), _rep_spec(1, E),
            _rep_spec(E, E3), _rep_spec(1, E3),
            _rep_spec(E, E), _rep_spec(1, E),
            _rep_spec(1, E), _rep_spec(1, E),
            _rep_spec(E, Hm), _rep_spec(1, Hm),
            _rep_spec(Hm, E), _rep_spec(1, E),
        ],
        out_specs=_tok_spec(L, E),
        out_shape=jax.ShapeDtypeStruct((B, L, E), x.dtype),
        compiler_params=pltpu.CompilerParams(dimension_semantics=("parallel",)),
    )(x,
      _row(p["norm1_w"]), _row(p["norm1_b"]),
      a["in_proj_weight"].T, _row(a["in_proj_bias"]),
      a["out_proj_weight"].T, _row(a["out_proj_bias"]),
      _row(p["norm2_w"]), _row(p["norm2_b"]),
      m["fc1_w"].T, _row(m["fc1_b"]),
      m["fc2_w"].T, _row(m["fc2_b"]))


def cross_modal_block(x_img, x_hm, p, num_heads):
    """Whole CrossModalFusionBlock in one fused Pallas kernel, grid over batch."""
    B, Li, E = x_img.shape
    Lh = x_hm.shape[1]
    a1, a2 = p["attn_img_to_hm"], p["attn_hm_to_img"]
    m1, m2 = p["mlp_img"], p["mlp_hm"]
    E3 = a1["in_proj_weight"].shape[0]
    Hm = m1["fc1_w"].shape[0]
    in_specs = [
        _tok_spec(Li, E), _tok_spec(Lh, E),
        _rep_spec(1, E), _rep_spec(1, E), _rep_spec(1, E), _rep_spec(1, E),
        _rep_spec(E, E3), _rep_spec(1, E3), _rep_spec(E, E), _rep_spec(1, E),
        _rep_spec(1, E), _rep_spec(1, E), _rep_spec(1, E), _rep_spec(1, E),
        _rep_spec(E, E3), _rep_spec(1, E3), _rep_spec(E, E), _rep_spec(1, E),
        _rep_spec(1, E), _rep_spec(1, E),
        _rep_spec(E, Hm), _rep_spec(1, Hm), _rep_spec(Hm, E), _rep_spec(1, E),
        _rep_spec(1, E), _rep_spec(1, E),
        _rep_spec(E, Hm), _rep_spec(1, Hm), _rep_spec(Hm, E), _rep_spec(1, E),
    ]
    return pl.pallas_call(
        functools.partial(_fusion_block_kernel, num_heads=num_heads),
        grid=(B,),
        in_specs=in_specs,
        out_specs=(_tok_spec(Li, E), _tok_spec(Lh, E)),
        out_shape=(jax.ShapeDtypeStruct((B, Li, E), x_img.dtype),
                   jax.ShapeDtypeStruct((B, Lh, E), x_hm.dtype)),
        compiler_params=pltpu.CompilerParams(dimension_semantics=("parallel",)),
    )(x_img, x_hm,
      _row(p["norm_img_q_w"]), _row(p["norm_img_q_b"]),
      _row(p["norm_hm_kv_w"]), _row(p["norm_hm_kv_b"]),
      a1["in_proj_weight"].T, _row(a1["in_proj_bias"]),
      a1["out_proj_weight"].T, _row(a1["out_proj_bias"]),
      _row(p["norm_hm_q_w"]), _row(p["norm_hm_q_b"]),
      _row(p["norm_img_kv_w"]), _row(p["norm_img_kv_b"]),
      a2["in_proj_weight"].T, _row(a2["in_proj_bias"]),
      a2["out_proj_weight"].T, _row(a2["out_proj_bias"]),
      _row(p["norm_img_mlp_w"]), _row(p["norm_img_mlp_b"]),
      m1["fc1_w"].T, _row(m1["fc1_b"]), m1["fc2_w"].T, _row(m1["fc2_b"]),
      _row(p["norm_hm_mlp_w"]), _row(p["norm_hm_mlp_b"]),
      m2["fc1_w"].T, _row(m2["fc1_b"]), m2["fc2_w"].T, _row(m2["fc2_b"]))


# ----------------------------- model pieces -----------------------------

def patch_embed(x_nchw, w, b, patch):
    """Conv2d(kernel=stride=patch) -> flatten(2) -> transpose(1,2) as im2col matmul.
    Tiny matmul: plain XLA (a Pallas launch would cost more than the compute)."""
    B, C, H, W = x_nchw.shape
    hp, wp = H // patch, W // patch
    x = x_nchw.reshape(B, C, hp, patch, wp, patch)
    x = x.transpose(0, 2, 4, 1, 3, 5).reshape(B, hp * wp, C * patch * patch)
    return x @ w.reshape(w.shape[0], -1).T + b


def vit_forward_features(x_nchw, p, num_heads, patch_size):
    # TODO(synk): synthetic stand-in for the timm ViT backbone (same math: patch conv,
    # cls token, pos-embed, pre-norm encoder blocks, final LayerNorm); no pretrained weights.
    tokens = patch_embed(x_nchw, p["patch_w"], p["patch_b"], patch_size)
    B, _, E = tokens.shape
    cls = jnp.broadcast_to(p["cls_token"], (B, 1, E))
    tokens = jnp.concatenate([cls, tokens], axis=1) + p["pos_embed"]
    for blk in p["blocks"]:
        tokens = encoder_block(tokens, blk, num_heads)
    return _ln(tokens, p["norm_w"], p["norm_b"])


def gaussian_heatmaps(keypoints_2d, heatmap_size, sigma):
    # TODO(synk): GaussianHeatmapGenerator class not provided; standard gaussian heatmap,
    # keypoints assumed as (x, y) in heatmap pixel coordinates.
    coords = jnp.arange(heatmap_size, dtype=jnp.float32)
    yy, xx = jnp.meshgrid(coords, coords, indexing="ij")
    kx = keypoints_2d[..., 0][:, :, None, None]
    ky = keypoints_2d[..., 1][:, :, None, None]
    d2 = (xx[None, None] - kx) ** 2 + (yy[None, None] - ky) ** 2
    return jnp.exp(-d2 / (2.0 * sigma ** 2)).astype(jnp.float32)  # (B, J, Hm, Hm)


def pose_head(x, p, num_joints):
    # Tiny MLP head: plain XLA per perf review.
    h = x
    for (w, b) in p["hidden"]:
        h = _gelu(h @ w.T + b)
    out = h @ p["out_w"].T + p["out_b"]
    return out.reshape(-1, num_joints, 3)


def transformer_pose_estimation_forward(params, image, depth, keypoints_2d, cfg):
    B = image.shape[0]
    img_depth = jnp.concatenate([image, depth], axis=1)                       # NCHW

    img_tok = vit_forward_features(img_depth, params["vit"], cfg["num_heads"],
                                   cfg["vit_patch_size"])
    img_tok = img_tok[:, 1:]                                                  # drop prefix (cls)

    heatmaps = gaussian_heatmaps(keypoints_2d, cfg["heatmap_size"], cfg["heatmap_sigma"])
    hm_tok = patch_embed(heatmaps, params["hm_patch_w"], params["hm_patch_b"],
                         cfg["heatmap_patch_size"])
    hm_tok = hm_tok + params["pos_embed_hm"]

    for blk in params["fusion"]:
        img_tok, hm_tok = cross_modal_block(img_tok, hm_tok, blk, cfg["num_heads"])

    cls = jnp.broadcast_to(params["final_cls_token"], (B, 1, img_tok.shape[-1]))
    tok = jnp.concatenate([cls, img_tok, hm_tok], axis=1) + params["final_pos_embed"]

    for blk in params["final_encoder"]:
        tok = encoder_block(tok, blk, cfg["num_heads"])

    cls_out = _ln(tok[:, 0], params["norm_out_w"], params["norm_out_b"])
    return pose_head(cls_out, params["pose_head"], cfg["num_joints"])


# ----------------------------- parameter init -----------------------------

def init_params(key, cfg):
    keys = iter(jax.random.split(key, 512))
    nk = lambda: next(keys)
    dense = lambda o, i: jax.random.normal(nk(), (o, i), jnp.float32) * 0.02
    zeros = lambda *s: jnp.zeros(s, jnp.float32)
    ones = lambda *s: jnp.ones(s, jnp.float32)

    E = cfg["embed_dim"]
    H = int(E * cfg["mlp_ratio"])
    J = cfg["num_joints"]

    def init_mha():
        return {"in_proj_weight": dense(3 * E, E), "in_proj_bias": zeros(3 * E),
                "out_proj_weight": dense(E, E), "out_proj_bias": zeros(E)}

    def init_mlp():
        return {"fc1_w": dense(H, E), "fc1_b": zeros(H),
                "fc2_w": dense(E, H), "fc2_b": zeros(E)}

    def init_encoder_block():
        return {"norm1_w": ones(E), "norm1_b": zeros(E), "attn": init_mha(),
                "norm2_w": ones(E), "norm2_b": zeros(E), "mlp": init_mlp()}

    def init_fusion_block():
        return {"norm_img_q_w": ones(E), "norm_img_q_b": zeros(E),
                "norm_hm_kv_w": ones(E), "norm_hm_kv_b": zeros(E),
                "attn_img_to_hm": init_mha(),
                "norm_hm_q_w": ones(E), "norm_hm_q_b": zeros(E),
                "norm_img_kv_w": ones(E), "norm_img_kv_b": zeros(E),
                "attn_hm_to_img": init_mha(),
                "norm_img_mlp_w": ones(E), "norm_img_mlp_b": zeros(E),
                "mlp_img": init_mlp(),
                "norm_hm_mlp_w": ones(E), "norm_hm_mlp_b": zeros(E),
                "mlp_hm": init_mlp()}

    p_img = cfg["vit_patch_size"]
    n_img = (cfg["image_size"] // p_img) ** 2
    p_hm = cfg["heatmap_patch_size"]
    n_hm = (cfg["heatmap_size"] // p_hm) ** 2

    vit = {
        "patch_w": jax.random.normal(nk(), (E, cfg["image_in_channels"], p_img, p_img),
                                     jnp.float32) * 0.02,
        "patch_b": zeros(E),
        "cls_token": jax.random.normal(nk(), (1, 1, E), jnp.float32) * 0.02,
        "pos_embed": jax.random.normal(nk(), (1, 1 + n_img, E), jnp.float32) * 0.02,
        "blocks": [init_encoder_block() for _ in range(cfg["vit_depth"])],
        "norm_w": ones(E), "norm_b": zeros(E),
    }

    hidden = []
    prev = E
    for hd in cfg["regression_hidden_dims"]:
        hidden.append((dense(hd, prev), zeros(hd)))
        prev = hd
    pose = {"hidden": hidden, "out_w": dense(J * 3, prev), "out_b": zeros(J * 3)}

    return {
        "vit": vit,
        "hm_patch_w": jax.random.normal(nk(), (E, cfg["heatmap_in_channels"], p_hm, p_hm),
                                        jnp.float32) * 0.02,
        "hm_patch_b": zeros(E),
        "pos_embed_hm": jax.random.normal(nk(), (1, n_hm, E), jnp.float32) * 0.02,
        "fusion": [init_fusion_block() for _ in range(cfg["num_cross_modal_layers"])],
        "final_cls_token": jax.random.normal(nk(), (1, 1, E), jnp.float32) * 0.02,
        "final_pos_embed": jax.random.normal(nk(), (1, 1 + n_img + n_hm, E), jnp.float32) * 0.02,
        "final_encoder": [init_encoder_block() for _ in range(cfg["final_encoder_depth"])],
        "norm_out_w": ones(E), "norm_out_b": zeros(E),
        "pose_head": pose,
    }


# --------------------------------- main ---------------------------------

if __name__ == "__main__":
    cfg = dict(
        embed_dim=32, num_heads=4, mlp_ratio=2.0,
        num_joints=5,
        image_size=16, image_in_channels=4, vit_patch_size=8, vit_depth=1,
        heatmap_size=16, heatmap_in_channels=5, heatmap_patch_size=8, heatmap_sigma=2.0,
        num_cross_modal_layers=1, final_encoder_depth=1,
        regression_hidden_dims=(64, 32),
    )

    root = jax.random.PRNGKey(0)
    k_params, k_img, k_depth, k_kp = jax.random.split(root, 4)
    params = init_params(k_params, cfg)

    B = 2
    image = jax.random.normal(k_img, (B, 3, cfg["image_size"], cfg["image_size"]), jnp.float32)
    depth = jax.random.normal(k_depth, (B, 1, cfg["image_size"], cfg["image_size"]), jnp.float32)
    keypoints_2d = jax.random.uniform(k_kp, (B, cfg["num_joints"], 2), jnp.float32,
                                      0.0, float(cfg["heatmap_size"]))

    fwd = jax.jit(functools.partial(transformer_pose_estimation_forward, cfg=cfg))
    pose_3d = fwd(params, image, depth, keypoints_2d)
    pose_3d = jax.block_until_ready(pose_3d)
    assert pose_3d.shape == (B, cfg["num_joints"], 3)
    assert bool(jnp.all(jnp.isfinite(pose_3d)))
    print("KERNEL_OK")
</pallas_src>

<mosaic_0001>
module attributes {stable_mosaic.version = 11 : i64} {
  func.func @_encoder_block_kernel(%arg0: i32, %arg1: memref<1x5x32xf32, #tpu.memory_space<vmem>>, %arg2: memref<1x32xf32, #tpu.memory_space<vmem>>, %arg3: memref<1x32xf32, #tpu.memory_space<vmem>>, %arg4: memref<32x96xf32, #tpu.memory_space<vmem>>, %arg5: memref<1x96xf32, #tpu.memory_space<vmem>>, %arg6: memref<32x32xf32, #tpu.memory_space<vmem>>, %arg7: memref<1x32xf32, #tpu.memory_space<vmem>>, %arg8: memref<1x32xf32, #tpu.memory_space<vmem>>, %arg9: memref<1x32xf32, #tpu.memory_space<vmem>>, %arg10: memref<32x64xf32, #tpu.memory_space<vmem>>, %arg11: memref<1x64xf32, #tpu.memory_space<vmem>>, %arg12: memref<64x32xf32, #tpu.memory_space<vmem>>, %arg13: memref<1x32xf32, #tpu.memory_space<vmem>>, %arg14: memref<1x5x32xf32, #tpu.memory_space<vmem>>) attributes {dimension_semantics = [#tpu.dimension_semantics<parallel>], iteration_bounds = array<i64: 2>, scalar_prefetch = 0 : i64, scratch_operands = 0 : i64, tpu.core_type = #tpu.core_type<tc>, window_params = [{transform_indices = @transform_0, window_bounds = array<i64: 1, 5, 32>}, {pipeline_mode = #tpu.pipeline_mode<synchronous>, transform_indices = @transform_1, window_bounds = array<i64: 1, 32>}, {pipeline_mode = #tpu.pipeline_mode<synchronous>, transform_indices = @transform_2, window_bounds = array<i64: 1, 32>}, {pipeline_mode = #tpu.pipeline_mode<synchronous>, transform_indices = @transform_3, window_bounds = array<i64: 32, 96>}, {pipeline_mode = #tpu.pipeline_mode<synchronous>, transform_indices = @transform_4, window_bounds = array<i64: 1, 96>}, {pipeline_mode = #tpu.pipeline_mode<synchronous>, transform_indices = @transform_5, window_bounds = array<i64: 32, 32>}, {pipeline_mode = #tpu.pipeline_mode<synchronous>, transform_indices = @transform_6, window_bounds = array<i64: 1, 32>}, {pipeline_mode = #tpu.pipeline_mode<synchronous>, transform_indices = @transform_7, window_bounds = array<i64: 1, 32>}, {pipeline_mode = #tpu.pipeline_mode<synchronous>, transform_indices = @transform_8, window_bounds = array<i64: 1, 32>}, {pipeline_mode = #tpu.pipeline_mode<synchronous>, transform_indices = @transform_9, window_bounds = array<i64: 32, 64>}, {pipeline_mode = #tpu.pipeline_mode<synchronous>, transform_indices = @transform_10, window_bounds = array<i64: 1, 64>}, {pipeline_mode = #tpu.pipeline_mode<synchronous>, transform_indices = @transform_11, window_bounds = array<i64: 64, 32>}, {pipeline_mode = #tpu.pipeline_mode<synchronous>, transform_indices = @transform_12, window_bounds = array<i64: 1, 32>}, {transform_indices = @transform_13, window_bounds = array<i64: 1, 5, 32>}]} {
    %c0 = arith.constant 0 : index
    %c0_0 = arith.constant 0 : index
    %c0_1 = arith.constant 0 : index
    %0 = vector.load %arg1[%c0, %c0_0, %c0_1] : memref<1x5x32xf32, #tpu.memory_space<vmem>>, vector<1x5x32xf32>
    %1 = vector.shape_cast %0 : vector<1x5x32xf32> to vector<5x32xf32>
    %c0_2 = arith.constant 0 : index
    %c0_3 = arith.constant 0 : index
    %2 = vector.load %arg2[%c0_2, %c0_3] : memref<1x32xf32, #tpu.memory_space<vmem>>, vector<1x32xf32>
    %c0_4 = arith.constant 0 : index
    %c0_5 = arith.constant 0 : index
    %3 = vector.load %arg3[%c0_4, %c0_5] : memref<1x32xf32, #tpu.memory_space<vmem>>, vector<1x32xf32>
    %cst = arith.constant dense<0.000000e+00> : vector<5xf32>
    %4 = vector.multi_reduction <add>, %1, %cst [1] : vector<5x32xf32> to vector<5xf32>
    %5 = vector.shape_cast %4 : vector<5xf32> to vector<5x1xf32>
    %cst_6 = arith.constant 3.200000e+01 : f32
    %6 = vector.broadcast %cst_6 : f32 to vector<5x1xf32>
    %7 = arith.divf %5, %6 : vector<5x1xf32>
    %8 = vector.broadcast %7 : vector<5x1xf32> to vector<5x32xf32>
    %9 = arith.subf %1, %8 : vector<5x32xf32>
    %10 = arith.mulf %9, %9 : vector<5x32xf32>
    %cst_7 = arith.constant dense<0.000000e+00> : vector<5xf32>
    %11 = vector.multi_reduction <add>, %10, %cst_7 [1] : vector<5x32xf32> to vector<5xf32>
    %12 = vector.shape_cast %11 : vector<5xf32> to vector<5x1xf32>
    %cst_8 = arith.constant 3.200000e+01 : f32
    %13 = vector.broadcast %cst_8 : f32 to vector<5x1xf32>
    %14 = arith.divf %12, %13 : vector<5x1xf32>
    %15 = vector.broadcast %7 : vector<5x1xf32> to vector<5x32xf32>
    %16 = arith.subf %1, %15 : vector<5x32xf32>
    %cst_9 = arith.constant 9.99999974E-6 : f32
    %17 = vector.broadcast %cst_9 : f32 to vector<5x1xf32>
    %18 = arith.addf %14, %17 : vector<5x1xf32>
    %19 = math.rsqrt %18 : vector<5x1xf32>
    %20 = vector.broadcast %19 : vector<5x1xf32> to vector<5x32xf32>
    %21 = arith.mulf %16, %20 : vector<5x32xf32>
    %22 = vector.broadcast %2 : vector<1x32xf32> to vector<5x32xf32>
    %23 = arith.mulf %21, %22 : vector<5x32xf32>
    %24 = vector.broadcast %3 : vector<1x32xf32> to vector<5x32xf32>
    %25 = arith.addf %23, %24 : vector<5x32xf32>
    %c0_10 = arith.constant 0 : index
    %c0_11 = arith.constant 0 : index
    %26 = vector.load %arg4[%c0_10, %c0_11] : memref<32x96xf32, #tpu.memory_space<vmem>>, vector<32x96xf32>
    %c0_12 = arith.constant 0 : index
    %c0_13 = arith.constant 0 : index
    %27 = vector.load %arg5[%c0_12, %c0_13] : memref<1x96xf32, #tpu.memory_space<vmem>>, vector<1x96xf32>
    %c0_14 = arith.constant 0 : index
    %c0_15 = arith.constant 0 : index
    %28 = vector.load %arg6[%c0_14, %c0_15] : memref<32x32xf32, #tpu.memory_space<vmem>>, vector<32x32xf32>
    %c0_16 = arith.constant 0 : index
    %c0_17 = arith.constant 0 : index
    %29 = vector.load %arg7[%c0_16, %c0_17] : memref<1x32xf32, #tpu.memory_space<vmem>>, vector<1x32xf32>
    %cst_18 = arith.constant dense<0.000000e+00> : vector<5x96xf32>
    %30 = tpu.matmul %25, %26, %cst_18 {dimension_numbers = #tpu.dot_dimension_numbers<[1], [0], [0], [1], [0, 0, 1, 1], [], []>} : vector<5x32xf32>, vector<32x96xf32>, vector<5x96xf32> -> vector<5x96xf32>
    %31 = vector.broadcast %27 : vector<1x96xf32> to vector<5x96xf32>
    %32 = arith.addf %30, %31 : vector<5x96xf32>
    %33 = vector.extract_strided_slice %32 {offsets = [0, 0], sizes = [5, 32], strides = [1, 1]} : vector<5x96xf32> to vector<5x32xf32>
    %34 = vector.extract_strided_slice %32 {offsets = [0, 32], sizes = [5, 32], strides = [1, 1]} : vector<5x96xf32> to vector<5x32xf32>
    %35 = vector.extract_strided_slice %32 {offsets = [0, 64], sizes = [5, 32], strides = [1, 1]} : vector<5x96xf32> to vector<5x32xf32>
    %cst_19 = arith.constant 0.000000e+00 : f32
    %36 = vector.broadcast %cst_19 : f32 to vector<5x32xf32>
    %37 = vector.extract_strided_slice %33 {offsets = [0, 0], sizes = [5, 8], strides = [1, 1]} : vector<5x32xf32> to vector<5x8xf32>
    %38 = vector.extract_strided_slice %34 {offsets = [0, 0], sizes = [5, 8], strides = [1, 1]} : vector<5x32xf32> to vector<5x8xf32>
    %cst_20 = arith.constant dense<0.000000e+00> : vector<5x5xf32>
    %39 = tpu.matmul %37, %38, %cst_20 {dimension_numbers = #tpu.dot_dimension_numbers<[1], [1], [0], [0], [0, 0, 1, 0], [], []>} : vector<5x8xf32>, vector<5x8xf32>, vector<5x5xf32> -> vector<5x5xf32>
    %cst_21 = arith.constant 0.353553385 : f32
    %40 = vector.broadcast %cst_21 : f32 to vector<5x5xf32>
    %41 = arith.mulf %39, %40 : vector<5x5xf32>
    %cst_22 = arith.constant dense<0xFF800000> : vector<5xf32>
    %42 = vector.multi_reduction <maximumf>, %41, %cst_22 [1] : vector<5x5xf32> to vector<5xf32>
    %43 = vector.shape_cast %42 : vector<5xf32> to vector<5x1xf32>
    %44 = vector.broadcast %43 : vector<5x1xf32> to vector<5x5xf32>
    %45 = arith.subf %41, %44 : vector<5x5xf32>
    %46 = math.exp %45 : vector<5x5xf32>
    %cst_23 = arith.constant dense<0.000000e+00> : vector<5xf32>
    %47 = vector.multi_reduction <add>, %46, %cst_23 [1] : vector<5x5xf32> to vector<5xf32>
    %48 = vector.shape_cast %47 : vector<5xf32> to vector<5x1xf32>
    %49 = tpu.reciprocal %48 {approx = true} : vector<5x1xf32> -> vector<5x1xf32>
    %50 = vector.broadcast %49 : vector<5x1xf32> to vector<5x5xf32>
    %51 = arith.mulf %46, %50 : vector<5x5xf32>
    %52 = vector.extract_strided_slice %35 {offsets = [0, 0], sizes = [5, 8], strides = [1, 1]} : vector<5x32xf32> to vector<5x8xf32>
    %cst_24 = arith.constant dense<0.000000e+00> : vector<5x8xf32>
    %53 = tpu.matmul %51, %52, %cst_24 {dimension_numbers = #tpu.dot_dimension_numbers<[1], [0], [0], [1], [0, 0, 1, 1], [], []>} : vector<5x5xf32>, vector<5x8xf32>, vector<5x8xf32> -> vector<5x8xf32>
    %54 = vector.extract_strided_slice %28 {offsets = [0, 0], sizes = [8, 32], strides = [1, 1]} : vector<32x32xf32> to vector<8x32xf32>
    %cst_25 = arith.constant dense<0.000000e+00> : vector<5x32xf32>
    %55 = tpu.matmul %53, %54, %cst_25 {dimension_numbers = #tpu.dot_dimension_numbers<[1], [0], [0], [1], [0, 0, 1, 1], [], []>} : vector<5x8xf32>, vector<8x32xf32>, vector<5x32xf32> -> vector<5x32xf32>
    %56 = arith.addf %36, %55 : vector<5x32xf32>
    %57 = vector.extract_strided_slice %33 {offsets = [0, 8], sizes = [5, 8], strides = [1, 1]} : vector<5x32xf32> to vector<5x8xf32>
    %58 = vector.extract_strided_slice %34 {offsets = [0, 8], sizes = [5, 8], strides = [1, 1]} : vector<5x32xf32> to vector<5x8xf32>
    %cst_26 = arith.constant dense<0.000000e+00> : vector<5x5xf32>
    %59 = tpu.matmul %57, %58, %cst_26 {dimension_numbers = #tpu.dot_dimension_numbers<[1], [1], [0], [0], [0, 0, 1, 0], [], []>} : vector<5x8xf32>, vector<5x8xf32>, vector<5x5xf32> -> vector<5x5xf32>
    %cst_27 = arith.constant 0.353553385 : f32
    %60 = vector.broadcast %cst_27 : f32 to vector<5x5xf32>
    %61 = arith.mulf %59, %60 : vector<5x5xf32>
    %cst_28 = arith.constant dense<0xFF800000> : vector<5xf32>
    %62 = vector.multi_reduction <maximumf>, %61, %cst_28 [1] : vector<5x5xf32> to vector<5xf32>
    %63 = vector.shape_cast %62 : vector<5xf32> to vector<5x1xf32>
    %64 = vector.broadcast %63 : vector<5x1xf32> to vector<5x5xf32>
    %65 = arith.subf %61, %64 : vector<5x5xf32>
    %66 = math.exp %65 : vector<5x5xf32>
    %cst_29 = arith.constant dense<0.000000e+00> : vector<5xf32>
    %67 = vector.multi_reduction <add>, %66, %cst_29 [1] : vector<5x5xf32> to vector<5xf32>
    %68 = vector.shape_cast %67 : vector<5xf32> to vector<5x1xf32>
    %69 = tpu.reciprocal %68 {approx = true} : vector<5x1xf32> -> vector<5x1xf32>
    %70 = vector.broadcast %69 : vector<5x1xf32> to vector<5x5xf32>
    %71 = arith.mulf %66, %70 : vector<5x5xf32>
    %72 = vector.extract_strided_slice %35 {offsets = [0, 8], sizes = [5, 8], strides = [1, 1]} : vector<5x32xf32> to vector<5x8xf32>
    %cst_30 = arith.constant dense<0.000000e+00> : vector<5x8xf32>
    %73 = tpu.matmul %71, %72, %cst_30 {dimension_numbers = #tpu.dot_dimension_numbers<[1], [0], [0], [1], [0, 0, 1, 1], [], []>} : vector<5x5xf32>, vector<5x8xf32>, vector<5x8xf32> -> vector<5x8xf32>
    %74 = vector.extract_strided_slice %28 {offsets = [8, 0], sizes = [8, 32], strides = [1, 1]} : vector<32x32xf32> to vector<8x32xf32>
    %cst_31 = arith.constant dense<0.000000e+00> : vector<5x32xf32>
    %75 = tpu.matmul %73, %74, %cst_31 {dimension_numbers = #tpu.dot_dimension_numbers<[1], [0], [0], [1], [0, 0, 1, 1], [], []>} : vector<5x8xf32>, vector<8x32xf32>, vector<5x32xf32> -> vector<5x32xf32>
    %76 = arith.addf %56, %75 : vector<5x32xf32>
    %77 = vector.extract_strided_slice %33 {offsets = [0, 16], sizes = [5, 8], strides = [1, 1]} : vector<5x32xf32> to vector<5x8xf32>
    %78 = vector.extract_strided_slice %34 {offsets = [0, 16], sizes = [5, 8], strides = [1, 1]} : vector<5x32xf32> to vector<5x8xf32>
    %cst_32 = arith.constant dense<0.000000e+00> : vector<5x5xf32>
    %79 = tpu.matmul %77, %78, %cst_32 {dimension_numbers = #tpu.dot_dimension_numbers<[1], [1], [0], [0], [0, 0, 1, 0], [], []>} : vector<5x8xf32>, vector<5x8xf32>, vector<5x5xf32> -> vector<5x5xf32>
    %cst_33 = arith.constant 0.353553385 : f32
    %80 = vector.broadcast %cst_33 : f32 to vector<5x5xf32>
    %81 = arith.mulf %79, %80 : vector<5x5xf32>
    %cst_34 = arith.constant dense<0xFF800000> : vector<5xf32>
    %82 = vector.multi_reduction <maximumf>, %81, %cst_34 [1] : vector<5x5xf32> to vector<5xf32>
    %83 = vector.shape_cast %82 : vector<5xf32> to vector<5x1xf32>
    %84 = vector.broadcast %83 : vector<5x1xf32> to vector<5x5xf32>
    %85 = arith.subf %81, %84 : vector<5x5xf32>
    %86 = math.exp %85 : vector<5x5xf32>
    %cst_35 = arith.constant dense<0.000000e+00> : vector<5xf32>
    %87 = vector.multi_reduction <add>, %86, %cst_35 [1] : vector<5x5xf32> to vector<5xf32>
    %88 = vector.shape_cast %87 : vector<5xf32> to vector<5x1xf32>
    %89 = tpu.reciprocal %88 {approx = true} : vector<5x1xf32> -> vector<5x1xf32>
    %90 = vector.broadcast %89 : vector<5x1xf32> to vector<5x5xf32>
    %91 = arith.mulf %86, %90 : vector<5x5xf32>
    %92 = vector.extract_strided_slice %35 {offsets = [0, 16], sizes = [5, 8], strides = [1, 1]} : vector<5x32xf32> to vector<5x8xf32>
    %cst_36 = arith.constant dense<0.000000e+00> : vector<5x8xf32>
    %93 = tpu.matmul %91, %92, %cst_36 {dimension_numbers = #tpu.dot_dimension_numbers<[1], [0], [0], [1], [0, 0, 1, 1], [], []>} : vector<5x5xf32>, vector<5x8xf32>, vector<5x8xf32> -> vector<5x8xf32>
    %94 = vector.extract_strided_slice %28 {offsets = [16, 0], sizes = [8, 32], strides = [1, 1]} : vector<32x32xf32> to vector<8x32xf32>
    %cst_37 = arith.constant dense<0.000000e+00> : vector<5x32xf32>
    %95 = tpu.matmul %93, %94, %cst_37 {dimension_numbers = #tpu.dot_dimension_numbers<[1], [0], [0], [1], [0, 0, 1, 1], [], []>} : vector<5x8xf32>, vector<8x32xf32>, vector<5x32xf32> -> vector<5x32xf32>
    %96 = arith.addf %76, %95 : vector<5x32xf32>
    %97 = vector.extract_strided_slice %33 {offsets = [0, 24], sizes = [5, 8], strides = [1, 1]} : vector<5x32xf32> to vector<5x8xf32>
    %98 = vector.extract_strided_slice %34 {offsets = [0, 24], sizes = [5, 8], strides = [1, 1]} : vector<5x32xf32> to vector<5x8xf32>
    %cst_38 = arith.constant dense<0.000000e+00> : vector<5x5xf32>
    %99 = tpu.matmul %97, %98, %cst_38 {dimension_numbers = #tpu.dot_dimension_numbers<[1], [1], [0], [0], [0, 0, 1, 0], [], []>} : vector<5x8xf32>, vector<5x8xf32>, vector<5x5xf32> -> vector<5x5xf32>
    %cst_39 = arith.constant 0.353553385 : f32
    %100 = vector.broadcast %cst_39 : f32 to vector<5x5xf32>
    %101 = arith.mulf %99, %100 : vector<5x5xf32>
    %cst_40 = arith.constant dense<0xFF800000> : vector<5xf32>
    %102 = vector.multi_reduction <maximumf>, %101, %cst_40 [1] : vector<5x5xf32> to vector<5xf32>
    %103 = vector.shape_cast %102 : vector<5xf32> to vector<5x1xf32>
    %104 = vector.broadcast %103 : vector<5x1xf32> to vector<5x5xf32>
    %105 = arith.subf %101, %104 : vector<5x5xf32>
    %106 = math.exp %105 : vector<5x5xf32>
    %cst_41 = arith.constant dense<0.000000e+00> : vector<5xf32>
    %107 = vector.multi_reduction <add>, %106, %cst_41 [1] : vector<5x5xf32> to vector<5xf32>
    %108 = vector.shape_cast %107 : vector<5xf32> to vector<5x1xf32>
    %109 = tpu.reciprocal %108 {approx = true} : vector<5x1xf32> -> vector<5x1xf32>
    %110 = vector.broadcast %109 : vector<5x1xf32> to vector<5x5xf32>
    %111 = arith.mulf %106, %110 : vector<5x5xf32>
    %112 = vector.extract_strided_slice %35 {offsets = [0, 24], sizes = [5, 8], strides = [1, 1]} : vector<5x32xf32> to vector<5x8xf32>
    %cst_42 = arith.constant dense<0.000000e+00> : vector<5x8xf32>
    %113 = tpu.matmul %111, %112, %cst_42 {dimension_numbers = #tpu.dot_dimension_numbers<[1], [0], [0], [1], [0, 0, 1, 1], [], []>} : vector<5x5xf32>, vector<5x8xf32>, vector<5x8xf32> -> vector<5x8xf32>
    %114 = vector.extract_strided_slice %28 {offsets = [24, 0], sizes = [8, 32], strides = [1, 1]} : vector<32x32xf32> to vector<8x32xf32>
    %cst_43 = arith.constant dense<0.000000e+00> : vector<5x32xf32>
    %115 = tpu.matmul %113, %114, %cst_43 {dimension_numbers = #tpu.dot_dimension_numbers<[1], [0], [0], [1], [0, 0, 1, 1], [], []>} : vector<5x8xf32>, vector<8x32xf32>, vector<5x32xf32> -> vector<5x32xf32>
    %116 = arith.addf %96, %115 : vector<5x32xf32>
    %117 = vector.broadcast %29 : vector<1x32xf32> to vector<5x32xf32>
    %118 = arith.addf %116, %117 : vector<5x32xf32>
    %119 = arith.addf %1, %118 : vector<5x32xf32>
    %c0_44 = arith.constant 0 : index
    %c0_45 = arith.constant 0 : index
    %120 = vector.load %arg8[%c0_44, %c0_45] : memref<1x32xf32, #tpu.memory_space<vmem>>, vector<1x32xf32>
    %c0_46 = arith.constant 0 : index
    %c0_47 = arith.constant 0 : index
    %121 = vector.load %arg9[%c0_46, %c0_47] : memref<1x32xf32, #tpu.memory_space<vmem>>, vector<1x32xf32>
    %cst_48 = arith.constant dense<0.000000e+00> : vector<5xf32>
    %122 = vector.multi_reduction <add>, %119, %cst_48 [1] : vector<5x32xf32> to vector<5xf32>
    %123 = vector.shape_cast %122 : vector<5xf32> to vector<5x1xf32>
    %cst_49 = arith.constant 3.200000e+01 : f32
    %124 = vector.broadcast %cst_49 : f32 to vector<5x1xf32>
    %125 = arith.divf %123, %124 : vector<5x1xf32>
    %126 = vector.broadcast %125 : vector<5x1xf32> to vector<5x32xf32>
    %127 = arith.subf %119, %126 : vector<5x32xf32>
    %128 = arith.mulf %127, %127 : vector<5x32xf32>
    %cst_50 = arith.constant dense<0.000000e+00> : vector<5xf32>
    %129 = vector.multi_reduction <add>, %128, %cst_50 [1] : vector<5x32xf32> to vector<5xf32>
    %130 = vector.shape_cast %129 : vector<5xf32> to vector<5x1xf32>
    %cst_51 = arith.constant 3.200000e+01 : f32
    %131 = vector.broadcast %cst_51 : f32 to vector<5x1xf32>
    %132 = arith.divf %130, %131 : vector<5x1xf32>
    %133 = vector.broadcast %125 : vector<5x1xf32> to vector<5x32xf32>
    %134 = arith.subf %119, %133 : vector<5x32xf32>
    %cst_52 = arith.constant 9.99999974E-6 : f32
    %135 = vector.broadcast %cst_52 : f32 to vector<5x1xf32>
    %136 = arith.addf %132, %135 : vector<5x1xf32>
    %137 = math.rsqrt %136 : vector<5x1xf32>
    %138 = vector.broadcast %137 : vector<5x1xf32> to vector<5x32xf32>
    %139 = arith.mulf %134, %138 : vector<5x32xf32>
    %140 = vector.broadcast %120 : vector<1x32xf32> to vector<5x32xf32>
    %141 = arith.mulf %139, %140 : vector<5x32xf32>
    %142 = vector.broadcast %121 : vector<1x32xf32> to vector<5x32xf32>
    %143 = arith.addf %141, %142 : vector<5x32xf32>
    %c0_53 = arith.constant 0 : index
    %c0_54 = arith.constant 0 : index
    %144 = vector.load %arg10[%c0_53, %c0_54] : memref<32x64xf32, #tpu.memory_space<vmem>>, vector<32x64xf32>
    %c0_55 = arith.constant 0 : index
    %c0_56 = arith.constant 0 : index
    %145 = vector.load %arg11[%c0_55, %c0_56] : memref<1x64xf32, #tpu.memory_space<vmem>>, vector<1x64xf32>
    %c0_57 = arith.constant 0 : index
    %c0_58 = arith.constant 0 : index
    %146 = vector.load %arg12[%c0_57, %c0_58] : memref<64x32xf32, #tpu.memory_space<vmem>>, vector<64x32xf32>
    %c0_59 = arith.constant 0 : index
    %c0_60 = arith.constant 0 : index
    %147 = vector.load %arg13[%c0_59, %c0_60] : memref<1x32xf32, #tpu.memory_space<vmem>>, vector<1x32xf32>
    %cst_61 = arith.constant dense<0.000000e+00> : vector<5x64xf32>
    %148 = tpu.matmul %143, %144, %cst_61 {dimension_numbers = #tpu.dot_dimension_numbers<[1], [0], [0], [1], [0, 0, 1, 1], [], []>} : vector<5x32xf32>, vector<32x64xf32>, vector<5x64xf32> -> vector<5x64xf32>
    %149 = vector.broadcast %145 : vector<1x64xf32> to vector<5x64xf32>
    %150 = arith.addf %148, %149 : vector<5x64xf32>
    %cst_62 = arith.constant 5.000000e-01 : f32
    %151 = vector.broadcast %cst_62 : f32 to vector<5x64xf32>
    %152 = arith.mulf %151, %150 : vector<5x64xf32>
    %cst_63 = arith.constant 4.471500e-02 : f32
    %153 = vector.broadcast %cst_63 : f32 to vector<5x64xf32>
    %154 = arith.mulf %153, %150 : vector<5x64xf32>
    %155 = arith.mulf %154, %150 : vector<5x64xf32>
    %156 = arith.mulf %155, %150 : vector<5x64xf32>
    %157 = arith.addf %150, %156 : vector<5x64xf32>
    %cst_64 = arith.constant 0.797884583 : f32
    %158 = vector.broadcast %cst_64 : f32 to vector<5x64xf32>
    %159 = arith.mulf %158, %157 : vector<5x64xf32>
    %160 = math.tanh %159 : vector<5x64xf32>
    %cst_65 = arith.constant 1.000000e+00 : f32
    %161 = vector.broadcast %cst_65 : f32 to vector<5x64xf32>
    %162 = arith.addf %161, %160 : vector<5x64xf32>
    %163 = arith.mulf %152, %162 : vector<5x64xf32>
    %cst_66 = arith.constant dense<0.000000e+00> : vector<5x32xf32>
    %164 = tpu.matmul %163, %146, %cst_66 {dimension_numbers = #tpu.dot_dimension_numbers<[1], [0], [0], [1], [0, 0, 1, 1], [], []>} : vector<5x64xf32>, vector<64x32xf32>, vector<5x32xf32> -> vector<5x32xf32>
    %165 = vector.broadcast %147 : vector<1x32xf32> to vector<5x32xf32>
    %166 = arith.addf %164, %165 : vector<5x32xf32>
    %167 = arith.addf %119, %166 : vector<5x32xf32>
    %c0_67 = arith.constant 0 : index
    %c0_68 = arith.constant 0 : index
    %c0_69 = arith.constant 0 : index
    %168 = vector.load %arg14[%c0_67, %c0_68, %c0_69] : memref<1x5x32xf32, #tpu.memory_space<vmem>>, vector<1x5x32xf32>
    %169 = vector.shape_cast %168 : vector<1x5x32xf32> to vector<5x32xf32>
    %170 = vector.shape_cast %167 : vector<5x32xf32> to vector<1x5x32xf32>
    tpu.vector_store %arg14[%c0_67, %c0_68, %c0_69], %170 {strides = array<i32>} : memref<1x5x32xf32, #tpu.memory_space<vmem>>, vector<1x5x32xf32>,
    return
  }
  func.func @transform_0(%arg0: i32) -> (i32, i32, i32) {
    %c0_i32 = arith.constant 0 : i32
    %c0_i32_0 = arith.constant 0 : i32
    %c0_i32_1 = arith.constant 0 : i32
    return %arg0, %c0_i32, %c0_i32_0 : i32, i32, i32
  }
  func.func @transform_1(%arg0: i32) -> (i32, i32) {
    %c0_i32 = arith.constant 0 : i32
    %c0_i32_0 = arith.constant 0 : i32
    %c0_i32_1 = arith.constant 0 : i32
    return %c0_i32, %c0_i32_0 : i32, i32
  }
  func.func @transform_2(%arg0: i32) -> (i32, i32) {
    %c0_i32 = arith.constant 0 : i32
    %c0_i32_0 = arith.constant 0 : i32
    %c0_i32_1 = arith.constant 0 : i32
    return %c0_i32, %c0_i32_0 : i32, i32
  }
  func.func @transform_3(%arg0: i32) -> (i32, i32) {
    %c0_i32 = arith.constant 0 : i32
    %c0_i32_0 = arith.constant 0 : i32
    %c0_i32_1 = arith.constant 0 : i32
    return %c0_i32, %c0_i32_0 : i32, i32
  }
  func.func @transform_4(%arg0: i32) -> (i32, i32) {
    %c0_i32 = arith.constant 0 : i32
    %c0_i32_0 = arith.constant 0 : i32
    %c0_i32_1 = arith.constant 0 : i32
    return %c0_i32, %c0_i32_0 : i32, i32
  }
  func.func @transform_5(%arg0: i32) -> (i32, i32) {
    %c0_i32 = arith.constant 0 : i32
    %c0_i32_0 = arith.constant 0 : i32
    %c0_i32_1 = arith.constant 0 : i32
    return %c0_i32, %c0_i32_0 : i32, i32
  }
  func.func @transform_6(%arg0: i32) -> (i32, i32) {
    %c0_i32 = arith.constant 0 : i32
    %c0_i32_0 = arith.constant 0 : i32
    %c0_i32_1 = arith.constant 0 : i32
    return %c0_i32, %c0_i32_0 : i32, i32
  }
  func.func @transform_7(%arg0: i32) -> (i32, i32) {
    %c0_i32 = arith.constant 0 : i32
    %c0_i32_0 = arith.constant 0 : i32
    %c0_i32_1 = arith.constant 0 : i32
    return %c0_i32, %c0_i32_0 : i32, i32
  }
  func.func @transform_8(%arg0: i32) -> (i32, i32) {
    %c0_i32 = arith.constant 0 : i32
    %c0_i32_0 = arith.constant 0 : i32
    %c0_i32_1 = arith.constant 0 : i32
    return %c0_i32, %c0_i32_0 : i32, i32
  }
  func.func @transform_9(%arg0: i32) -> (i32, i32) {
    %c0_i32 = arith.constant 0 : i32
    %c0_i32_0 = arith.constant 0 : i32
    %c0_i32_1 = arith.constant 0 : i32
    return %c0_i32, %c0_i32_0 : i32, i32
  }
  func.func @transform_10(%arg0: i32) -> (i32, i32) {
    %c0_i32 = arith.constant 0 : i32
    %c0_i32_0 = arith.constant 0 : i32
    %c0_i32_1 = arith.constant 0 : i32
    return %c0_i32, %c0_i32_0 : i32, i32
  }
  func.func @transform_11(%arg0: i32) -> (i32, i32) {
    %c0_i32 = arith.constant 0 : i32
    %c0_i32_0 = arith.constant 0 : i32
    %c0_i32_1 = arith.constant 0 : i32
    return %c0_i32, %c0_i32_0 : i32, i32
  }
  func.func @transform_12(%arg0: i32) -> (i32, i32) {
    %c0_i32 = arith.constant 0 : i32
    %c0_i32_0 = arith.constant 0 : i32
    %c0_i32_1 = arith.constant 0 : i32
    return %c0_i32, %c0_i32_0 : i32, i32
  }
  func.func @transform_13(%arg0: i32) -> (i32, i32, i32) {
    %c0_i32 = arith.constant 0 : i32
    %c0_i32_0 = arith.constant 0 : i32
    %c0_i32_1 = arith.constant 0 : i32
    return %arg0, %c0_i32, %c0_i32_0 : i32, i32, i32
  }
}

module attributes {stable_mosaic.version = 11 : i64} {
  func.func @_fusion_block_kernel(%arg0: i32, %arg1: memref<1x4x32xf32, #tpu.memory_space<vmem>>, %arg2: memref<1x4x32xf32, #tpu.memory_space<vmem>>, %arg3: memref<1x32xf32, #tpu.memory_space<vmem>>, %arg4: memref<1x32xf32, #tpu.memory_space<vmem>>, %arg5: memref<1x32xf32, #tpu.memory_space<vmem>>, %arg6: memref<1x32xf32, #tpu.memory_space<vmem>>, %arg7: memref<32x96xf32, #tpu.memory_space<vmem>>, %arg8: memref<1x96xf32, #tpu.memory_space<vmem>>, %arg9: memref<32x32xf32, #tpu.memory_space<vmem>>, %arg10: memref<1x32xf32, #tpu.memory_space<vmem>>, %arg11: memref<1x32xf32, #tpu.memory_space<vmem>>, %arg12: memref<1x32xf32, #tpu.memory_space<vmem>>, %arg13: memref<1x32xf32, #tpu.memory_space<vmem>>, %arg14: memref<1x32xf32, #tpu.memory_space<vmem>>, %arg15: memref<32x96xf32, #tpu.memory_space<vmem>>, %arg16: memref<1x96xf32, #tpu.memory_space<vmem>>, %arg17: memref<32x32xf32, #tpu.memory_space<vmem>>, %arg18: memref<1x32xf32, #tpu.memory_space<vmem>>, %arg19: memref<1x32xf32, #tpu.memory_space<vmem>>, %arg20: memref<1x32xf32, #tpu.memory_space<vmem>>, %arg21: memref<32x64xf32, #tpu.memory_space<vmem>>, %arg22: memref<1x64xf32, #tpu.memory_space<vmem>>, %arg23: memref<64x32xf32, #tpu.memory_space<vmem>>, %arg24: memref<1x32xf32, #tpu.memory_space<vmem>>, %arg25: memref<1x32xf32, #tpu.memory_space<vmem>>, %arg26: memref<1x32xf32, #tpu.memory_space<vmem>>, %arg27: memref<32x64xf32, #tpu.memory_space<vmem>>, %arg28: memref<1x64xf32, #tpu.memory_space<vmem>>, %arg29: memref<64x32xf32, #tpu.memory_space<vmem>>, %arg30: memref<1x32xf32, #tpu.memory_space<vmem>>, %arg31: memref<1x4x32xf32, #tpu.memory_space<vmem>>, %arg32: memref<1x4x32xf32, #tpu.memory_space<vmem>>) attributes {dimension_semantics = [#tpu.dimension_semantics<parallel>], iteration_bounds = array<i64: 2>, scalar_prefetch = 0 : i64, scratch_operands = 0 : i64, tpu.core_type = #tpu.core_type<tc>, window_params = [{transform_indices = @transform_0, window_bounds = array<i64: 1, 4, 32>}, {transform_indices = @transform_1, window_bounds = array<i64: 1, 4, 32>}, {pipeline_mode = #tpu.pipeline_mode<synchronous>, transform_indices = @transform_2, window_bounds = array<i64: 1, 32>}, {pipeline_mode = #tpu.pipeline_mode<synchronous>, transform_indices = @transform_3, window_bounds = array<i64: 1, 32>}, {pipeline_mode = #tpu.pipeline_mode<synchronous>, transform_indices = @transform_4, window_bounds = array<i64: 1, 32>}, {pipeline_mode = #tpu.pipeline_mode<synchronous>, transform_indices = @transform_5, window_bounds = array<i64: 1, 32>}, {pipeline_mode = #tpu.pipeline_mode<synchronous>, transform_indices = @transform_6, window_bounds = array<i64: 32, 96>}, {pipeline_mode = #tpu.pipeline_mode<synchronous>, transform_indices = @transform_7, window_bounds = array<i64: 1, 96>}, {pipeline_mode = #tpu.pipeline_mode<synchronous>, transform_indices = @transform_8, window_bounds = array<i64: 32, 32>}, {pipeline_mode = #tpu.pipeline_mode<synchronous>, transform_indices = @transform_9, window_bounds = array<i64: 1, 32>}, {pipeline_mode = #tpu.pipeline_mode<synchronous>, transform_indices = @transform_10, window_bounds = array<i64: 1, 32>}, {pipeline_mode = #tpu.pipeline_mode<synchronous>, transform_indices = @transform_11, window_bounds = array<i64: 1, 32>}, {pipeline_mode = #tpu.pipeline_mode<synchronous>, transform_indices = @transform_12, window_bounds = array<i64: 1, 32>}, {pipeline_mode = #tpu.pipeline_mode<synchronous>, transform_indices = @transform_13, window_bounds = array<i64: 1, 32>}, {pipeline_mode = #tpu.pipeline_mode<synchronous>, transform_indices = @transform_14, window_bounds = array<i64: 32, 96>}, {pipeline_mode = #tpu.pipeline_mode<synchronous>, transform_indices = @transform_15, window_bounds = array<i64: 1, 96>}, {pipeline_mode = #tpu.pipeline_mode<synchronous>, transform_indices = @transform_16, window_bounds = array<i64: 32, 32>}, {pipeline_mode = #tpu.pipeline_mode<synchronous>, transform_indices = @transform_17, window_bounds = array<i64: 1, 32>}, {pipeline_mode = #tpu.pipeline_mode<synchronous>, transform_indices = @transform_18, window_bounds = array<i64: 1, 32>}, {pipeline_mode = #tpu.pipeline_mode<synchronous>, transform_indices = @transform_19, window_bounds = array<i64: 1, 32>}, {pipeline_mode = #tpu.pipeline_mode<synchronous>, transform_indices = @transform_20, window_bounds = array<i64: 32, 64>}, {pipeline_mode = #tpu.pipeline_mode<synchronous>, transform_indices = @transform_21, window_bounds = array<i64: 1, 64>}, {pipeline_mode = #tpu.pipeline_mode<synchronous>, transform_indices = @transform_22, window_bounds = array<i64: 64, 32>}, {pipeline_mode = #tpu.pipeline_mode<synchronous>, transform_indices = @transform_23, window_bounds = array<i64: 1, 32>}, {pipeline_mode = #tpu.pipeline_mode<synchronous>, transform_indices = @transform_24, window_bounds = array<i64: 1, 32>}, {pipeline_mode = #tpu.pipeline_mode<synchronous>, transform_indices = @transform_25, window_bounds = array<i64: 1, 32>}, {pipeline_mode = #tpu.pipeline_mode<synchronous>, transform_indices = @transform_26, window_bounds = array<i64: 32, 64>}, {pipeline_mode = #tpu.pipeline_mode<synchronous>, transform_indices = @transform_27, window_bounds = array<i64: 1, 64>}, {pipeline_mode = #tpu.pipeline_mode<synchronous>, transform_indices = @transform_28, window_bounds = array<i64: 64, 32>}, {pipeline_mode = #tpu.pipeline_mode<synchronous>, transform_indices = @transform_29, window_bounds = array<i64: 1, 32>}, {transform_indices = @transform_30, window_bounds = array<i64: 1, 4, 32>}, {transform_indices = @transform_31, window_bounds = array<i64: 1, 4, 32>}]} {
    %c0 = arith.constant 0 : index
    %c0_0 = arith.constant 0 : index
    %c0_1 = arith.constant 0 : index
    %0 = vector.load %arg1[%c0, %c0_0, %c0_1] : memref<1x4x32xf32, #tpu.memory_space<vmem>>, vector<1x4x32xf32>
    %1 = vector.shape_cast %0 : vector<1x4x32xf32> to vector<4x32xf32>
    %c0_2 = arith.constant 0 : index
    %c0_3 = arith.constant 0 : index
    %c0_4 = arith.constant 0 : index
    %2 = vector.load %arg2[%c0_2, %c0_3, %c0_4] : memref<1x4x32xf32, #tpu.memory_space<vmem>>, vector<1x4x32xf32>
    %3 = vector.shape_cast %2 : vector<1x4x32xf32> to vector<4x32xf32>
    %c0_5 = arith.constant 0 : index
    %c0_6 = arith.constant 0 : index
    %4 = vector.load %arg3[%c0_5, %c0_6] : memref<1x32xf32, #tpu.memory_space<vmem>>, vector<1x32xf32>
    %c0_7 = arith.constant 0 : index
    %c0_8 = arith.constant 0 : index
    %5 = vector.load %arg4[%c0_7, %c0_8] : memref<1x32xf32, #tpu.memory_space<vmem>>, vector<1x32xf32>
    %cst = arith.constant dense<0.000000e+00> : vector<4xf32>
    %6 = vector.multi_reduction <add>, %1, %cst [1] : vector<4x32xf32> to vector<4xf32>
    %7 = vector.shape_cast %6 : vector<4xf32> to vector<4x1xf32>
    %cst_9 = arith.constant 3.200000e+01 : f32
    %8 = vector.broadcast %cst_9 : f32 to vector<4x1xf32>
    %9 = arith.divf %7, %8 : vector<4x1xf32>
    %10 = vector.broadcast %9 : vector<4x1xf32> to vector<4x32xf32>
    %11 = arith.subf %1, %10 : vector<4x32xf32>
    %12 = arith.mulf %11, %11 : vector<4x32xf32>
    %cst_10 = arith.constant dense<0.000000e+00> : vector<4xf32>
    %13 = vector.multi_reduction <add>, %12, %cst_10 [1] : vector<4x32xf32> to vector<4xf32>
    %14 = vector.shape_cast %13 : vector<4xf32> to vector<4x1xf32>
    %cst_11 = arith.constant 3.200000e+01 : f32
    %15 = vector.broadcast %cst_11 : f32 to vector<4x1xf32>
    %16 = arith.divf %14, %15 : vector<4x1xf32>
    %17 = vector.broadcast %9 : vector<4x1xf32> to vector<4x32xf32>
    %18 = arith.subf %1, %17 : vector<4x32xf32>
    %cst_12 = arith.constant 9.99999974E-6 : f32
    %19 = vector.broadcast %cst_12 : f32 to vector<4x1xf32>
    %20 = arith.addf %16, %19 : vector<4x1xf32>
    %21 = math.rsqrt %20 : vector<4x1xf32>
    %22 = vector.broadcast %21 : vector<4x1xf32> to vector<4x32xf32>
    %23 = arith.mulf %18, %22 : vector<4x32xf32>
    %24 = vector.broadcast %4 : vector<1x32xf32> to vector<4x32xf32>
    %25 = arith.mulf %23, %24 : vector<4x32xf32>
    %26 = vector.broadcast %5 : vector<1x32xf32> to vector<4x32xf32>
    %27 = arith.addf %25, %26 : vector<4x32xf32>
    %c0_13 = arith.constant 0 : index
    %c0_14 = arith.constant 0 : index
    %28 = vector.load %arg5[%c0_13, %c0_14] : memref<1x32xf32, #tpu.memory_space<vmem>>, vector<1x32xf32>
    %c0_15 = arith.constant 0 : index
    %c0_16 = arith.constant 0 : index
    %29 = vector.load %arg6[%c0_15, %c0_16] : memref<1x32xf32, #tpu.memory_space<vmem>>, vector<1x32xf32>
    %cst_17 = arith.constant dense<0.000000e+00> : vector<4xf32>
    %30 = vector.multi_reduction <add>, %3, %cst_17 [1] : vector<4x32xf32> to vector<4xf32>
    %31 = vector.shape_cast %30 : vector<4xf32> to vector<4x1xf32>
    %cst_18 = arith.constant 3.200000e+01 : f32
    %32 = vector.broadcast %cst_18 : f32 to vector<4x1xf32>
    %33 = arith.divf %31, %32 : vector<4x1xf32>
    %34 = vector.broadcast %33 : vector<4x1xf32> to vector<4x32xf32>
    %35 = arith.subf %3, %34 : vector<4x32xf32>
    %36 = arith.mulf %35, %35 : vector<4x32xf32>
    %cst_19 = arith.constant dense<0.000000e+00> : vector<4xf32>
    %37 = vector.multi_reduction <add>, %36, %cst_19 [1] : vector<4x32xf32> to vector<4xf32>
    %38 = vector.shape_cast %37 : vector<4xf32> to vector<4x1xf32>
    %cst_20 = arith.constant 3.200000e+01 : f32
    %39 = vector.broadcast %cst_20 : f32 to vector<4x1xf32>
    %40 = arith.divf %38, %39 : vector<4x1xf32>
    %41 = vector.broadcast %33 : vector<4x1xf32> to vector<4x32xf32>
    %42 = arith.subf %3, %41 : vector<4x32xf32>
    %cst_21 = arith.constant 9.99999974E-6 : f32
    %43 = vector.broadcast %cst_21 : f32 to vector<4x1xf32>
    %44 = arith.addf %40, %43 : vector<4x1xf32>
    %45 = math.rsqrt %44 : vector<4x1xf32>
    %46 = vector.broadcast %45 : vector<4x1xf32> to vector<4x32xf32>
    %47 = arith.mulf %42, %46 : vector<4x32xf32>
    %48 = vector.broadcast %28 : vector<1x32xf32> to vector<4x32xf32>
    %49 = arith.mulf %47, %48 : vector<4x32xf32>
    %50 = vector.broadcast %29 : vector<1x32xf32> to vector<4x32xf32>
    %51 = arith.addf %49, %50 : vector<4x32xf32>
    %c0_22 = arith.constant 0 : index
    %c0_23 = arith.constant 0 : index
    %52 = vector.load %arg7[%c0_22, %c0_23] : memref<32x96xf32, #tpu.memory_space<vmem>>, vector<32x96xf32>
    %c0_24 = arith.constant 0 : index
    %c0_25 = arith.constant 0 : index
    %53 = vector.load %arg8[%c0_24, %c0_25] : memref<1x96xf32, #tpu.memory_space<vmem>>, vector<1x96xf32>
    %c0_26 = arith.constant 0 : index
    %c0_27 = arith.constant 0 : index
    %54 = vector.load %arg9[%c0_26, %c0_27] : memref<32x32xf32, #tpu.memory_space<vmem>>, vector<32x32xf32>
    %c0_28 = arith.constant 0 : index
    %c0_29 = arith.constant 0 : index
    %55 = vector.load %arg10[%c0_28, %c0_29] : memref<1x32xf32, #tpu.memory_space<vmem>>, vector<1x32xf32>
    %56 = vector.extract_strided_slice %52 {offsets = [0, 0], sizes = [32, 32], strides = [1, 1]} : vector<32x96xf32> to vector<32x32xf32>
    %cst_30 = arith.constant dense<0.000000e+00> : vector<4x32xf32>
    %57 = tpu.matmul %27, %56, %cst_30 {dimension_numbers = #tpu.dot_dimension_numbers<[1], [0], [0], [1], [0, 0, 1, 1], [], []>} : vector<4x32xf32>, vector<32x32xf32>, vector<4x32xf32> -> vector<4x32xf32>
    %58 = vector.extract_strided_slice %53 {offsets = [0, 0], sizes = [1, 32], strides = [1, 1]} : vector<1x96xf32> to vector<1x32xf32>
    %59 = vector.broadcast %58 : vector<1x32xf32> to vector<4x32xf32>
    %60 = arith.addf %57, %59 : vector<4x32xf32>
    %61 = vector.extract_strided_slice %52 {offsets = [0, 32], sizes = [32, 64], strides = [1, 1]} : vector<32x96xf32> to vector<32x64xf32>
    %cst_31 = arith.constant dense<0.000000e+00> : vector<4x64xf32>
    %62 = tpu.matmul %51, %61, %cst_31 {dimension_numbers = #tpu.dot_dimension_numbers<[1], [0], [0], [1], [0, 0, 1, 1], [], []>} : vector<4x32xf32>, vector<32x64xf32>, vector<4x64xf32> -> vector<4x64xf32>
    %63 = vector.extract_strided_slice %53 {offsets = [0, 32], sizes = [1, 64], strides = [1, 1]} : vector<1x96xf32> to vector<1x64xf32>
    %64 = vector.broadcast %63 : vector<1x64xf32> to vector<4x64xf32>
    %65 = arith.addf %62, %64 : vector<4x64xf32>
    %66 = vector.extract_strided_slice %65 {offsets = [0, 0], sizes = [4, 32], strides = [1, 1]} : vector<4x64xf32> to vector<4x32xf32>
    %67 = vector.extract_strided_slice %65 {offsets = [0, 32], sizes = [4, 32], strides = [1, 1]} : vector<4x64xf32> to vector<4x32xf32>
    %cst_32 = arith.constant 0.000000e+00 : f32
    %68 = vector.broadcast %cst_32 : f32 to vector<4x32xf32>
    %69 = vector.extract_strided_slice %60 {offsets = [0, 0], sizes = [4, 8], strides = [1, 1]} : vector<4x32xf32> to vector<4x8xf32>
    %70 = vector.extract_strided_slice %66 {offsets = [0, 0], sizes = [4, 8], strides = [1, 1]} : vector<4x32xf32> to vector<4x8xf32>
    %cst_33 = arith.constant dense<0.000000e+00> : vector<4x4xf32>
    %71 = tpu.matmul %69, %70, %cst_33 {dimension_numbers = #tpu.dot_dimension_numbers<[1], [1], [0], [0], [0, 0, 1, 0], [], []>} : vector<4x8xf32>, vector<4x8xf32>, vector<4x4xf32> -> vector<4x4xf32>
    %cst_34 = arith.constant 0.353553385 : f32
    %72 = vector.broadcast %cst_34 : f32 to vector<4x4xf32>
    %73 = arith.mulf %71, %72 : vector<4x4xf32>
    %cst_35 = arith.constant dense<0xFF800000> : vector<4xf32>
    %74 = vector.multi_reduction <maximumf>, %73, %cst_35 [1] : vector<4x4xf32> to vector<4xf32>
    %75 = vector.shape_cast %74 : vector<4xf32> to vector<4x1xf32>
    %76 = vector.broadcast %75 : vector<4x1xf32> to vector<4x4xf32>
    %77 = arith.subf %73, %76 : vector<4x4xf32>
    %78 = math.exp %77 : vector<4x4xf32>
    %cst_36 = arith.constant dense<0.000000e+00> : vector<4xf32>
    %79 = vector.multi_reduction <add>, %78, %cst_36 [1] : vector<4x4xf32> to vector<4xf32>
    %80 = vector.shape_cast %79 : vector<4xf32> to vector<4x1xf32>
    %81 = tpu.reciprocal %80 {approx = true} : vector<4x1xf32> -> vector<4x1xf32>
    %82 = vector.broadcast %81 : vector<4x1xf32> to vector<4x4xf32>
    %83 = arith.mulf %78, %82 : vector<4x4xf32>
    %84 = vector.extract_strided_slice %67 {offsets = [0, 0], sizes = [4, 8], strides = [1, 1]} : vector<4x32xf32> to vector<4x8xf32>
    %cst_37 = arith.constant dense<0.000000e+00> : vector<4x8xf32>
    %85 = tpu.matmul %83, %84, %cst_37 {dimension_numbers = #tpu.dot_dimension_numbers<[1], [0], [0], [1], [0, 0, 1, 1], [], []>} : vector<4x4xf32>, vector<4x8xf32>, vector<4x8xf32> -> vector<4x8xf32>
    %86 = vector.extract_strided_slice %54 {offsets = [0, 0], sizes = [8, 32], strides = [1, 1]} : vector<32x32xf32> to vector<8x32xf32>
    %cst_38 = arith.constant dense<0.000000e+00> : vector<4x32xf32>
    %87 = tpu.matmul %85, %86, %cst_38 {dimension_numbers = #tpu.dot_dimension_numbers<[1], [0], [0], [1], [0, 0, 1, 1], [], []>} : vector<4x8xf32>, vector<8x32xf32>, vector<4x32xf32> -> vector<4x32xf32>
    %88 = arith.addf %68, %87 : vector<4x32xf32>
    %89 = vector.extract_strided_slice %60 {offsets = [0, 8], sizes = [4, 8], strides = [1, 1]} : vector<4x32xf32> to vector<4x8xf32>
    %90 = vector.extract_strided_slice %66 {offsets = [0, 8], sizes = [4, 8], strides = [1, 1]} : vector<4x32xf32> to vector<4x8xf32>
    %cst_39 = arith.constant dense<0.000000e+00> : vector<4x4xf32>
    %91 = tpu.matmul %89, %90, %cst_39 {dimension_numbers = #tpu.dot_dimension_numbers<[1], [1], [0], [0], [0, 0, 1, 0], [], []>} : vector<4x8xf32>, vector<4x8xf32>, vector<4x4xf32> -> vector<4x4xf32>
    %cst_40 = arith.constant 0.353553385 : f32
    %92 = vector.broadcast %cst_40 : f32 to vector<4x4xf32>
    %93 = arith.mulf %91, %92 : vector<4x4xf32>
    %cst_41 = arith.constant dense<0xFF800000> : vector<4xf32>
    %94 = vector.multi_reduction <maximumf>, %93, %cst_41 [1] : vector<4x4xf32> to vector<4xf32>
    %95 = vector.shape_cast %94 : vector<4xf32> to vector<4x1xf32>
    %96 = vector.broadcast %95 : vector<4x1xf32> to vector<4x4xf32>
    %97 = arith.subf %93, %96 : vector<4x4xf32>
    %98 = math.exp %97 : vector<4x4xf32>
    %cst_42 = arith.constant dense<0.000000e+00> : vector<4xf32>
    %99 = vector.multi_reduction <add>, %98, %cst_42 [1] : vector<4x4xf32> to vector<4xf32>
    %100 = vector.shape_cast %99 : vector<4xf32> to vector<4x1xf32>
    %101 = tpu.reciprocal %100 {approx = true} : vector<4x1xf32> -> vector<4x1xf32>
    %102 = vector.broadcast %101 : vector<4x1xf32> to vector<4x4xf32>
    %103 = arith.mulf %98, %102 : vector<4x4xf32>
    %104 = vector.extract_strided_slice %67 {offsets = [0, 8], sizes = [4, 8], strides = [1, 1]} : vector<4x32xf32> to vector<4x8xf32>
    %cst_43 = arith.constant dense<0.000000e+00> : vector<4x8xf32>
    %105 = tpu.matmul %103, %104, %cst_43 {dimension_numbers = #tpu.dot_dimension_numbers<[1], [0], [0], [1], [0, 0, 1, 1], [], []>} : vector<4x4xf32>, vector<4x8xf32>, vector<4x8xf32> -> vector<4x8xf32>
    %106 = vector.extract_strided_slice %54 {offsets = [8, 0], sizes = [8, 32], strides = [1, 1]} : vector<32x32xf32> to vector<8x32xf32>
    %cst_44 = arith.constant dense<0.000000e+00> : vector<4x32xf32>
    %107 = tpu.matmul %105, %106, %cst_44 {dimension_numbers = #tpu.dot_dimension_numbers<[1], [0], [0], [1], [0, 0, 1, 1], [], []>} : vector<4x8xf32>, vector<8x32xf32>, vector<4x32xf32> -> vector<4x32xf32>
    %108 = arith.addf %88, %107 : vector<4x32xf32>
    %109 = vector.extract_strided_slice %60 {offsets = [0, 16], sizes = [4, 8], strides = [1, 1]} : vector<4x32xf32> to vector<4x8xf32>
    %110 = vector.extract_strided_slice %66 {offsets = [0, 16], sizes = [4, 8], strides = [1, 1]} : vector<4x32xf32> to vector<4x8xf32>
    %cst_45 = arith.constant dense<0.000000e+00> : vector<4x4xf32>
    %111 = tpu.matmul %109, %110, %cst_45 {dimension_numbers = #tpu.dot_dimension_numbers<[1], [1], [0], [0], [0, 0, 1, 0], [], []>} : vector<4x8xf32>, vector<4x8xf32>, vector<4x4xf32> -> vector<4x4xf32>
    %cst_46 = arith.constant 0.353553385 : f32
    %112 = vector.broadcast %cst_46 : f32 to vector<4x4xf32>
    %113 = arith.mulf %111, %112 : vector<4x4xf32>
    %cst_47 = arith.constant dense<0xFF800000> : vector<4xf32>
    %114 = vector.multi_reduction <maximumf>, %113, %cst_47 [1] : vector<4x4xf32> to vector<4xf32>
    %115 = vector.shape_cast %114 : vector<4xf32> to vector<4x1xf32>
    %116 = vector.broadcast %115 : vector<4x1xf32> to vector<4x4xf32>
    %117 = arith.subf %113, %116 : vector<4x4xf32>
    %118 = math.exp %117 : vector<4x4xf32>
    %cst_48 = arith.constant dense<0.000000e+00> : vector<4xf32>
    %119 = vector.multi_reduction <add>, %118, %cst_48 [1] : vector<4x4xf32> to vector<4xf32>
    %120 = vector.shape_cast %119 : vector<4xf32> to vector<4x1xf32>
    %121 = tpu.reciprocal %120 {approx = true} : vector<4x1xf32> -> vector<4x1xf32>
    %122 = vector.broadcast %121 : vector<4x1xf32> to vector<4x4xf32>
    %123 = arith.mulf %118, %122 : vector<4x4xf32>
    %124 = vector.extract_strided_slice %67 {offsets = [0, 16], sizes = [4, 8], strides = [1, 1]} : vector<4x32xf32> to vector<4x8xf32>
    %cst_49 = arith.constant dense<0.000000e+00> : vector<4x8xf32>
    %125 = tpu.matmul %123, %124, %cst_49 {dimension_numbers = #tpu.dot_dimension_numbers<[1], [0], [0], [1], [0, 0, 1, 1], [], []>} : vector<4x4xf32>, vector<4x8xf32>, vector<4x8xf32> -> vector<4x8xf32>
    %126 = vector.extract_strided_slice %54 {offsets = [16, 0], sizes = [8, 32], strides = [1, 1]} : vector<32x32xf32> to vector<8x32xf32>
    %cst_50 = arith.constant dense<0.000000e+00> : vector<4x32xf32>
    %127 = tpu.matmul %125, %126, %cst_50 {dimension_numbers = #tpu.dot_dimension_numbers<[1], [0], [0], [1], [0, 0, 1, 1], [], []>} : vector<4x8xf32>, vector<8x32xf32>, vector<4x32xf32> -> vector<4x32xf32>
    %128 = arith.addf %108, %127 : vector<4x32xf32>
    %129 = vector.extract_strided_slice %60 {offsets = [0, 24], sizes = [4, 8], strides = [1, 1]} : vector<4x32xf32> to vector<4x8xf32>
    %130 = vector.extract_strided_slice %66 {offsets = [0, 24], sizes = [4, 8], strides = [1, 1]} : vector<4x32xf32> to vector<4x8xf32>
    %cst_51 = arith.constant dense<0.000000e+00> : vector<4x4xf32>
    %131 = tpu.matmul %129, %130, %cst_51 {dimension_numbers = #tpu.dot_dimension_numbers<[1], [1], [0], [0], [0, 0, 1, 0], [], []>} : vector<4x8xf32>, vector<4x8xf32>, vector<4x4xf32> -> vector<4x4xf32>
    %cst_52 = arith.constant 0.353553385 : f32
    %132 = vector.broadcast %cst_52 : f32 to vector<4x4xf32>
    %133 = arith.mulf %131, %132 : vector<4x4xf32>
    %cst_53 = arith.constant dense<0xFF800000> : vector<4xf32>
    %134 = vector.multi_reduction <maximumf>, %133, %cst_53 [1] : vector<4x4xf32> to vector<4xf32>
    %135 = vector.shape_cast %134 : vector<4xf32> to vector<4x1xf32>
    %136 = vector.broadcast %135 : vector<4x1xf32> to vector<4x4xf32>
    %137 = arith.subf %133, %136 : vector<4x4xf32>
    %138 = math.exp %137 : vector<4x4xf32>
    %cst_54 = arith.constant dense<0.000000e+00> : vector<4xf32>
    %139 = vector.multi_reduction <add>, %138, %cst_54 [1] : vector<4x4xf32> to vector<4xf32>
    %140 = vector.shape_cast %139 : vector<4xf32> to vector<4x1xf32>
    %141 = tpu.reciprocal %140 {approx = true} : vector<4x1xf32> -> vector<4x1xf32>
    %142 = vector.broadcast %141 : vector<4x1xf32> to vector<4x4xf32>
    %143 = arith.mulf %138, %142 : vector<4x4xf32>
    %144 = vector.extract_strided_slice %67 {offsets = [0, 24], sizes = [4, 8], strides = [1, 1]} : vector<4x32xf32> to vector<4x8xf32>
    %cst_55 = arith.constant dense<0.000000e+00> : vector<4x8xf32>
    %145 = tpu.matmul %143, %144, %cst_55 {dimension_numbers = #tpu.dot_dimension_numbers<[1], [0], [0], [1], [0, 0, 1, 1], [], []>} : vector<4x4xf32>, vector<4x8xf32>, vector<4x8xf32> -> vector<4x8xf32>
    %146 = vector.extract_strided_slice %54 {offsets = [24, 0], sizes = [8, 32], strides = [1, 1]} : vector<32x32xf32> to vector<8x32xf32>
    %cst_56 = arith.constant dense<0.000000e+00> : vector<4x32xf32>
    %147 = tpu.matmul %145, %146, %cst_56 {dimension_numbers = #tpu.dot_dimension_numbers<[1], [0], [0], [1], [0, 0, 1, 1], [], []>} : vector<4x8xf32>, vector<8x32xf32>, vector<4x32xf32> -> vector<4x32xf32>
    %148 = arith.addf %128, %147 : vector<4x32xf32>
    %149 = vector.broadcast %55 : vector<1x32xf32> to vector<4x32xf32>
    %150 = arith.addf %148, %149 : vector<4x32xf32>
    %151 = arith.addf %1, %150 : vector<4x32xf32>
    %c0_57 = arith.constant 0 : index
    %c0_58 = arith.constant 0 : index
    %152 = vector.load %arg11[%c0_57, %c0_58] : memref<1x32xf32, #tpu.memory_space<vmem>>, vector<1x32xf32>
    %c0_59 = arith.constant 0 : index
    %c0_60 = arith.constant 0 : index
    %153 = vector.load %arg12[%c0_59, %c0_60] : memref<1x32xf32, #tpu.memory_space<vmem>>, vector<1x32xf32>
    %cst_61 = arith.constant dense<0.000000e+00> : vector<4xf32>
    %154 = vector.multi_reduction <add>, %3, %cst_61 [1] : vector<4x32xf32> to vector<4xf32>
    %155 = vector.shape_cast %154 : vector<4xf32> to vector<4x1xf32>
    %cst_62 = arith.constant 3.200000e+01 : f32
    %156 = vector.broadcast %cst_62 : f32 to vector<4x1xf32>
    %157 = arith.divf %155, %156 : vector<4x1xf32>
    %158 = vector.broadcast %157 : vector<4x1xf32> to vector<4x32xf32>
    %159 = arith.subf %3, %158 : vector<4x32xf32>
    %160 = arith.mulf %159, %159 : vector<4x32xf32>
    %cst_63 = arith.constant dense<0.000000e+00> : vector<4xf32>
    %161 = vector.multi_reduction <add>, %160, %cst_63 [1] : vector<4x32xf32> to vector<4xf32>
    %162 = vector.shape_cast %161 : vector<4xf32> to vector<4x1xf32>
    %cst_64 = arith.constant 3.200000e+01 : f32
    %163 = vector.broadcast %cst_64 : f32 to vector<4x1xf32>
    %164 = arith.divf %162, %163 : vector<4x1xf32>
    %165 = vector.broadcast %157 : vector<4x1xf32> to vector<4x32xf32>
    %166 = arith.subf %3, %165 : vector<4x32xf32>
    %cst_65 = arith.constant 9.99999974E-6 : f32
    %167 = vector.broadcast %cst_65 : f32 to vector<4x1xf32>
    %168 = arith.addf %164, %167 : vector<4x1xf32>
    %169 = math.rsqrt %168 : vector<4x1xf32>
    %170 = vector.broadcast %169 : vector<4x1xf32> to vector<4x32xf32>
    %171 = arith.mulf %166, %170 : vector<4x32xf32>
    %172 = vector.broadcast %152 : vector<1x32xf32> to vector<4x32xf32>
    %173 = arith.mulf %171, %172 : vector<4x32xf32>
    %174 = vector.broadcast %153 : vector<1x32xf32> to vector<4x32xf32>
    %175 = arith.addf %173, %174 : vector<4x32xf32>
    %c0_66 = arith.constant 0 : index
    %c0_67 = arith.constant 0 : index
    %176 = vector.load %arg13[%c0_66, %c0_67] : memref<1x32xf32, #tpu.memory_space<vmem>>, vector<1x32xf32>
    %c0_68 = arith.constant 0 : index
    %c0_69 = arith.constant 0 : index
    %177 = vector.load %arg14[%c0_68, %c0_69] : memref<1x32xf32, #tpu.memory_space<vmem>>, vector<1x32xf32>
    %cst_70 = arith.constant dense<0.000000e+00> : vector<4xf32>
    %178 = vector.multi_reduction <add>, %151, %cst_70 [1] : vector<4x32xf32> to vector<4xf32>
    %179 = vector.shape_cast %178 : vector<4xf32> to vector<4x1xf32>
    %cst_71 = arith.constant 3.200000e+01 : f32
    %180 = vector.broadcast %cst_71 : f32 to vector<4x1xf32>
    %181 = arith.divf %179, %180 : vector<4x1xf32>
    %182 = vector.broadcast %181 : vector<4x1xf32> to vector<4x32xf32>
    %183 = arith.subf %151, %182 : vector<4x32xf32>
    %184 = arith.mulf %183, %183 : vector<4x32xf32>
    %cst_72 = arith.constant dense<0.000000e+00> : vector<4xf32>
    %185 = vector.multi_reduction <add>, %184, %cst_72 [1] : vector<4x32xf32> to vector<4xf32>
    %186 = vector.shape_cast %185 : vector<4xf32> to vector<4x1xf32>
    %cst_73 = arith.constant 3.200000e+01 : f32
    %187 = vector.broadcast %cst_73 : f32 to vector<4x1xf32>
    %188 = arith.divf %186, %187 : vector<4x1xf32>
    %189 = vector.broadcast %181 : vector<4x1xf32> to vector<4x32xf32>
    %190 = arith.subf %151, %189 : vector<4x32xf32>
    %cst_74 = arith.constant 9.99999974E-6 : f32
    %191 = vector.broadcast %cst_74 : f32 to vector<4x1xf32>
    %192 = arith.addf %188, %191 : vector<4x1xf32>
    %193 = math.rsqrt %192 : vector<4x1xf32>
    %194 = vector.broadcast %193 : vector<4x1xf32> to vector<4x32xf32>
    %195 = arith.mulf %190, %194 : vector<4x32xf32>
    %196 = vector.broadcast %176 : vector<1x32xf32> to vector<4x32xf32>
    %197 = arith.mulf %195, %196 : vector<4x32xf32>
    %198 = vector.broadcast %177 : vector<1x32xf32> to vector<4x32xf32>
    %199 = arith.addf %197, %198 : vector<4x32xf32>
    %c0_75 = arith.constant 0 : index
    %c0_76 = arith.constant 0 : index
    %200 = vector.load %arg15[%c0_75, %c0_76] : memref<32x96xf32, #tpu.memory_space<vmem>>, vector<32x96xf32>
    %c0_77 = arith.constant 0 : index
    %c0_78 = arith.constant 0 : index
    %201 = vector.load %arg16[%c0_77, %c0_78] : memref<1x96xf32, #tpu.memory_space<vmem>>, vector<1x96xf32>
    %c0_79 = arith.constant 0 : index
    %c0_80 = arith.constant 0 : index
    %202 = vector.load %arg17[%c0_79, %c0_80] : memref<32x32xf32, #tpu.memory_space<vmem>>, vector<32x32xf32>
    %c0_81 = arith.constant 0 : index
    %c0_82 = arith.constant 0 : index
    %203 = vector.load %arg18[%c0_81, %c0_82] : memref<1x32xf32, #tpu.memory_space<vmem>>, vector<1x32xf32>
    %204 = vector.extract_strided_slice %200 {offsets = [0, 0], sizes = [32, 32], strides = [1, 1]} : vector<32x96xf32> to vector<32x32xf32>
    %cst_83 = arith.constant dense<0.000000e+00> : vector<4x32xf32>
    %205 = tpu.matmul %175, %204, %cst_83 {dimension_numbers = #tpu.dot_dimension_numbers<[1], [0], [0], [1], [0, 0, 1, 1], [], []>} : vector<4x32xf32>, vector<32x32xf32>, vector<4x32xf32> -> vector<4x32xf32>
    %206 = vector.extract_strided_slice %201 {offsets = [0, 0], sizes = [1, 32], strides = [1, 1]} : vector<1x96xf32> to vector<1x32xf32>
    %207 = vector.broadcast %206 : vector<1x32xf32> to vector<4x32xf32>
    %208 = arith.addf %205, %207 : vector<4x32xf32>
    %209 = vector.extract_strided_slice %200 {offsets = [0, 32], sizes = [32, 64], strides = [1, 1]} : vector<32x96xf32> to vector<32x64xf32>
    %cst_84 = arith.constant dense<0.000000e+00> : vector<4x64xf32>
    %210 = tpu.matmul %199, %209, %cst_84 {dimension_numbers = #tpu.dot_dimension_numbers<[1], [0], [0], [1], [0, 0, 1, 1], [], []>} : vector<4x32xf32>, vector<32x64xf32>, vector<4x64xf32> -> vector<4x64xf32>
    %211 = vector.extract_strided_slice %201 {offsets = [0, 32], sizes = [1, 64], strides = [1, 1]} : vector<1x96xf32> to vector<1x64xf32>
    %212 = vector.broadcast %211 : vector<1x64xf32> to vector<4x64xf32>
    %213 = arith.addf %210, %212 : vector<4x64xf32>
    %214 = vector.extract_strided_slice %213 {offsets = [0, 0], sizes = [4, 32], strides = [1, 1]} : vector<4x64xf32> to vector<4x32xf32>
    %215 = vector.extract_strided_slice %213 {offsets = [0, 32], sizes = [4, 32], strides = [1, 1]} : vector<4x64xf32> to vector<4x32xf32>
    %cst_85 = arith.constant 0.000000e+00 : f32
    %216 = vector.broadcast %cst_85 : f32 to vector<4x32xf32>
    %217 = vector.extract_strided_slice %208 {offsets = [0, 0], sizes = [4, 8], strides = [1, 1]} : vector<4x32xf32> to vector<4x8xf32>
    %218 = vector.extract_strided_slice %214 {offsets = [0, 0], sizes = [4, 8], strides = [1, 1]} : vector<4x32xf32> to vector<4x8xf32>
    %cst_86 = arith.constant dense<0.000000e+00> : vector<4x4xf32>
    %219 = tpu.matmul %217, %218, %cst_86 {dimension_numbers = #tpu.dot_dimension_numbers<[1], [1], [0], [0], [0, 0, 1, 0], [], []>} : vector<4x8xf32>, vector<4x8xf32>, vector<4x4xf32> -> vector<4x4xf32>
    %cst_87 = arith.constant 0.353553385 : f32
    %220 = vector.broadcast %cst_87 : f32 to vector<4x4xf32>
    %221 = arith.mulf %219, %220 : vector<4x4xf32>
    %cst_88 = arith.constant dense<0xFF800000> : vector<4xf32>
    %222 = vector.multi_reduction <maximumf>, %221, %cst_88 [1] : vector<4x4xf32> to vector<4xf32>
    %223 = vector.shape_cast %222 : vector<4xf32> to vector<4x1xf32>
    %224 = vector.broadcast %223 : vector<4x1xf32> to vector<4x4xf32>
    %225 = arith.subf %221, %224 : vector<4x4xf32>
    %226 = math.exp %225 : vector<4x4xf32>
    %cst_89 = arith.constant dense<0.000000e+00> : vector<4xf32>
    %227 = vector.multi_reduction <add>, %226, %cst_89 [1] : vector<4x4xf32> to vector<4xf32>
    %228 = vector.shape_cast %227 : vector<4xf32> to vector<4x1xf32>
    %229 = tpu.reciprocal %228 {approx = true} : vector<4x1xf32> -> vector<4x1xf32>
    %230 = vector.broadcast %229 : vector<4x1xf32> to vector<4x4xf32>
    %231 = arith.mulf %226, %230 : vector<4x4xf32>
    %232 = vector.extract_strided_slice %215 {offsets = [0, 0], sizes = [4, 8], strides = [1, 1]} : vector<4x32xf32> to vector<4x8xf32>
    %cst_90 = arith.constant dense<0.000000e+00> : vector<4x8xf32>
    %233 = tpu.matmul %231, %232, %cst_90 {dimension_numbers = #tpu.dot_dimension_numbers<[1], [0], [0], [1], [0, 0, 1, 1], [], []>} : vector<4x4xf32>, vector<4x8xf32>, vector<4x8xf32> -> vector<4x8xf32>
    %234 = vector.extract_strided_slice %202 {offsets = [0, 0], sizes = [8, 32], strides = [1, 1]} : vector<32x32xf32> to vector<8x32xf32>
    %cst_91 = arith.constant dense<0.000000e+00> : vector<4x32xf32>
    %235 = tpu.matmul %233, %234, %cst_91 {dimension_numbers = #tpu.dot_dimension_numbers<[1], [0], [0], [1], [0, 0, 1, 1], [], []>} : vector<4x8xf32>, vector<8x32xf32>, vector<4x32xf32> -> vector<4x32xf32>
    %236 = arith.addf %216, %235 : vector<4x32xf32>
    %237 = vector.extract_strided_slice %208 {offsets = [0, 8], sizes = [4, 8], strides = [1, 1]} : vector<4x32xf32> to vector<4x8xf32>
    %238 = vector.extract_strided_slice %214 {offsets = [0, 8], sizes = [4, 8], strides = [1, 1]} : vector<4x32xf32> to vector<4x8xf32>
    %cst_92 = arith.constant dense<0.000000e+00> : vector<4x4xf32>
    %239 = tpu.matmul %237, %238, %cst_92 {dimension_numbers = #tpu.dot_dimension_numbers<[1], [1], [0], [0], [0, 0, 1, 0], [], []>} : vector<4x8xf32>, vector<4x8xf32>, vector<4x4xf32> -> vector<4x4xf32>
    %cst_93 = arith.constant 0.353553385 : f32
    %240 = vector.broadcast %cst_93 : f32 to vector<4x4xf32>
    %241 = arith.mulf %239, %240 : vector<4x4xf32>
    %cst_94 = arith.constant dense<0xFF800000> : vector<4xf32>
    %242 = vector.multi_reduction <maximumf>, %241, %cst_94 [1] : vector<4x4xf32> to vector<4xf32>
    %243 = vector.shape_cast %242 : vector<4xf32> to vector<4x1xf32>
    %244 = vector.broadcast %243 : vector<4x1xf32> to vector<4x4xf32>
    %245 = arith.subf %241, %244 : vector<4x4xf32>
    %246 = math.exp %245 : vector<4x4xf32>
    %cst_95 = arith.constant dense<0.000000e+00> : vector<4xf32>
    %247 = vector.multi_reduction <add>, %246, %cst_95 [1] : vector<4x4xf32> to vector<4xf32>
    %248 = vector.shape_cast %247 : vector<4xf32> to vector<4x1xf32>
    %249 = tpu.reciprocal %248 {approx = true} : vector<4x1xf32> -> vector<4x1xf32>
    %250 = vector.broadcast %249 : vector<4x1xf32> to vector<4x4xf32>
    %251 = arith.mulf %246, %250 : vector<4x4xf32>
    %252 = vector.extract_strided_slice %215 {offsets = [0, 8], sizes = [4, 8], strides = [1, 1]} : vector<4x32xf32> to vector<4x8xf32>
    %cst_96 = arith.constant dense<0.000000e+00> : vector<4x8xf32>
    %253 = tpu.matmul %251, %252, %cst_96 {dimension_numbers = #tpu.dot_dimension_numbers<[1], [0], [0], [1], [0, 0, 1, 1], [], []>} : vector<4x4xf32>, vector<4x8xf32>, vector<4x8xf32> -> vector<4x8xf32>
    %254 = vector.extract_strided_slice %202 {offsets = [8, 0], sizes = [8, 32], strides = [1, 1]} : vector<32x32xf32> to vector<8x32xf32>
    %cst_97 = arith.constant dense<0.000000e+00> : vector<4x32xf32>
    %255 = tpu.matmul %253, %254, %cst_97 {dimension_numbers = #tpu.dot_dimension_numbers<[1], [0], [0], [1], [0, 0, 1, 1], [], []>} : vector<4x8xf32>, vector<8x32xf32>, vector<4x32xf32> -> vector<4x32xf32>
    %256 = arith.addf %236, %255 : vector<4x32xf32>
    %257 = vector.extract_strided_slice %208 {offsets = [0, 16], sizes = [4, 8], strides = [1, 1]} : vector<4x32xf32> to vector<4x8xf32>
    %258 = vector.extract_strided_slice %214 {offsets = [0, 16], sizes = [4, 8], strides = [1, 1]} : vector<4x32xf32> to vector<4x8xf32>
    %cst_98 = arith.constant dense<0.000000e+00> : vector<4x4xf32>
    %259 = tpu.matmul %257, %258, %cst_98 {dimension_numbers = #tpu.dot_dimension_numbers<[1], [1], [0], [0], [0, 0, 1, 0], [], []>} : vector<4x8xf32>, vector<4x8xf32>, vector<4x4xf32> -> vector<4x4xf32>
    %cst_99 = arith.constant 0.353553385 : f32
    %260 = vector.broadcast %cst_99 : f32 to vector<4x4xf32>
    %261 = arith.mulf %259, %260 : vector<4x4xf32>
    %cst_100 = arith.constant dense<0xFF800000> : vector<4xf32>
    %262 = vector.multi_reduction <maximumf>, %261, %cst_100 [1] : vector<4x4xf32> to vector<4xf32>
    %263 = vector.shape_cast %262 : vector<4xf32> to vector<4x1xf32>
    %264 = vector.broadcast %263 : vector<4x1xf32> to vector<4x4xf32>
    %265 = arith.subf %261, %264 : vector<4x4xf32>
    %266 = math.exp %265 : vector<4x4xf32>
    %cst_101 = arith.constant dense<0.000000e+00> : vector<4xf32>
    %267 = vector.multi_reduction <add>, %266, %cst_101 [1] : vector<4x4xf32> to vector<4xf32>
    %268 = vector.shape_cast %267 : vector<4xf32> to vector<4x1xf32>
    %269 = tpu.reciprocal %268 {approx = true} : vector<4x1xf32> -> vector<4x1xf32>
    %270 = vector.broadcast %269 : vector<4x1xf32> to vector<4x4xf32>
    %271 = arith.mulf %266, %270 : vector<4x4xf32>
    %272 = vector.extract_strided_slice %215 {offsets = [0, 16], sizes = [4, 8], strides = [1, 1]} : vector<4x32xf32> to vector<4x8xf32>
    %cst_102 = arith.constant dense<0.000000e+00> : vector<4x8xf32>
    %273 = tpu.matmul %271, %272, %cst_102 {dimension_numbers = #tpu.dot_dimension_numbers<[1], [0], [0], [1], [0, 0, 1, 1], [], []>} : vector<4x4xf32>, vector<4x8xf32>, vector<4x8xf32> -> vector<4x8xf32>
    %274 = vector.extract_strided_slice %202 {offsets = [16, 0], sizes = [8, 32], strides = [1, 1]} : vector<32x32xf32> to vector<8x32xf32>
    %cst_103 = arith.constant dense<0.000000e+00> : vector<4x32xf32>
    %275 = tpu.matmul %273, %274, %cst_103 {dimension_numbers = #tpu.dot_dimension_numbers<[1], [0], [0], [1], [0, 0, 1, 1], [], []>} : vector<4x8xf32>, vector<8x32xf32>, vector<4x32xf32> -> vector<4x32xf32>
    %276 = arith.addf %256, %275 : vector<4x32xf32>
    %277 = vector.extract_strided_slice %208 {offsets = [0, 24], sizes = [4, 8], strides = [1, 1]} : vector<4x32xf32> to vector<4x8xf32>
    %278 = vector.extract_strided_slice %214 {offsets = [0, 24], sizes = [4, 8], strides = [1, 1]} : vector<4x32xf32> to vector<4x8xf32>
    %cst_104 = arith.constant dense<0.000000e+00> : vector<4x4xf32>
    %279 = tpu.matmul %277, %278, %cst_104 {dimension_numbers = #tpu.dot_dimension_numbers<[1], [1], [0], [0], [0, 0, 1, 0], [], []>} : vector<4x8xf32>, vector<4x8xf32>, vector<4x4xf32> -> vector<4x4xf32>
    %cst_105 = arith.constant 0.353553385 : f32
    %280 = vector.broadcast %cst_105 : f32 to vector<4x4xf32>
    %281 = arith.mulf %279, %280 : vector<4x4xf32>
    %cst_106 = arith.constant dense<0xFF800000> : vector<4xf32>
    %282 = vector.multi_reduction <maximumf>, %281, %cst_106 [1] : vector<4x4xf32> to vector<4xf32>
    %283 = vector.shape_cast %282 : vector<4xf32> to vector<4x1xf32>
    %284 = vector.broadcast %283 : vector<4x1xf32> to vector<4x4xf32>
    %285 = arith.subf %281, %284 : vector<4x4xf32>
    %286 = math.exp %285 : vector<4x4xf32>
    %cst_107 = arith.constant dense<0.000000e+00> : vector<4xf32>
    %287 = vector.multi_reduction <add>, %286, %cst_107 [1] : vector<4x4xf32> to vector<4xf32>
    %288 = vector.shape_cast %287 : vector<4xf32> to vector<4x1xf32>
    %289 = tpu.reciprocal %288 {approx = true} : vector<4x1xf32> -> vector<4x1xf32>
    %290 = vector.broadcast %289 : vector<4x1xf32> to vector<4x4xf32>
    %291 = arith.mulf %286, %290 : vector<4x4xf32>
    %292 = vector.extract_strided_slice %215 {offsets = [0, 24], sizes = [4, 8], strides = [1, 1]} : vector<4x32xf32> to vector<4x8xf32>
    %cst_108 = arith.constant dense<0.000000e+00> : vector<4x8xf32>
    %293 = tpu.matmul %291, %292, %cst_108 {dimension_numbers = #tpu.dot_dimension_numbers<[1], [0], [0], [1], [0, 0, 1, 1], [], []>} : vector<4x4xf32>, vector<4x8xf32>, vector<4x8xf32> -> vector<4x8xf32>
    %294 = vector.extract_strided_slice %202 {offsets = [24, 0], sizes = [8, 32], strides = [1, 1]} : vector<32x32xf32> to vector<8x32xf32>
    %cst_109 = arith.constant dense<0.000000e+00> : vector<4x32xf32>
    %295 = tpu.matmul %293, %294, %cst_109 {dimension_numbers = #tpu.dot_dimension_numbers<[1], [0], [0], [1], [0, 0, 1, 1], [], []>} : vector<4x8xf32>, vector<8x32xf32>, vector<4x32xf32> -> vector<4x32xf32>
    %296 = arith.addf %276, %295 : vector<4x32xf32>
    %297 = vector.broadcast %203 : vector<1x32xf32> to vector<4x32xf32>
    %298 = arith.addf %296, %297 : vector<4x32xf32>
    %299 = arith.addf %3, %298 : vector<4x32xf32>
    %c0_110 = arith.constant 0 : index
    %c0_111 = arith.constant 0 : index
    %300 = vector.load %arg19[%c0_110, %c0_111] : memref<1x32xf32, #tpu.memory_space<vmem>>, vector<1x32xf32>
    %c0_112 = arith.constant 0 : index
    %c0_113 = arith.constant 0 : index
    %301 = vector.load %arg20[%c0_112, %c0_113] : memref<1x32xf32, #tpu.memory_space<vmem>>, vector<1x32xf32>
    %cst_114 = arith.constant dense<0.000000e+00> : vector<4xf32>
    %302 = vector.multi_reduction <add>, %151, %cst_114 [1] : vector<4x32xf32> to vector<4xf32>
    %303 = vector.shape_cast %302 : vector<4xf32> to vector<4x1xf32>
    %cst_115 = arith.constant 3.200000e+01 : f32
    %304 = vector.broadcast %cst_115 : f32 to vector<4x1xf32>
    %305 = arith.divf %303, %304 : vector<4x1xf32>
    %306 = vector.broadcast %305 : vector<4x1xf32> to vector<4x32xf32>
    %307 = arith.subf %151, %306 : vector<4x32xf32>
    %308 = arith.mulf %307, %307 : vector<4x32xf32>
    %cst_116 = arith.constant dense<0.000000e+00> : vector<4xf32>
    %309 = vector.multi_reduction <add>, %308, %cst_116 [1] : vector<4x32xf32> to vector<4xf32>
    %310 = vector.shape_cast %309 : vector<4xf32> to vector<4x1xf32>
    %cst_117 = arith.constant 3.200000e+01 : f32
    %311 = vector.broadcast %cst_117 : f32 to vector<4x1xf32>
    %312 = arith.divf %310, %311 : vector<4x1xf32>
    %313 = vector.broadcast %305 : vector<4x1xf32> to vector<4x32xf32>
    %314 = arith.subf %151, %313 : vector<4x32xf32>
    %cst_118 = arith.constant 9.99999974E-6 : f32
    %315 = vector.broadcast %cst_118 : f32 to vector<4x1xf32>
    %316 = arith.addf %312, %315 : vector<4x1xf32>
    %317 = math.rsqrt %316 : vector<4x1xf32>
    %318 = vector.broadcast %317 : vector<4x1xf32> to vector<4x32xf32>
    %319 = arith.mulf %314, %318 : vector<4x32xf32>
    %320 = vector.broadcast %300 : vector<1x32xf32> to vector<4x32xf32>
    %321 = arith.mulf %319, %320 : vector<4x32xf32>
    %322 = vector.broadcast %301 : vector<1x32xf32> to vector<4x32xf32>
    %323 = arith.addf %321, %322 : vector<4x32xf32>
    %c0_119 = arith.constant 0 : index
    %c0_120 = arith.constant 0 : index
    %324 = vector.load %arg21[%c0_119, %c0_120] : memref<32x64xf32, #tpu.memory_space<vmem>>, vector<32x64xf32>
    %c0_121 = arith.constant 0 : index
    %c0_122 = arith.constant 0 : index
    %325 = vector.load %arg22[%c0_121, %c0_122] : memref<1x64xf32, #tpu.memory_space<vmem>>, vector<1x64xf32>
    %c0_123 = arith.constant 0 : index
    %c0_124 = arith.constant 0 : index
    %326 = vector.load %arg23[%c0_123, %c0_124] : memref<64x32xf32, #tpu.memory_space<vmem>>, vector<64x32xf32>
    %c0_125 = arith.constant 0 : index
    %c0_126 = arith.constant 0 : index
    %327 = vector.load %arg24[%c0_125, %c0_126] : memref<1x32xf32, #tpu.memory_space<vmem>>, vector<1x32xf32>
    %cst_127 = arith.constant dense<0.000000e+00> : vector<4x64xf32>
    %328 = tpu.matmul %323, %324, %cst_127 {dimension_numbers = #tpu.dot_dimension_numbers<[1], [0], [0], [1], [0, 0, 1, 1], [], []>} : vector<4x32xf32>, vector<32x64xf32>, vector<4x64xf32> -> vector<4x64xf32>
    %329 = vector.broadcast %325 : vector<1x64xf32> to vector<4x64xf32>
    %330 = arith.addf %328, %329 : vector<4x64xf32>
    %cst_128 = arith.constant 5.000000e-01 : f32
    %331 = vector.broadcast %cst_128 : f32 to vector<4x64xf32>
    %332 = arith.mulf %331, %330 : vector<4x64xf32>
    %cst_129 = arith.constant 4.471500e-02 : f32
    %333 = vector.broadcast %cst_129 : f32 to vector<4x64xf32>
    %334 = arith.mulf %333, %330 : vector<4x64xf32>
    %335 = arith.mulf %334, %330 : vector<4x64xf32>
    %336 = arith.mulf %335, %330 : vector<4x64xf32>
    %337 = arith.addf %330, %336 : vector<4x64xf32>
    %cst_130 = arith.constant 0.797884583 : f32
    %338 = vector.broadcast %cst_130 : f32 to vector<4x64xf32>
    %339 = arith.mulf %338, %337 : vector<4x64xf32>
    %340 = math.tanh %339 : vector<4x64xf32>
    %cst_131 = arith.constant 1.000000e+00 : f32
    %341 = vector.broadcast %cst_131 : f32 to vector<4x64xf32>
    %342 = arith.addf %341, %340 : vector<4x64xf32>
    %343 = arith.mulf %332, %342 : vector<4x64xf32>
    %cst_132 = arith.constant dense<0.000000e+00> : vector<4x32xf32>
    %344 = tpu.matmul %343, %326, %cst_132 {dimension_numbers = #tpu.dot_dimension_numbers<[1], [0], [0], [1], [0, 0, 1, 1], [], []>} : vector<4x64xf32>, vector<64x32xf32>, vector<4x32xf32> -> vector<4x32xf32>
    %345 = vector.broadcast %327 : vector<1x32xf32> to vector<4x32xf32>
    %346 = arith.addf %344, %345 : vector<4x32xf32>
    %347 = arith.addf %151, %346 : vector<4x32xf32>
    %c0_133 = arith.constant 0 : index
    %c0_134 = arith.constant 0 : index
    %348 = vector.load %arg25[%c0_133, %c0_134] : memref<1x32xf32, #tpu.memory_space<vmem>>, vector<1x32xf32>
    %c0_135 = arith.constant 0 : index
    %c0_136 = arith.constant 0 : index
    %349 = vector.load %arg26[%c0_135, %c0_136] : memref<1x32xf32, #tpu.memory_space<vmem>>, vector<1x32xf32>
    %cst_137 = arith.constant dense<0.000000e+00> : vector<4xf32>
    %350 = vector.multi_reduction <add>, %299, %cst_137 [1] : vector<4x32xf32> to vector<4xf32>
    %351 = vector.shape_cast %350 : vector<4xf32> to vector<4x1xf32>
    %cst_138 = arith.constant 3.200000e+01 : f32
    %352 = vector.broadcast %cst_138 : f32 to vector<4x1xf32>
    %353 = arith.divf %351, %352 : vector<4x1xf32>
    %354 = vector.broadcast %353 : vector<4x1xf32> to vector<4x32xf32>
    %355 = arith.subf %299, %354 : vector<4x32xf32>
    %356 = arith.mulf %355, %355 : vector<4x32xf32>
    %cst_139 = arith.constant dense<0.000000e+00> : vector<4xf32>
    %357 = vector.multi_reduction <add>, %356, %cst_139 [1] : vector<4x32xf32> to vector<4xf32>
    %358 = vector.shape_cast %357 : vector<4xf32> to vector<4x1xf32>
    %cst_140 = arith.constant 3.200000e+01 : f32
    %359 = vector.broadcast %cst_140 : f32 to vector<4x1xf32>
    %360 = arith.divf %358, %359 : vector<4x1xf32>
    %361 = vector.broadcast %353 : vector<4x1xf32> to vector<4x32xf32>
    %362 = arith.subf %299, %361 : vector<4x32xf32>
    %cst_141 = arith.constant 9.99999974E-6 : f32
    %363 = vector.broadcast %cst_141 : f32 to vector<4x1xf32>
    %364 = arith.addf %360, %363 : vector<4x1xf32>
    %365 = math.rsqrt %364 : vector<4x1xf32>
    %366 = vector.broadcast %365 : vector<4x1xf32> to vector<4x32xf32>
    %367 = arith.mulf %362, %366 : vector<4x32xf32>
    %368 = vector.broadcast %348 : vector<1x32xf32> to vector<4x32xf32>
    %369 = arith.mulf %367, %368 : vector<4x32xf32>
    %370 = vector.broadcast %349 : vector<1x32xf32> to vector<4x32xf32>
    %371 = arith.addf %369, %370 : vector<4x32xf32>
    %c0_142 = arith.constant 0 : index
    %c0_143 = arith.constant 0 : index
    %372 = vector.load %arg27[%c0_142, %c0_143] : memref<32x64xf32, #tpu.memory_space<vmem>>, vector<32x64xf32>
    %c0_144 = arith.constant 0 : index
    %c0_145 = arith.constant 0 : index
    %373 = vector.load %arg28[%c0_144, %c0_145] : memref<1x64xf32, #tpu.memory_space<vmem>>, vector<1x64xf32>
    %c0_146 = arith.constant 0 : index
    %c0_147 = arith.constant 0 : index
    %374 = vector.load %arg29[%c0_146, %c0_147] : memref<64x32xf32, #tpu.memory_space<vmem>>, vector<64x32xf32>
    %c0_148 = arith.constant 0 : index
    %c0_149 = arith.constant 0 : index
    %375 = vector.load %arg30[%c0_148, %c0_149] : memref<1x32xf32, #tpu.memory_space<vmem>>, vector<1x32xf32>
    %cst_150 = arith.constant dense<0.000000e+00> : vector<4x64xf32>
    %376 = tpu.matmul %371, %372, %cst_150 {dimension_numbers = #tpu.dot_dimension_numbers<[1], [0], [0], [1], [0, 0, 1, 1], [], []>} : vector<4x32xf32>, vector<32x64xf32>, vector<4x64xf32> -> vector<4x64xf32>
    %377 = vector.broadcast %373 : vector<1x64xf32> to vector<4x64xf32>
    %378 = arith.addf %376, %377 : vector<4x64xf32>
    %cst_151 = arith.constant 5.000000e-01 : f32
    %379 = vector.broadcast %cst_151 : f32 to vector<4x64xf32>
    %380 = arith.mulf %379, %378 : vector<4x64xf32>
    %cst_152 = arith.constant 4.471500e-02 : f32
    %381 = vector.broadcast %cst_152 : f32 to vector<4x64xf32>
    %382 = arith.mulf %381, %378 : vector<4x64xf32>
    %383 = arith.mulf %382, %378 : vector<4x64xf32>
    %384 = arith.mulf %383, %378 : vector<4x64xf32>
    %385 = arith.addf %378, %384 : vector<4x64xf32>
    %cst_153 = arith.constant 0.797884583 : f32
    %386 = vector.broadcast %cst_153 : f32 to vector<4x64xf32>
    %387 = arith.mulf %386, %385 : vector<4x64xf32>
    %388 = math.tanh %387 : vector<4x64xf32>
    %cst_154 = arith.constant 1.000000e+00 : f32
    %389 = vector.broadcast %cst_154 : f32 to vector<4x64xf32>
    %390 = arith.addf %389, %388 : vector<4x64xf32>
    %391 = arith.mulf %380, %390 : vector<4x64xf32>
    %cst_155 = arith.constant dense<0.000000e+00> : vector<4x32xf32>
    %392 = tpu.matmul %391, %374, %cst_155 {dimension_numbers = #tpu.dot_dimension_numbers<[1], [0], [0], [1], [0, 0, 1, 1], [], []>} : vector<4x64xf32>, vector<64x32xf32>, vector<4x32xf32> -> vector<4x32xf32>
    %393 = vector.broadcast %375 : vector<1x32xf32> to vector<4x32xf32>
    %394 = arith.addf %392, %393 : vector<4x32xf32>
    %395 = arith.addf %299, %394 : vector<4x32xf32>
    %c0_156 = arith.constant 0 : index
    %c0_157 = arith.constant 0 : index
    %c0_158 = arith.constant 0 : index
    %396 = vector.load %arg31[%c0_156, %c0_157, %c0_158] : memref<1x4x32xf32, #tpu.memory_space<vmem>>, vector<1x4x32xf32>
    %397 = vector.shape_cast %396 : vector<1x4x32xf32> to vector<4x32xf32>
    %398 = vector.shape_cast %347 : vector<4x32xf32> to vector<1x4x32xf32>
    tpu.vector_store %arg31[%c0_156, %c0_157, %c0_158], %398 {strides = array<i32>} : memref<1x4x32xf32, #tpu.memory_space<vmem>>, vector<1x4x32xf32>,
    %c0_159 = arith.constant 0 : index
    %c0_160 = arith.constant 0 : index
    %c0_161 = arith.constant 0 : index
    %399 = vector.load %arg32[%c0_159, %c0_160, %c0_161] : memref<1x4x32xf32, #tpu.memory_space<vmem>>, vector<1x4x32xf32>
    %400 = vector.shape_cast %399 : vector<1x4x32xf32> to vector<4x32xf32>
    %401 = vector.shape_cast %395 : vector<4x32xf32> to vector<1x4x32xf32>
    tpu.vector_store %arg32[%c0_159, %c0_160, %c0_161], %401 {strides = array<i32>} : memref<1x4x32xf32, #tpu.memory_space<vmem>>, vector<1x4x32xf32>,
    return
  }
  func.func @transform_0(%arg0: i32) -> (i32, i32, i32) {
    %c0_i32 = arith.constant 0 : i32
    %c0_i32_0 = arith.constant 0 : i32
    %c0_i32_1 = arith.constant 0 : i32
    return %arg0, %c0_i32, %c0_i32_0 : i32, i32, i32
  }
  func.func @transform_1(%arg0: i32) -> (i32, i32, i32) {
    %c0_i32 = arith.constant 0 : i32
    %c0_i32_0 = arith.constant 0 : i32
    %c0_i32_1 = arith.constant 0 : i32
    return %arg0, %c0_i32, %c0_i32_0 : i32, i32, i32
  }
  func.func @transform_2(%arg0: i32) -> (i32, i32) {
    %c0_i32 = arith.constant 0 : i32
    %c0_i32_0 = arith.constant 0 : i32
    %c0_i32_1 = arith.constant 0 : i32
    return %c0_i32, %c0_i32_0 : i32, i32
  }
  func.func @transform_3(%arg0: i32) -> (i32, i32) {
    %c0_i32 = arith.constant 0 : i32
    %c0_i32_0 = arith.constant 0 : i32
    %c0_i32_1 = arith.constant 0 : i32
    return %c0_i32, %c0_i32_0 : i32, i32
  }
  func.func @transform_4(%arg0: i32) -> (i32, i32) {
    %c0_i32 = arith.constant 0 : i32
    %c0_i32_0 = arith.constant 0 : i32
    %c0_i32_1 = arith.constant 0 : i32
    return %c0_i32, %c0_i32_0 : i32, i32
  }
  func.func @transform_5(%arg0: i32) -> (i32, i32) {
    %c0_i32 = arith.constant 0 : i32
    %c0_i32_0 = arith.constant 0 : i32
    %c0_i32_1 = arith.constant 0 : i32
    return %c0_i32, %c0_i32_0 : i32, i32
  }
  func.func @transform_6(%arg0: i32) -> (i32, i32) {
    %c0_i32 = arith.constant 0 : i32
    %c0_i32_0 = arith.constant 0 : i32
    %c0_i32_1 = arith.constant 0 : i32
    return %c0_i32, %c0_i32_0 : i32, i32
  }
  func.func @transform_7(%arg0: i32) -> (i32, i32) {
    %c0_i32 = arith.constant 0 : i32
    %c0_i32_0 = arith.constant 0 : i32
    %c0_i32_1 = arith.constant 0 : i32
    return %c0_i32, %c0_i32_0 : i32, i32
  }
  func.func @transform_8(%arg0: i32) -> (i32, i32) {
    %c0_i32 = arith.constant 0 : i32
    %c0_i32_0 = arith.constant 0 : i32
    %c0_i32_1 = arith.constant 0 : i32
    return %c0_i32, %c0_i32_0 : i32, i32
  }
  func.func @transform_9(%arg0: i32) -> (i32, i32) {
    %c0_i32 = arith.constant 0 : i32
    %c0_i32_0 = arith.constant 0 : i32
    %c0_i32_1 = arith.constant 0 : i32
    return %c0_i32, %c0_i32_0 : i32, i32
  }
  func.func @transform_10(%arg0: i32) -> (i32, i32) {
    %c0_i32 = arith.constant 0 : i32
    %c0_i32_0 = arith.constant 0 : i32
    %c0_i32_1 = arith.constant 0 : i32
    return %c0_i32, %c0_i32_0 : i32, i32
  }
  func.func @transform_11(%arg0: i32) -> (i32, i32) {
    %c0_i32 = arith.constant 0 : i32
    %c0_i32_0 = arith.constant 0 : i32
    %c0_i32_1 = arith.constant 0 : i32
    return %c0_i32, %c0_i32_0 : i32, i32
  }
  func.func @transform_12(%arg0: i32) -> (i32, i32) {
    %c0_i32 = arith.constant 0 : i32
    %c0_i32_0 = arith.constant 0 : i32
    %c0_i32_1 = arith.constant 0 : i32
    return %c0_i32, %c0_i32_0 : i32, i32
  }
  func.func @transform_13(%arg0: i32) -> (i32, i32) {
    %c0_i32 = arith.constant 0 : i32
    %c0_i32_0 = arith.constant 0 : i32
    %c0_i32_1 = arith.constant 0 : i32
    return %c0_i32, %c0_i32_0 : i32, i32
  }
  func.func @transform_14(%arg0: i32) -> (i32, i32) {
    %c0_i32 = arith.constant 0 : i32
    %c0_i32_0 = arith.constant 0 : i32
    %c0_i32_1 = arith.constant 0 : i32
    return %c0_i32, %c0_i32_0 : i32, i32
  }
  func.func @transform_15(%arg0: i32) -> (i32, i32) {
    %c0_i32 = arith.constant 0 : i32
    %c0_i32_0 = arith.constant 0 : i32
    %c0_i32_1 = arith.constant 0 : i32
    return %c0_i32, %c0_i32_0 : i32, i32
  }
  func.func @transform_16(%arg0: i32) -> (i32, i32) {
    %c0_i32 = arith.constant 0 : i32
    %c0_i32_0 = arith.constant 0 : i32
    %c0_i32_1 = arith.constant 0 : i32
    return %c0_i32, %c0_i32_0 : i32, i32
  }
  func.func @transform_17(%arg0: i32) -> (i32, i32) {
    %c0_i32 = arith.constant 0 : i32
    %c0_i32_0 = arith.constant 0 : i32
    %c0_i32_1 = arith.constant 0 : i32
    return %c0_i32, %c0_i32_0 : i32, i32
  }
  func.func @transform_18(%arg0: i32) -> (i32, i32) {
    %c0_i32 = arith.constant 0 : i32
    %c0_i32_0 = arith.constant 0 : i32
    %c0_i32_1 = arith.constant 0 : i32
    return %c0_i32, %c0_i32_0 : i32, i32
  }
  func.func @transform_19(%arg0: i32) -> (i32, i32) {
    %c0_i32 = arith.constant 0 : i32
    %c0_i32_0 = arith.constant 0 : i32
    %c0_i32_1 = arith.constant 0 : i32
    return %c0_i32, %c0_i32_0 : i32, i32
  }
  func.func @transform_20(%arg0: i32) -> (i32, i32) {
    %c0_i32 = arith.constant 0 : i32
    %c0_i32_0 = arith.constant 0 : i32
    %c0_i32_1 = arith.constant 0 : i32
    return %c0_i32, %c0_i32_0 : i32, i32
  }
  func.func @transform_21(%arg0: i32) -> (i32, i32) {
    %c0_i32 = arith.constant 0 : i32
    %c0_i32_0 = arith.constant 0 : i32
    %c0_i32_1 = arith.constant 0 : i32
    return %c0_i32, %c0_i32_0 : i32, i32
  }
  func.func @transform_22(%arg0: i32) -> (i32, i32) {
    %c0_i32 = arith.constant 0 : i32
    %c0_i32_0 = arith.constant 0 : i32
    %c0_i32_1 = arith.constant 0 : i32
    return %c0_i32, %c0_i32_0 : i32, i32
  }
  func.func @transform_23(%arg0: i32) -> (i32, i32) {
    %c0_i32 = arith.constant 0 : i32
    %c0_i32_0 = arith.constant 0 : i32
    %c0_i32_1 = arith.constant 0 : i32
    return %c0_i32, %c0_i32_0 : i32, i32
  }
  func.func @transform_24(%arg0: i32) -> (i32, i32) {
    %c0_i32 = arith.constant 0 : i32
    %c0_i32_0 = arith.constant 0 : i32
    %c0_i32_1 = arith.constant 0 : i32
    return %c0_i32, %c0_i32_0 : i32, i32
  }
  func.func @transform_25(%arg0: i32) -> (i32, i32) {
    %c0_i32 = arith.constant 0 : i32
    %c0_i32_0 = arith.constant 0 : i32
    %c0_i32_1 = arith.constant 0 : i32
    return %c0_i32, %c0_i32_0 : i32, i32
  }
  func.func @transform_26(%arg0: i32) -> (i32, i32) {
    %c0_i32 = arith.constant 0 : i32
    %c0_i32_0 = arith.constant 0 : i32
    %c0_i32_1 = arith.constant 0 : i32
    return %c0_i32, %c0_i32_0 : i32, i32
  }
  func.func @transform_27(%arg0: i32) -> (i32, i32) {
    %c0_i32 = arith.constant 0 : i32
    %c0_i32_0 = arith.constant 0 : i32
    %c0_i32_1 = arith.constant 0 : i32
    return %c0_i32, %c0_i32_0 : i32, i32
  }
  func.func @transform_28(%arg0: i32) -> (i32, i32) {
    %c0_i32 = arith.constant 0 : i32
    %c0_i32_0 = arith.constant 0 : i32
    %c0_i32_1 = arith.constant 0 : i32
    return %c0_i32, %c0_i32_0 : i32, i32
  }
  func.func @transform_29(%arg0: i32) -> (i32, i32) {
    %c0_i32 = arith.constant 0 : i32
    %c0_i32_0 = arith.constant 0 : i32
    %c0_i32_1 = arith.constant 0 : i32
    return %c0_i32, %c0_i32_0 : i32, i32
  }
  func.func @transform_30(%arg0: i32) -> (i32, i32, i32) {
    %c0_i32 = arith.constant 0 : i32
    %c0_i32_0 = arith.constant 0 : i32
    %c0_i32_1 = arith.constant 0 : i32
    return %arg0, %c0_i32, %c0_i32_0 : i32, i32, i32
  }
  func.func @transform_31(%arg0: i32) -> (i32, i32, i32) {
    %c0_i32 = arith.constant 0 : i32
    %c0_i32_0 = arith.constant 0 : i32
    %c0_i32_1 = arith.constant 0 : i32
    return %arg0, %c0_i32, %c0_i32_0 : i32, i32, i32
  }
}

module attributes {stable_mosaic.version = 11 : i64} {
  func.func @_encoder_block_kernel(%arg0: i32, %arg1: memref<1x9x32xf32, #tpu.memory_space<vmem>>, %arg2: memref<1x32xf32, #tpu.memory_space<vmem>>, %arg3: memref<1x32xf32, #tpu.memory_space<vmem>>, %arg4: memref<32x96xf32, #tpu.memory_space<vmem>>, %arg5: memref<1x96xf32, #tpu.memory_space<vmem>>, %arg6: memref<32x32xf32, #tpu.memory_space<vmem>>, %arg7: memref<1x32xf32, #tpu.memory_space<vmem>>, %arg8: memref<1x32xf32, #tpu.memory_space<vmem>>, %arg9: memref<1x32xf32, #tpu.memory_space<vmem>>, %arg10: memref<32x64xf32, #tpu.memory_space<vmem>>, %arg11: memref<1x64xf32, #tpu.memory_space<vmem>>, %arg12: memref<64x32xf32, #tpu.memory_space<vmem>>, %arg13: memref<1x32xf32, #tpu.memory_space<vmem>>, %arg14: memref<1x9x32xf32, #tpu.memory_space<vmem>>) attributes {dimension_semantics = [#tpu.dimension_semantics<parallel>], iteration_bounds = array<i64: 2>, scalar_prefetch = 0 : i64, scratch_operands = 0 : i64, tpu.core_type = #tpu.core_type<tc>, window_params = [{transform_indices = @transform_0, window_bounds = array<i64: 1, 9, 32>}, {pipeline_mode = #tpu.pipeline_mode<synchronous>, transform_indices = @transform_1, window_bounds = array<i64: 1, 32>}, {pipeline_mode = #tpu.pipeline_mode<synchronous>, transform_indices = @transform_2, window_bounds = array<i64: 1, 32>}, {pipeline_mode = #tpu.pipeline_mode<synchronous>, transform_indices = @transform_3, window_bounds = array<i64: 32, 96>}, {pipeline_mode = #tpu.pipeline_mode<synchronous>, transform_indices = @transform_4, window_bounds = array<i64: 1, 96>}, {pipeline_mode = #tpu.pipeline_mode<synchronous>, transform_indices = @transform_5, window_bounds = array<i64: 32, 32>}, {pipeline_mode = #tpu.pipeline_mode<synchronous>, transform_indices = @transform_6, window_bounds = array<i64: 1, 32>}, {pipeline_mode = #tpu.pipeline_mode<synchronous>, transform_indices = @transform_7, window_bounds = array<i64: 1, 32>}, {pipeline_mode = #tpu.pipeline_mode<synchronous>, transform_indices = @transform_8, window_bounds = array<i64: 1, 32>}, {pipeline_mode = #tpu.pipeline_mode<synchronous>, transform_indices = @transform_9, window_bounds = array<i64: 32, 64>}, {pipeline_mode = #tpu.pipeline_mode<synchronous>, transform_indices = @transform_10, window_bounds = array<i64: 1, 64>}, {pipeline_mode = #tpu.pipeline_mode<synchronous>, transform_indices = @transform_11, window_bounds = array<i64: 64, 32>}, {pipeline_mode = #tpu.pipeline_mode<synchronous>, transform_indices = @transform_12, window_bounds = array<i64: 1, 32>}, {transform_indices = @transform_13, window_bounds = array<i64: 1, 9, 32>}]} {
    %c0 = arith.constant 0 : index
    %c0_0 = arith.constant 0 : index
    %c0_1 = arith.constant 0 : index
    %0 = vector.load %arg1[%c0, %c0_0, %c0_1] : memref<1x9x32xf32, #tpu.memory_space<vmem>>, vector<1x9x32xf32>
    %1 = vector.shape_cast %0 : vector<1x9x32xf32> to vector<9x32xf32>
    %c0_2 = arith.constant 0 : index
    %c0_3 = arith.constant 0 : index
    %2 = vector.load %arg2[%c0_2, %c0_3] : memref<1x32xf32, #tpu.memory_space<vmem>>, vector<1x32xf32>
    %c0_4 = arith.constant 0 : index
    %c0_5 = arith.constant 0 : index
    %3 = vector.load %arg3[%c0_4, %c0_5] : memref<1x32xf32, #tpu.memory_space<vmem>>, vector<1x32xf32>
    %cst = arith.constant dense<0.000000e+00> : vector<9xf32>
    %4 = vector.multi_reduction <add>, %1, %cst [1] : vector<9x32xf32> to vector<9xf32>
    %5 = vector.shape_cast %4 : vector<9xf32> to vector<9x1xf32>
    %cst_6 = arith.constant 3.200000e+01 : f32
    %6 = vector.broadcast %cst_6 : f32 to vector<9x1xf32>
    %7 = arith.divf %5, %6 : vector<9x1xf32>
    %8 = vector.broadcast %7 : vector<9x1xf32> to vector<9x32xf32>
    %9 = arith.subf %1, %8 : vector<9x32xf32>
    %10 = arith.mulf %9, %9 : vector<9x32xf32>
    %cst_7 = arith.constant dense<0.000000e+00> : vector<9xf32>
    %11 = vector.multi_reduction <add>, %10, %cst_7 [1] : vector<9x32xf32> to vector<9xf32>
    %12 = vector.shape_cast %11 : vector<9xf32> to vector<9x1xf32>
    %cst_8 = arith.constant 3.200000e+01 : f32
    %13 = vector.broadcast %cst_8 : f32 to vector<9x1xf32>
    %14 = arith.divf %12, %13 : vector<9x1xf32>
    %15 = vector.broadcast %7 : vector<9x1xf32> to vector<9x32xf32>
    %16 = arith.subf %1, %15 : vector<9x32xf32>
    %cst_9 = arith.constant 9.99999974E-6 : f32
    %17 = vector.broadcast %cst_9 : f32 to vector<9x1xf32>
    %18 = arith.addf %14, %17 : vector<9x1xf32>
    %19 = math.rsqrt %18 : vector<9x1xf32>
    %20 = vector.broadcast %19 : vector<9x1xf32> to vector<9x32xf32>
    %21 = arith.mulf %16, %20 : vector<9x32xf32>
    %22 = vector.broadcast %2 : vector<1x32xf32> to vector<9x32xf32>
    %23 = arith.mulf %21, %22 : vector<9x32xf32>
    %24 = vector.broadcast %3 : vector<1x32xf32> to vector<9x32xf32>
    %25 = arith.addf %23, %24 : vector<9x32xf32>
    %c0_10 = arith.constant 0 : index
    %c0_11 = arith.constant 0 : index
    %26 = vector.load %arg4[%c0_10, %c0_11] : memref<32x96xf32, #tpu.memory_space<vmem>>, vector<32x96xf32>
    %c0_12 = arith.constant 0 : index
    %c0_13 = arith.constant 0 : index
    %27 = vector.load %arg5[%c0_12, %c0_13] : memref<1x96xf32, #tpu.memory_space<vmem>>, vector<1x96xf32>
    %c0_14 = arith.constant 0 : index
    %c0_15 = arith.constant 0 : index
    %28 = vector.load %arg6[%c0_14, %c0_15] : memref<32x32xf32, #tpu.memory_space<vmem>>, vector<32x32xf32>
    %c0_16 = arith.constant 0 : index
    %c0_17 = arith.constant 0 : index
    %29 = vector.load %arg7[%c0_16, %c0_17] : memref<1x32xf32, #tpu.memory_space<vmem>>, vector<1x32xf32>
    %cst_18 = arith.constant dense<0.000000e+00> : vector<9x96xf32>
    %30 = tpu.matmul %25, %26, %cst_18 {dimension_numbers = #tpu.dot_dimension_numbers<[1], [0], [0], [1], [0, 0, 1, 1], [], []>} : vector<9x32xf32>, vector<32x96xf32>, vector<9x96xf32> -> vector<9x96xf32>
    %31 = vector.broadcast %27 : vector<1x96xf32> to vector<9x96xf32>
    %32 = arith.addf %30, %31 : vector<9x96xf32>
    %33 = vector.extract_strided_slice %32 {offsets = [0, 0], sizes = [9, 32], strides = [1, 1]} : vector<9x96xf32> to vector<9x32xf32>
    %34 = vector.extract_strided_slice %32 {offsets = [0, 32], sizes = [9, 32], strides = [1, 1]} : vector<9x96xf32> to vector<9x32xf32>
    %35 = vector.extract_strided_slice %32 {offsets = [0, 64], sizes = [9, 32], strides = [1, 1]} : vector<9x96xf32> to vector<9x32xf32>
    %cst_19 = arith.constant 0.000000e+00 : f32
    %36 = vector.broadcast %cst_19 : f32 to vector<9x32xf32>
    %37 = vector.extract_strided_slice %33 {offsets = [0, 0], sizes = [9, 8], strides = [1, 1]} : vector<9x32xf32> to vector<9x8xf32>
    %38 = vector.extract_strided_slice %34 {offsets = [0, 0], sizes = [9, 8], strides = [1, 1]} : vector<9x32xf32> to vector<9x8xf32>
    %cst_20 = arith.constant dense<0.000000e+00> : vector<9x9xf32>
    %39 = tpu.matmul %37, %38, %cst_20 {dimension_numbers = #tpu.dot_dimension_numbers<[1], [1], [0], [0], [0, 0, 1, 0], [], []>} : vector<9x8xf32>, vector<9x8xf32>, vector<9x9xf32> -> vector<9x9xf32>
    %cst_21 = arith.constant 0.353553385 : f32
    %40 = vector.broadcast %cst_21 : f32 to vector<9x9xf32>
    %41 = arith.mulf %39, %40 : vector<9x9xf32>
    %cst_22 = arith.constant dense<0xFF800000> : vector<9xf32>
    %42 = vector.multi_reduction <maximumf>, %41, %cst_22 [1] : vector<9x9xf32> to vector<9xf32>
    %43 = vector.shape_cast %42 : vector<9xf32> to vector<9x1xf32>
    %44 = vector.broadcast %43 : vector<9x1xf32> to vector<9x9xf32>
    %45 = arith.subf %41, %44 : vector<9x9xf32>
    %46 = math.exp %45 : vector<9x9xf32>
    %cst_23 = arith.constant dense<0.000000e+00> : vector<9xf32>
    %47 = vector.multi_reduction <add>, %46, %cst_23 [1] : vector<9x9xf32> to vector<9xf32>
    %48 = vector.shape_cast %47 : vector<9xf32> to vector<9x1xf32>
    %49 = tpu.reciprocal %48 {approx = true} : vector<9x1xf32> -> vector<9x1xf32>
    %50 = vector.broadcast %49 : vector<9x1xf32> to vector<9x9xf32>
    %51 = arith.mulf %46, %50 : vector<9x9xf32>
    %52 = vector.extract_strided_slice %35 {offsets = [0, 0], sizes = [9, 8], strides = [1, 1]} : vector<9x32xf32> to vector<9x8xf32>
    %cst_24 = arith.constant dense<0.000000e+00> : vector<9x8xf32>
    %53 = tpu.matmul %51, %52, %cst_24 {dimension_numbers = #tpu.dot_dimension_numbers<[1], [0], [0], [1], [0, 0, 1, 1], [], []>} : vector<9x9xf32>, vector<9x8xf32>, vector<9x8xf32> -> vector<9x8xf32>
    %54 = vector.extract_strided_slice %28 {offsets = [0, 0], sizes = [8, 32], strides = [1, 1]} : vector<32x32xf32> to vector<8x32xf32>
    %cst_25 = arith.constant dense<0.000000e+00> : vector<9x32xf32>
    %55 = tpu.matmul %53, %54, %cst_25 {dimension_numbers = #tpu.dot_dimension_numbers<[1], [0], [0], [1], [0, 0, 1, 1], [], []>} : vector<9x8xf32>, vector<8x32xf32>, vector<9x32xf32> -> vector<9x32xf32>
    %56 = arith.addf %36, %55 : vector<9x32xf32>
    %57 = vector.extract_strided_slice %33 {offsets = [0, 8], sizes = [9, 8], strides = [1, 1]} : vector<9x32xf32> to vector<9x8xf32>
    %58 = vector.extract_strided_slice %34 {offsets = [0, 8], sizes = [9, 8], strides = [1, 1]} : vector<9x32xf32> to vector<9x8xf32>
    %cst_26 = arith.constant dense<0.000000e+00> : vector<9x9xf32>
    %59 = tpu.matmul %57, %58, %cst_26 {dimension_numbers = #tpu.dot_dimension_numbers<[1], [1], [0], [0], [0, 0, 1, 0], [], []>} : vector<9x8xf32>, vector<9x8xf32>, vector<9x9xf32> -> vector<9x9xf32>
    %cst_27 = arith.constant 0.353553385 : f32
    %60 = vector.broadcast %cst_27 : f32 to vector<9x9xf32>
    %61 = arith.mulf %59, %60 : vector<9x9xf32>
    %cst_28 = arith.constant dense<0xFF800000> : vector<9xf32>
    %62 = vector.multi_reduction <maximumf>, %61, %cst_28 [1] : vector<9x9xf32> to vector<9xf32>
    %63 = vector.shape_cast %62 : vector<9xf32> to vector<9x1xf32>
    %64 = vector.broadcast %63 : vector<9x1xf32> to vector<9x9xf32>
    %65 = arith.subf %61, %64 : vector<9x9xf32>
    %66 = math.exp %65 : vector<9x9xf32>
    %cst_29 = arith.constant dense<0.000000e+00> : vector<9xf32>
    %67 = vector.multi_reduction <add>, %66, %cst_29 [1] : vector<9x9xf32> to vector<9xf32>
    %68 = vector.shape_cast %67 : vector<9xf32> to vector<9x1xf32>
    %69 = tpu.reciprocal %68 {approx = true} : vector<9x1xf32> -> vector<9x1xf32>
    %70 = vector.broadcast %69 : vector<9x1xf32> to vector<9x9xf32>
    %71 = arith.mulf %66, %70 : vector<9x9xf32>
    %72 = vector.extract_strided_slice %35 {offsets = [0, 8], sizes = [9, 8], strides = [1, 1]} : vector<9x32xf32> to vector<9x8xf32>
    %cst_30 = arith.constant dense<0.000000e+00> : vector<9x8xf32>
    %73 = tpu.matmul %71, %72, %cst_30 {dimension_numbers = #tpu.dot_dimension_numbers<[1], [0], [0], [1], [0, 0, 1, 1], [], []>} : vector<9x9xf32>, vector<9x8xf32>, vector<9x8xf32> -> vector<9x8xf32>
    %74 = vector.extract_strided_slice %28 {offsets = [8, 0], sizes = [8, 32], strides = [1, 1]} : vector<32x32xf32> to vector<8x32xf32>
    %cst_31 = arith.constant dense<0.000000e+00> : vector<9x32xf32>
    %75 = tpu.matmul %73, %74, %cst_31 {dimension_numbers = #tpu.dot_dimension_numbers<[1], [0], [0], [1], [0, 0, 1, 1], [], []>} : vector<9x8xf32>, vector<8x32xf32>, vector<9x32xf32> -> vector<9x32xf32>
    %76 = arith.addf %56, %75 : vector<9x32xf32>
    %77 = vector.extract_strided_slice %33 {offsets = [0, 16], sizes = [9, 8], strides = [1, 1]} : vector<9x32xf32> to vector<9x8xf32>
    %78 = vector.extract_strided_slice %34 {offsets = [0, 16], sizes = [9, 8], strides = [1, 1]} : vector<9x32xf32> to vector<9x8xf32>
    %cst_32 = arith.constant dense<0.000000e+00> : vector<9x9xf32>
    %79 = tpu.matmul %77, %78, %cst_32 {dimension_numbers = #tpu.dot_dimension_numbers<[1], [1], [0], [0], [0, 0, 1, 0], [], []>} : vector<9x8xf32>, vector<9x8xf32>, vector<9x9xf32> -> vector<9x9xf32>
    %cst_33 = arith.constant 0.353553385 : f32
    %80 = vector.broadcast %cst_33 : f32 to vector<9x9xf32>
    %81 = arith.mulf %79, %80 : vector<9x9xf32>
    %cst_34 = arith.constant dense<0xFF800000> : vector<9xf32>
    %82 = vector.multi_reduction <maximumf>, %81, %cst_34 [1] : vector<9x9xf32> to vector<9xf32>
    %83 = vector.shape_cast %82 : vector<9xf32> to vector<9x1xf32>
    %84 = vector.broadcast %83 : vector<9x1xf32> to vector<9x9xf32>
    %85 = arith.subf %81, %84 : vector<9x9xf32>
    %86 = math.exp %85 : vector<9x9xf32>
    %cst_35 = arith.constant dense<0.000000e+00> : vector<9xf32>
    %87 = vector.multi_reduction <add>, %86, %cst_35 [1] : vector<9x9xf32> to vector<9xf32>
    %88 = vector.shape_cast %87 : vector<9xf32> to vector<9x1xf32>
    %89 = tpu.reciprocal %88 {approx = true} : vector<9x1xf32> -> vector<9x1xf32>
    %90 = vector.broadcast %89 : vector<9x1xf32> to vector<9x9xf32>
    %91 = arith.mulf %86, %90 : vector<9x9xf32>
    %92 = vector.extract_strided_slice %35 {offsets = [0, 16], sizes = [9, 8], strides = [1, 1]} : vector<9x32xf32> to vector<9x8xf32>
    %cst_36 = arith.constant dense<0.000000e+00> : vector<9x8xf32>
    %93 = tpu.matmul %91, %92, %cst_36 {dimension_numbers = #tpu.dot_dimension_numbers<[1], [0], [0], [1], [0, 0, 1, 1], [], []>} : vector<9x9xf32>, vector<9x8xf32>, vector<9x8xf32> -> vector<9x8xf32>
    %94 = vector.extract_strided_slice %28 {offsets = [16, 0], sizes = [8, 32], strides = [1, 1]} : vector<32x32xf32> to vector<8x32xf32>
    %cst_37 = arith.constant dense<0.000000e+00> : vector<9x32xf32>
    %95 = tpu.matmul %93, %94, %cst_37 {dimension_numbers = #tpu.dot_dimension_numbers<[1], [0], [0], [1], [0, 0, 1, 1], [], []>} : vector<9x8xf32>, vector<8x32xf32>, vector<9x32xf32> -> vector<9x32xf32>
    %96 = arith.addf %76, %95 : vector<9x32xf32>
    %97 = vector.extract_strided_slice %33 {offsets = [0, 24], sizes = [9, 8], strides = [1, 1]} : vector<9x32xf32> to vector<9x8xf32>
    %98 = vector.extract_strided_slice %34 {offsets = [0, 24], sizes = [9, 8], strides = [1, 1]} : vector<9x32xf32> to vector<9x8xf32>
    %cst_38 = arith.constant dense<0.000000e+00> : vector<9x9xf32>
    %99 = tpu.matmul %97, %98, %cst_38 {dimension_numbers = #tpu.dot_dimension_numbers<[1], [1], [0], [0], [0, 0, 1, 0], [], []>} : vector<9x8xf32>, vector<9x8xf32>, vector<9x9xf32> -> vector<9x9xf32>
    %cst_39 = arith.constant 0.353553385 : f32
    %100 = vector.broadcast %cst_39 : f32 to vector<9x9xf32>
    %101 = arith.mulf %99, %100 : vector<9x9xf32>
    %cst_40 = arith.constant dense<0xFF800000> : vector<9xf32>
    %102 = vector.multi_reduction <maximumf>, %101, %cst_40 [1] : vector<9x9xf32> to vector<9xf32>
    %103 = vector.shape_cast %102 : vector<9xf32> to vector<9x1xf32>
    %104 = vector.broadcast %103 : vector<9x1xf32> to vector<9x9xf32>
    %105 = arith.subf %101, %104 : vector<9x9xf32>
    %106 = math.exp %105 : vector<9x9xf32>
    %cst_41 = arith.constant dense<0.000000e+00> : vector<9xf32>
    %107 = vector.multi_reduction <add>, %106, %cst_41 [1] : vector<9x9xf32> to vector<9xf32>
    %108 = vector.shape_cast %107 : vector<9xf32> to vector<9x1xf32>
    %109 = tpu.reciprocal %108 {approx = true} : vector<9x1xf32> -> vector<9x1xf32>
    %110 = vector.broadcast %109 : vector<9x1xf32> to vector<9x9xf32>
    %111 = arith.mulf %106, %110 : vector<9x9xf32>
    %112 = vector.extract_strided_slice %35 {offsets = [0, 24], sizes = [9, 8], strides = [1, 1]} : vector<9x32xf32> to vector<9x8xf32>
    %cst_42 = arith.constant dense<0.000000e+00> : vector<9x8xf32>
    %113 = tpu.matmul %111, %112, %cst_42 {dimension_numbers = #tpu.dot_dimension_numbers<[1], [0], [0], [1], [0, 0, 1, 1], [], []>} : vector<9x9xf32>, vector<9x8xf32>, vector<9x8xf32> -> vector<9x8xf32>
    %114 = vector.extract_strided_slice %28 {offsets = [24, 0], sizes = [8, 32], strides = [1, 1]} : vector<32x32xf32> to vector<8x32xf32>
    %cst_43 = arith.constant dense<0.000000e+00> : vector<9x32xf32>
    %115 = tpu.matmul %113, %114, %cst_43 {dimension_numbers = #tpu.dot_dimension_numbers<[1], [0], [0], [1], [0, 0, 1, 1], [], []>} : vector<9x8xf32>, vector<8x32xf32>, vector<9x32xf32> -> vector<9x32xf32>
    %116 = arith.addf %96, %115 : vector<9x32xf32>
    %117 = vector.broadcast %29 : vector<1x32xf32> to vector<9x32xf32>
    %118 = arith.addf %116, %117 : vector<9x32xf32>
    %119 = arith.addf %1, %118 : vector<9x32xf32>
    %c0_44 = arith.constant 0 : index
    %c0_45 = arith.constant 0 : index
    %120 = vector.load %arg8[%c0_44, %c0_45] : memref<1x32xf32, #tpu.memory_space<vmem>>, vector<1x32xf32>
    %c0_46 = arith.constant 0 : index
    %c0_47 = arith.constant 0 : index
    %121 = vector.load %arg9[%c0_46, %c0_47] : memref<1x32xf32, #tpu.memory_space<vmem>>, vector<1x32xf32>
    %cst_48 = arith.constant dense<0.000000e+00> : vector<9xf32>
    %122 = vector.multi_reduction <add>, %119, %cst_48 [1] : vector<9x32xf32> to vector<9xf32>
    %123 = vector.shape_cast %122 : vector<9xf32> to vector<9x1xf32>
    %cst_49 = arith.constant 3.200000e+01 : f32
    %124 = vector.broadcast %cst_49 : f32 to vector<9x1xf32>
    %125 = arith.divf %123, %124 : vector<9x1xf32>
    %126 = vector.broadcast %125 : vector<9x1xf32> to vector<9x32xf32>
    %127 = arith.subf %119, %126 : vector<9x32xf32>
    %128 = arith.mulf %127, %127 : vector<9x32xf32>
    %cst_50 = arith.constant dense<0.000000e+00> : vector<9xf32>
    %129 = vector.multi_reduction <add>, %128, %cst_50 [1] : vector<9x32xf32> to vector<9xf32>
    %130 = vector.shape_cast %129 : vector<9xf32> to vector<9x1xf32>
    %cst_51 = arith.constant 3.200000e+01 : f32
    %131 = vector.broadcast %cst_51 : f32 to vector<9x1xf32>
    %132 = arith.divf %130, %131 : vector<9x1xf32>
    %133 = vector.broadcast %125 : vector<9x1xf32> to vector<9x32xf32>
    %134 = arith.subf %119, %133 : vector<9x32xf32>
    %cst_52 = arith.constant 9.99999974E-6 : f32
    %135 = vector.broadcast %cst_52 : f32 to vector<9x1xf32>
    %136 = arith.addf %132, %135 : vector<9x1xf32>
    %137 = math.rsqrt %136 : vector<9x1xf32>
    %138 = vector.broadcast %137 : vector<9x1xf32> to vector<9x32xf32>
    %139 = arith.mulf %134, %138 : vector<9x32xf32>
    %140 = vector.broadcast %120 : vector<1x32xf32> to vector<9x32xf32>
    %141 = arith.mulf %139, %140 : vector<9x32xf32>
    %142 = vector.broadcast %121 : vector<1x32xf32> to vector<9x32xf32>
    %143 = arith.addf %141, %142 : vector<9x32xf32>
    %c0_53 = arith.constant 0 : index
    %c0_54 = arith.constant 0 : index
    %144 = vector.load %arg10[%c0_53, %c0_54] : memref<32x64xf32, #tpu.memory_space<vmem>>, vector<32x64xf32>
    %c0_55 = arith.constant 0 : index
    %c0_56 = arith.constant 0 : index
    %145 = vector.load %arg11[%c0_55, %c0_56] : memref<1x64xf32, #tpu.memory_space<vmem>>, vector<1x64xf32>
    %c0_57 = arith.constant 0 : index
    %c0_58 = arith.constant 0 : index
    %146 = vector.load %arg12[%c0_57, %c0_58] : memref<64x32xf32, #tpu.memory_space<vmem>>, vector<64x32xf32>
    %c0_59 = arith.constant 0 : index
    %c0_60 = arith.constant 0 : index
    %147 = vector.load %arg13[%c0_59, %c0_60] : memref<1x32xf32, #tpu.memory_space<vmem>>, vector<1x32xf32>
    %cst_61 = arith.constant dense<0.000000e+00> : vector<9x64xf32>
    %148 = tpu.matmul %143, %144, %cst_61 {dimension_numbers = #tpu.dot_dimension_numbers<[1], [0], [0], [1], [0, 0, 1, 1], [], []>} : vector<9x32xf32>, vector<32x64xf32>, vector<9x64xf32> -> vector<9x64xf32>
    %149 = vector.broadcast %145 : vector<1x64xf32> to vector<9x64xf32>
    %150 = arith.addf %148, %149 : vector<9x64xf32>
    %cst_62 = arith.constant 5.000000e-01 : f32
    %151 = vector.broadcast %cst_62 : f32 to vector<9x64xf32>
    %152 = arith.mulf %151, %150 : vector<9x64xf32>
    %cst_63 = arith.constant 4.471500e-02 : f32
    %153 = vector.broadcast %cst_63 : f32 to vector<9x64xf32>
    %154 = arith.mulf %153, %150 : vector<9x64xf32>
    %155 = arith.mulf %154, %150 : vector<9x64xf32>
    %156 = arith.mulf %155, %150 : vector<9x64xf32>
    %157 = arith.addf %150, %156 : vector<9x64xf32>
    %cst_64 = arith.constant 0.797884583 : f32
    %158 = vector.broadcast %cst_64 : f32 to vector<9x64xf32>
    %159 = arith.mulf %158, %157 : vector<9x64xf32>
    %160 = math.tanh %159 : vector<9x64xf32>
    %cst_65 = arith.constant 1.000000e+00 : f32
    %161 = vector.broadcast %cst_65 : f32 to vector<9x64xf32>
    %162 = arith.addf %161, %160 : vector<9x64xf32>
    %163 = arith.mulf %152, %162 : vector<9x64xf32>
    %cst_66 = arith.constant dense<0.000000e+00> : vector<9x32xf32>
    %164 = tpu.matmul %163, %146, %cst_66 {dimension_numbers = #tpu.dot_dimension_numbers<[1], [0], [0], [1], [0, 0, 1, 1], [], []>} : vector<9x64xf32>, vector<64x32xf32>, vector<9x32xf32> -> vector<9x32xf32>
    %165 = vector.broadcast %147 : vector<1x32xf32> to vector<9x32xf32>
    %166 = arith.addf %164, %165 : vector<9x32xf32>
    %167 = arith.addf %119, %166 : vector<9x32xf32>
    %c0_67 = arith.constant 0 : index
    %c0_68 = arith.constant 0 : index
    %c0_69 = arith.constant 0 : index
    %168 = vector.load %arg14[%c0_67, %c0_68, %c0_69] : memref<1x9x32xf32, #tpu.memory_space<vmem>>, vector<1x9x32xf32>
    %169 = vector.shape_cast %168 : vector<1x9x32xf32> to vector<9x32xf32>
    %170 = vector.shape_cast %167 : vector<9x32xf32> to vector<1x9x32xf32>
    tpu.vector_store %arg14[%c0_67, %c0_68, %c0_69], %170 {strides = array<i32>} : memref<1x9x32xf32, #tpu.memory_space<vmem>>, vector<1x9x32xf32>,
    return
  }
  func.func @transform_0(%arg0: i32) -> (i32, i32, i32) {
    %c0_i32 = arith.constant 0 : i32
    %c0_i32_0 = arith.constant 0 : i32
    %c0_i32_1 = arith.constant 0 : i32
    return %arg0, %c0_i32, %c0_i32_0 : i32, i32, i32
  }
  func.func @transform_1(%arg0: i32) -> (i32, i32) {
    %c0_i32 = arith.constant 0 : i32
    %c0_i32_0 = arith.constant 0 : i32
    %c0_i32_1 = arith.constant 0 : i32
    return %c0_i32, %c0_i32_0 : i32, i32
  }
  func.func @transform_2(%arg0: i32) -> (i32, i32) {
    %c0_i32 = arith.constant 0 : i32
    %c0_i32_0 = arith.constant 0 : i32
    %c0_i32_1 = arith.constant 0 : i32
    return %c0_i32, %c0_i32_0 : i32, i32
  }
  func.func @transform_3(%arg0: i32) -> (i32, i32) {
    %c0_i32 = arith.constant 0 : i32
    %c0_i32_0 = arith.constant 0 : i32
    %c0_i32_1 = arith.constant 0 : i32
    return %c0_i32, %c0_i32_0 : i32, i32
  }
  func.func @transform_4(%arg0: i32) -> (i32, i32) {
    %c0_i32 = arith.constant 0 : i32
    %c0_i32_0 = arith.constant 0 : i32
    %c0_i32_1 = arith.constant 0 : i32
    return %c0_i32, %c0_i32_0 : i32, i32
  }
  func.func @transform_5(%arg0: i32) -> (i32, i32) {
    %c0_i32 = arith.constant 0 : i32
    %c0_i32_0 = arith.constant 0 : i32
    %c0_i32_1 = arith.constant 0 : i32
    return %c0_i32, %c0_i32_0 : i32, i32
  }
  func.func @transform_6(%arg0: i32) -> (i32, i32) {
    %c0_i32 = arith.constant 0 : i32
    %c0_i32_0 = arith.constant 0 : i32
    %c0_i32_1 = arith.constant 0 : i32
    return %c0_i32, %c0_i32_0 : i32, i32
  }
  func.func @transform_7(%arg0: i32) -> (i32, i32) {
    %c0_i32 = arith.constant 0 : i32
    %c0_i32_0 = arith.constant 0 : i32
    %c0_i32_1 = arith.constant 0 : i32
    return %c0_i32, %c0_i32_0 : i32, i32
  }
  func.func @transform_8(%arg0: i32) -> (i32, i32) {
    %c0_i32 = arith.constant 0 : i32
    %c0_i32_0 = arith.constant 0 : i32
    %c0_i32_1 = arith.constant 0 : i32
    return %c0_i32, %c0_i32_0 : i32, i32
  }
  func.func @transform_9(%arg0: i32) -> (i32, i32) {
    %c0_i32 = arith.constant 0 : i32
    %c0_i32_0 = arith.constant 0 : i32
    %c0_i32_1 = arith.constant 0 : i32
    return %c0_i32, %c0_i32_0 : i32, i32
  }
  func.func @transform_10(%arg0: i32) -> (i32, i32) {
    %c0_i32 = arith.constant 0 : i32
    %c0_i32_0 = arith.constant 0 : i32
    %c0_i32_1 = arith.constant 0 : i32
    return %c0_i32, %c0_i32_0 : i32, i32
  }
  func.func @transform_11(%arg0: i32) -> (i32, i32) {
    %c0_i32 = arith.constant 0 : i32
    %c0_i32_0 = arith.constant 0 : i32
    %c0_i32_1 = arith.constant 0 : i32
    return %c0_i32, %c0_i32_0 : i32, i32
  }
  func.func @transform_12(%arg0: i32) -> (i32, i32) {
    %c0_i32 = arith.constant 0 : i32
    %c0_i32_0 = arith.constant 0 : i32
    %c0_i32_1 = arith.constant 0 : i32
    return %c0_i32, %c0_i32_0 : i32, i32
  }
  func.func @transform_13(%arg0: i32) -> (i32, i32, i32) {
    %c0_i32 = arith.constant 0 : i32
    %c0_i32_0 = arith.constant 0 : i32
    %c0_i32_1 = arith.constant 0 : i32
    return %arg0, %c0_i32, %c0_i32_0 : i32, i32, i32
  }
}

</mosaic_0001>

<bundles_post_ra>
// kernel: transformer_pose_estimation_forward.3
= control target key start
LH: loop header
LB: loop body
LE: loop exit
PB: predicated region body
PF: predicated region fallthrough
CT: control target
= control target key end

     0   :  { %s2141_s25 = smov 0   ;;  %s2358_s0 = inlined_call_operand.vmem [shape: f32[2,5,32], index: 0, kind: input, shape index: {}]   ;;  %s2359_s1 = inlined_call_operand.vmem [shape: f32[1,32], index: 1, kind: input, shape index: {}]   ;;  %s2360_s2 = inlined_call_operand.vmem [shape: f32[1,32], index: 2, kind: input, shape index: {}]   ;;  %s2361_s3 = inlined_call_operand.vmem [shape: f32[32,96], index: 3, kind: input, shape index: {}]   ;;  %s2362_s4 = inlined_call_operand.vmem [shape: f32[1,96], index: 4, kind: input, shape index: {}]   ;;  %s2363_s5 = inlined_call_operand.vmem [shape: f32[32,32], index: 5, kind: input, shape index: {}]   ;;  %s2364_s6 = inlined_call_operand.vmem [shape: f32[1,32], index: 6, kind: input, shape index: {}]   ;;  %s2365_s7 = inlined_call_operand.vmem [shape: f32[1,32], index: 7, kind: input, shape index: {}]   ;;  %s2366_s8 = inlined_call_operand.vmem [shape: f32[1,32], index: 8, kind: input, shape index: {}]   ;;  %s2367_s9 = inlined_call_operand.vmem [shape: f32[32,64], index: 9, kind: input, shape index: {}]   ;;  %s2368_s10 = inlined_call_operand.vmem [shape: f32[1,64], index: 10, kind: input, shape index: {}]   ;;  %s2369_s11 = inlined_call_operand.vmem [shape: f32[64,32], index: 11, kind: input, shape index: {}]   ;;  %s2370_s12 = inlined_call_operand.vmem [shape: f32[1,32], index: 12, kind: input, shape index: {}]   ;;  %s2371_s13 = inlined_call_operand.vmem [shape: f32[2,5,32], index: 13, kind: output, shape index: {}]  }
   0x1 LB: > { %s1797_s26 = sadd.s32 4294967295, %s2055_s25   ;;  %p1801_p0 = scmp.ge.s32.totalorder %s2055_s25, 1  ;;  %s2055_s25 = sphi %s2141_s25, %s23_s25  }
   0x2   : > { %p386_p1 = scmp.lt.s32.totalorder %s2055_s25, 3 }
   0x4   : > { %p387_p2 = pnand %p1801_p0, %p386_p1 }
   0x5   : > { %p428_p3 = scmp.lt.s32.totalorder (!%p387_p2), %s1797_s26, 1  ;;  %vm439_vm0 = vcmask (!%p387_p2), 258048   ;;  %v468_v7 = vld [vmem:[%s2361_s3] sm:$0xff] (!%p387_p2)  ;;  %v469_v8 = vld [vmem:[%s2361_s3 + $0x8] sm:$0xff] (!%p387_p2)  ;;  %v470_v9 = vld [vmem:[%s2361_s3 + $0x10] sm:$0xff] (!%p387_p2)  ;;  %v2057_v10 = vmov (!%p387_p2), 0.0|0.0  }
   0x6   : > { %390 = sbr.rel (%p387_p2) target bundleno = 3669 (0xe55), region = 72  ;;  %1981 = vmatprep.subr.bf16.mxu0 (!%p387_p2), %v2057_v10  ;;  %v1982_v11 = vpack.c.bf16 (!%p387_p2), %v469_v8, %v468_v7  ;;  %v471_v12 = vld [vmem:[%s2361_s3 + $0x18] sm:$0xff] (!%p387_p2)  ;;  %vm2058_vm1 = vmmov (!%p387_p2), 0   ;;  %v2059_v13 = vmov (!%p387_p2), 0.0   ;;  %v1804_v19 = vld [vmem:[%s2359_s1] ss:$0 sm:$0xff] (!%p387_p2) }
   0x7   : > { %1888 = vmatprep.mubr.msk.f32.mxu0 (!%p387_p2), %vm2058_vm1, %v2059_v13  ;;  %1896 = vmatprep.subr.mxu1 (!%p387_p2), %v2059_v13  ;;  %v1985_v14 = vpack.c.bf16 (!%p387_p2), %v471_v12, %v470_v9  ;;  %v1805_v21 = vld [vmem:[%s2360_s2] ss:$0 sm:$0xff] (!%p387_p2)  ;;  %vm484_vm2 = vcmask (!%p387_p2), 261120   ;;  %s2060_s14 = smov (!%p387_p2), 120   ;;  %s2061_s15 = smov (!%p387_p2), 96   ;;  %vm561_vm3 = vcmask (!%p387_p2), 64512  }
   0x8   : > { %1898 = vmatprep.mubr.msk.f32.mxu1 (!%p387_p2), %vm2058_vm1, %v2059_v13  ;;  %1983 = vmatpush3.bf16.msra.mxu0 (!%p387_p2), %v1982_v11  ;;  %v1806_v24 = vld [vmem:[%s2362_s4] ss:$0 sm:$0xff] (!%p387_p2)  ;;  %s2062_s16 = smov (!%p387_p2), 88   ;;  %vm637_vm4 = vcmask (!%p387_p2), 36864   ;;  %s2063_s17 = smov (!%p387_p2), 56   ;;  %v474_v49 = vld [vmem:[%s2363_s5 + $0x8] sm:$0xff] (!%p387_p2) }
   0x9   : > { %1984 = vmatprep.subr.bf16.mxu0 (!%p387_p2), %v2057_v10  ;;  %s2064_s18 = smov (!%p387_p2), 64   ;;  %s2065_s19 = smov (!%p387_p2), 80   ;;  %vm655_vm5 = vcmask (!%p387_p2), 1044480   ;;  %vm651_vm6 = vcmask (!%p387_p2), 39936   ;;  %v473_v58 = vld [vmem:[%s2363_s5] sm:$0xff] (!%p387_p2)  ;;  %vm1668_vm7 = vcmask (!%p387_p2), 523264  }
   0xa   : > { %s2066_s20 = smov (!%p387_p2), 112   ;;  %s2067_s28 = smov (!%p387_p2), 48  }
   0xb   : > { %s2068_s29 = smov (!%p387_p2), 104  }
   0xc   : > { %1986 = vmatpush3.bf16.msra.mxu0 (!%p387_p2), %v1985_v14 }
   0xd   : > { %s2373_s26 = smov (!%p428_p3, %s1797_s26), 1  ;;  %1891 = vmatprep.subr.mxu0 %v2059_v13 }
   0xe   : > { %s1802_s27 = sshll.u32 %s2373_s26, 3 }
   0xf   : > { %s431_s30 = scalar_lea.vmem %s2358_s0, %s1802_s27 }
  0x10   : > { %v2157_v0 = vld [vmem:[%s431_s30] sm:$0x1f]  ;;  %s2069_s30 = smov 72  }
  0x11   : > { %v440_v1 = vsel %vm439_vm0, %v2157_v0, 0.0 }
  0x12   : > { %441 = vadd.xlane.f32.xlu0 %v440_v1 }
  0x9f   : > { %v442_v2 = vpop.xlane.xlu0 %441 }
  0xa0   : > { %v444_v3 = vmul.f32 0.03125, %v442_v2 }
  0xa2   : > { %v445_v4 = vsub.f32 %v2157_v0, %v444_v3 }
  0xa4   : > { %v446_v5 = vmul.f32 %v445_v4, %v445_v4 }
  0xa6   : > { %v447_v6 = vsel %vm439_vm0, %v446_v5, 0.0 }
  0xa7   : > { %448 = vadd.xlane.f32.xlu0 %v447_v6 }
 0x134   : > { %v449_v15 = vpop.xlane.xlu0 %448 }
 0x135   : > { %v450_v16 = vmul.f32 0.03125, %v449_v15 }
 0x137   : > { %v451_v17 = vadd.f32 1e-05, %v450_v16 }
 0x139   : > { %2027 = vrsqrt.f32 %v451_v17 }
 0x143   : > { %v2028_v18 = vpop.eup %2027 }
 0x144   : > { %v453_v20 = vmul.f32 %v2028_v18, %v445_v4 }
 0x146   : > { %v460_v22 = vmul.f32 %v1804_v19, %v453_v20 }
 0x148   : > { %v467_v23 = vadd.f32 %v1805_v21, %v460_v22 }
 0x14a   : > { %1889 = vmatmul.mubr.msk.f32.vlgmr.msra.gmra.mrb[0].mxu0 %vm484_vm2, %v467_v23 }
 0x14b   : > { %1893 = vmatprep.mubr.msk.f32.mxu0 %vm2058_vm1, %v2059_v13 }
 0x21d   : > { %v554_v25 = vpop.f32.mrb[0].mxu0 }
 0x21e   : > { %v2195_v26 = vadd.f32 %v1806_v24, %v554_v25  ;;  %v1890_v27 = vpop.f32.mrb[1].mxu0  ;;  %v475_v24 = vld [vmem:[%s2363_s5 + $0x10] sm:$0xff] }
 0x220   : > { %728 = vrot.lane.b32.xlu0 %v2195_v26, %s2060_s14  ;;  %559 = vrot.lane.b32.xlu1 %v2195_v26, %s2061_s15 }
 0x224   : > { %730 = vrot.lane.b32.xlu1 %v2195_v26, %s2062_s16  ;;  %s2070_s16 = smov 40  }
 0x292   : > { %v560_v28 = vpop.permute.xlu1 %559  ;;  %v729_v30 = vpop.permute.xlu0 %728 }
 0x293   : > { %1892 = vmatpush3.xpose.msk.msra.mxu0 %vm561_vm3, %v560_v28 }
 0x294   : > { %1901 = vmatprep.subr.mxu0 %v2059_v13 }
 0x296   : > { %1894 = vmatmul.mubr.msk.f32.vlgmr.msra.gmra.mrb[2].mxu0 %vm561_vm3, %v2195_v26  ;;  %v731_v29 = vpop.permute.xlu1 %730 }
 0x297   : > { %1902 = vmatpush3.xpose.msk.msra.mxu0 %vm561_vm3, %v731_v29  ;;  %1903 = vmatprep.mubr.msk.f32.mxu0 %vm2058_vm1, %v2059_v13 }
 0x298   : > { %1911 = vmatprep.subr.mxu0 %v2059_v13 }
 0x29a   : > { %1904 = vmatmul.mubr.msk.f32.vlgmr.msra.gmra.mrb[4].mxu0 %vm561_vm3, %v729_v30 }
 0x29b   : > { %1913 = vmatprep.mubr.msk.f32.mxu0 %vm2058_vm1, %v2059_v13  ;;  %1912 = vmatpush3.msra.mxu0 %v474_v49 }
 0x29c   : > { %1921 = vmatprep.subr.mxu0 %v2059_v13 }
 0x369   : > { %v632_v31 = vpop.f32.mrb[2].mxu0 }
 0x36a   : > { %v636_v32 = vmul.f32 0.35355338, %v632_v31  ;;  %v1895_v33 = vpop.f32.mrb[3].mxu0 }
 0x36c   : > { %v638_v34 = vsel %vm637_vm4, %v636_v32, -inf }
 0x36d   : > { %639 = vmax.xlane.f32.xlu1 %v638_v34  ;;  %v802_v35 = vpop.f32.mrb[4].mxu0 }
 0x36e   : > { %v806_v36 = vmul.f32 0.35355338, %v802_v35  ;;  %v1905_v37 = vpop.f32.mrb[5].mxu0 }
 0x36f   : > { %v476_v37 = vld [vmem:[%s2363_s5 + $0x18] sm:$0xff] }
 0x370   : > { %v807_v38 = vsel %vm637_vm4, %v806_v36, -inf }
 0x371   : > { %808 = vmax.xlane.f32.xlu0 %v807_v38 }
 0x387   : > { %818 = vrot.lane.b32.xlu0 %v2195_v26, %s2063_s17 }
 0x3fa   : > { %v640_v39 = vpop.xlane.xlu1 %639 }
 0x3fb   : > { %v641_v40 = vsub.f32 %v636_v32, %v640_v39 }
 0x3fd   : > { %v642_v41 = vmul.f32 1.442695, %v641_v40 }
 0x3fe   : > { %v809_v42 = vpop.xlane.xlu0 %808 }
 0x3ff   : > { %2029 = vpow2.f32 %v642_v41  ;;  %v810_v43 = vsub.f32 %v806_v36, %v809_v42 }
 0x401   : > { %v811_v44 = vmul.f32 1.442695, %v810_v43 }
 0x402   : > { %v819_v55 = vpop.permute.xlu0 %818 }
 0x403   : > { %2031 = vpow2.f32 %v811_v44 }
 0x409   : > { %v2030_v45 = vpop.eup %2029 }
 0x40a   : > { %v644_v46 = vsel %vm637_vm4, %v2030_v45, 0.0 }
 0x40b   : > { %645 = vadd.xlane.f32.xlu1 %v644_v46  ;;  %v1828_v46 = vld [vmem:[%s2364_s6] ss:$0 sm:$0xff] }
 0x40d   : > { %v2032_v47 = vpop.eup %2031 }
 0x40e   : > { %v813_v48 = vsel %vm637_vm4, %v2032_v47, 0.0 }
 0x40f   : > { %814 = vadd.xlane.f32.xlu1 %v813_v48 }
 0x420   : > { %649 = vrot.lane.b32.xlu1 %v2195_v26, %s2064_s18 }
 0x424   : > { %1043 = vrot.lane.b32.xlu1 %v2195_v26, %s2065_s19 }
 0x428   : > { %1041 = vrot.lane.b32.xlu1 %v2195_v26, %s2066_s20 }
 0x498   : > { %v646_v50 = vpop.xlane.xlu1 %645 }
 0x499   : > { %2033 = vrcp.f32 %v646_v50 }
 0x49c   : > { %v815_v51 = vpop.xlane.xlu1 %814 }
 0x49d   : > { %2035 = vrcp.f32 %v815_v51 }
 0x4a0   : > { %v650_v52 = vpop.permute.xlu1 %649 }
 0x4a1   : > { %1897 = vmatpush3.msk.msra.mxu1 %vm655_vm5, %v650_v52 }
 0x4a2   : > { %1906 = vmatprep.subr.mxu1 %v2059_v13 }
 0x4a3   : > { %v2034_v53 = vpop.eup %2033 }
 0x4a4   : > { %v648_v54 = vmul.f32 %v2034_v53, %v2030_v45  ;;  %v1044_v61 = vpop.permute.xlu1 %1043 }
 0x4a6   : > { %1899 = vmatmul.mubr.msk.f32.vlgmr.msra.gmra.mrb[0].mxu1 %vm651_vm6, %v648_v54 }
 0x4a7   : > { %v2036_v56 = vpop.eup %2035  ;;  %1907 = vmatpush3.msk.msra.mxu1 %vm655_vm5, %v819_v55  ;;  %1908 = vmatprep.mubr.msk.f32.mxu1 %vm2058_vm1, %v2059_v13 }
 0x4a8   : > { %v817_v57 = vmul.f32 %v2036_v56, %v2032_v47  ;;  %1916 = vmatprep.subr.mxu1 %v2059_v13  ;;  %v1042_v1 = vpop.permute.xlu1 %1041 }
 0x4aa   : > { %1909 = vmatmul.mubr.msk.f32.vlgmr.msra.gmra.mrb[2].mxu1 %vm651_vm6, %v817_v57  ;;  %v1560_v57 = vld [vmem:[%s2367_s9] sm:$0xff] }
 0x4ab   : > { %1918 = vmatprep.mubr.msk.f32.mxu1 %vm2058_vm1, %v2059_v13  ;;  %1917 = vmatpush3.msra.mxu1 %v473_v58 }
 0x4ac   : > { %1926 = vmatprep.subr.mxu1 %v2059_v13 }
 0x579   : > { %v724_v59 = vpop.f32.mrb[0].mxu1 }
 0x57a   : > { %v1900_v60 = vpop.f32.mrb[1].mxu1  ;;  %1919 = vmatmul.mubr.msk.f32.vlgmr.msra.gmra.mrb[4].mxu1 %vm561_vm3, %v724_v59  ;;  %v1562_v59 = vld [vmem:[%s2367_s9 + $0x10] sm:$0xff] }
 0x57b   : > { %1928 = vmatprep.mubr.msk.f32.mxu1 %vm2058_vm1, %v2059_v13  ;;  %v1563_v60 = vld [vmem:[%s2367_s9 + $0x18] sm:$0xff] }
 0x57d   : > { %v891_v62 = vpop.f32.mrb[2].mxu1 }
 0x57e   : > { %v1910_v63 = vpop.f32.mrb[3].mxu1  ;;  %1914 = vmatmul.mubr.msk.f32.vlgmr.msra.gmra.mrb[6].mxu0 %vm561_vm3, %v891_v62 }
 0x57f   : > { %1922 = vmatpush3.xpose.msk.msra.mxu0 %vm561_vm3, %v1044_v61  ;;  %1923 = vmatprep.mubr.msk.f32.mxu0 %vm2058_vm1, %v2059_v13  ;;  %v1991_v61 = vpack.c.bf16 %v1563_v60, %v1562_v59 }
 0x580   : > { %1931 = vmatprep.subr.mxu0 %v2059_v13 }
 0x582   : > { %1924 = vmatmul.mubr.msk.f32.vlgmr.msra.gmra.mrb[8].mxu0 %vm561_vm3, %v1042_v1 }
 0x583   : > { %1933 = vmatprep.mubr.msk.f32.mxu0 %vm2058_vm1, %v2059_v13  ;;  %1932 = vmatpush3.msra.mxu0 %v475_v24 }
 0x584   : > { %1941 = vmatprep.subr.mxu0 %v2059_v13 }
 0x64d   : > { %v1037_v2 = vpop.f32.mrb[4].mxu1 }
 0x64e   : > { %v1920_v3 = vpop.f32.mrb[5].mxu1 }
 0x64f   : > { %v1829_v3 = vld [vmem:[%s2365_s7] ss:$0 sm:$0xff] }
 0x651   : > { %v964_v4 = vpop.f32.mrb[6].mxu0 }
 0x652   : > { %v1038_v5 = vadd.f32 %v1037_v2, %v964_v4  ;;  %v1915_v6 = vpop.f32.mrb[7].mxu0 }
 0x655   : > { %v1115_v7 = vpop.f32.mrb[8].mxu0 }
 0x656   : > { %v1119_v8 = vmul.f32 0.35355338, %v1115_v7  ;;  %v1925_v9 = vpop.f32.mrb[9].mxu0 }
 0x657   : > { %v1566_v9 = vld [vmem:[%s2369_s11 + $0x8] sm:$0xff] }
 0x658   : > { %v1120_v11 = vsel %vm637_vm4, %v1119_v8, -inf }
 0x659   : > { %1121 = vmax.xlane.f32.xlu1 %v1120_v11 }
 0x66a   : > { %1131 = vrot.lane.b32.xlu1 %v2195_v26, %s2067_s28 }
 0x66e   : > { %1282 = vrot.lane.b32.xlu1 %v2195_v26, %s2068_s29 }
 0x6e6   : > { %v1122_v12 = vpop.xlane.xlu1 %1121 }
 0x6e7   : > { %v1123_v14 = vsub.f32 %v1119_v8, %v1122_v12  ;;  %v1565_v8 = vld [vmem:[%s2369_s11] sm:$0xff]  ;;  %v1567_v12 = vld [vmem:[%s2369_s11 + $0x10] sm:$0xff] }
 0x6e8   : > { %v1994_v11 = vpack.c.bf16 %v1566_v9, %v1565_v8 }
 0x6e9   : > { %v1124_v15 = vmul.f32 1.442695, %v1123_v14  ;;  %v1568_v14 = vld [vmem:[%s2369_s11 + $0x18] sm:$0xff] }
 0x6ea   : > { %v1132_v16 = vpop.permute.xlu1 %1131 }
 0x6eb   : > { %2037 = vpow2.f32 %v1124_v15  ;;  %1927 = vmatpush3.msk.msra.mxu1 %vm655_vm5, %v1132_v16  ;;  %v1997_v15 = vpack.c.bf16 %v1568_v14, %v1567_v12  ;;  %v1569_v16 = vld [vmem:[%s2369_s11 + $0x20] sm:$0xff] }
 0x6ec   : > { %1936 = vmatprep.subr.mxu1 %v2059_v13 }
 0x6ee   : > { %v1283_v23 = vpop.permute.xlu1 %1282 }
 0x6f5   : > { %v2038_v17 = vpop.eup %2037 }
 0x6f6   : > { %v1126_v18 = vsel %vm637_vm4, %v2038_v17, 0.0 }
 0x6f7   : > { %1127 = vadd.xlane.f32.xlu0 %v1126_v18 }
 0x70d   : > { %1284 = vrot.lane.b32.xlu0 %v2195_v26, %s2069_s30  ;;  %s435_s30 = scalar_lea.vmem %s2371_s13, %s1802_s27 }
 0x784   : > { %v1128_v19 = vpop.xlane.xlu0 %1127 }
 0x785   : > { %2039 = vrcp.f32 %v1128_v19  ;;  %v1571_v19 = vld [vmem:[%s2369_s11 + $0x30] sm:$0xff] }
 0x788   : > { %v1285_v22 = vpop.permute.xlu0 %1284 }
 0x78f   : > { %v2040_v20 = vpop.eup %2039 }
 0x790   : > { %v1130_v21 = vmul.f32 %v2040_v20, %v2038_v17  ;;  %v1570_v17 = vld [vmem:[%s2369_s11 + $0x28] sm:$0xff]  ;;  %v1572_v20 = vld [vmem:[%s2369_s11 + $0x38] sm:$0xff] }
 0x791   : > { %v2000_v18 = vpack.c.bf16 %v1570_v17, %v1569_v16 }
 0x792   : > { %1929 = vmatmul.mubr.msk.f32.vlgmr.msra.gmra.mrb[6].mxu1 %vm651_vm6, %v1130_v21  ;;  %v2003_v21 = vpack.c.bf16 %v1572_v20, %v1571_v19 }
 0x793   : > { %1937 = vmatpush3.xpose.msk.msra.mxu1 %vm561_vm3, %v1285_v22  ;;  %1938 = vmatprep.mubr.msk.f32.mxu1 %vm2058_vm1, %v2059_v13  ;;  %v1831_v22 = vld [vmem:[%s2368_s10] ss:$0 sm:$0xff] }
 0x794   : > { %1946 = vmatprep.subr.mxu1 %v2059_v13 }
 0x796   : > { %1939 = vmatmul.mubr.msk.f32.vlgmr.msra.gmra.mrb[8].mxu1 %vm561_vm3, %v1283_v23 }
 0x797   : > { %1948 = vmatprep.mubr.msk.f32.mxu1 %vm2058_vm1, %v2059_v13  ;;  %1947 = vmatpush3.msra.mxu1 %v476_v37 }
 0x798   : > { %1993 = vmatprep.subr.bf16.mxu1 %v2057_v10 }
 0x865   : > { %v1204_v25 = vpop.f32.mrb[6].mxu1 }
 0x866   : > { %v1930_v27 = vpop.f32.mrb[7].mxu1  ;;  %1934 = vmatmul.mubr.msk.f32.vlgmr.msra.gmra.mrb[10].mxu0 %vm561_vm3, %v1204_v25 }
 0x867   : > { %1943 = vmatprep.mubr.msk.f32.mxu0 %vm2058_vm1, %v2059_v13 }
 0x869   : > { %v1356_v28 = vpop.f32.mrb[8].mxu1 }
 0x86a   : > { %v1360_v29 = vmul.f32 0.35355338, %v1356_v28  ;;  %v1940_v30 = vpop.f32.mrb[9].mxu1 }
 0x86c   : > { %v1361_v31 = vsel %vm637_vm4, %v1360_v29, -inf }
 0x86d   : > { %1362 = vmax.xlane.f32.xlu1 %v1361_v31 }
 0x8fa   : > { %v1363_v32 = vpop.xlane.xlu1 %1362 }
 0x8fb   : > { %v1364_v33 = vsub.f32 %v1360_v29, %v1363_v32 }
 0x8fd   : > { %v1365_v34 = vmul.f32 1.442695, %v1364_v33 }
 0x8ff   : > { %2041 = vpow2.f32 %v1365_v34 }
 0x909   : > { %v2042_v35 = vpop.eup %2041 }
 0x90a   : > { %v1367_v36 = vsel %vm637_vm4, %v2042_v35, 0.0 }
 0x90b   : > { %1368 = vadd.xlane.f32.xlu0 %v1367_v36 }
 0x921   : > { %1372 = vrot.lane.b32.xlu0 %v2195_v26, %s2070_s16 }
 0x939   : > { %v1277_v38 = vpop.f32.mrb[10].mxu0 }
 0x93a   : > { %v1281_v39 = vadd.f32 %v1277_v38, %v1038_v5  ;;  %v1935_v40 = vpop.f32.mrb[11].mxu0  ;;  %v1830_v5 = vld [vmem:[%s2366_s8] ss:$0 sm:$0xff] }
 0x998   : > { %v1369_v41 = vpop.xlane.xlu0 %1368 }
 0x999   : > { %2043 = vrcp.f32 %v1369_v41 }
 0x99c   : > { %v1373_v42 = vpop.permute.xlu0 %1372 }
 0x99d   : > { %1942 = vmatpush3.msk.msra.mxu0 %vm655_vm5, %v1373_v42 }
 0x99e   : > { %1987 = vmatprep.subr.bf16.mxu0 %v2057_v10 }
 0x9a3   : > { %v2044_v43 = vpop.eup %2043 }
 0x9a4   : > { %v1371_v44 = vmul.f32 %v2044_v43, %v2042_v35  ;;  %v1833_v35 = vld [vmem:[%s2370_s12] ss:$0 sm:$0xff] }
 0x9a6   : > { %1944 = vmatmul.mubr.msk.f32.vlgmr.msra.gmra.mrb[12].mxu0 %vm651_vm6, %v1371_v44 }
 0x9a7   : > { %1959 = vmatprep.mubr.msk.f32.mxu0 %vm2058_vm1, %v2059_v13 }
 0xa79   : > { %v1445_v26 = vpop.f32.mrb[12].mxu0 }
 0xa7a   : > { %v1945_v45 = vpop.f32.mrb[13].mxu0  ;;  %1949 = vmatmul.mubr.msk.f32.vlgmr.msra.gmra.mrb[10].mxu1 %vm561_vm3, %v1445_v26 }
 0xa7b   : > { %1978 = vmatprep.mubr.msk.f32.mxu1 %vm2058_vm1, %v2059_v13  ;;  %1995 = vmatpush3.bf16.msra.mxu1 %v1994_v11 }
 0xa7c   : > { %1996 = vmatprep.subr.bf16.mxu1 %v2057_v10 }
 0xa7f   : > { %1998 = vmatpush3.bf16.msra.mxu1 %v1997_v15 }
 0xa80   : > { %1999 = vmatprep.subr.bf16.mxu1 %v2057_v10 }
 0xa83   : > { %2001 = vmatpush3.bf16.msra.mxu1 %v2000_v18 }
 0xa84   : > { %2002 = vmatprep.subr.bf16.mxu1 %v2057_v10 }
 0xa87   : > { %2004 = vmatpush3.bf16.msra.mxu1 %v2003_v21 }
 0xb4d   : > { %v1518_v47 = vpop.f32.mrb[10].mxu1 }
 0xb4e   : > { %v1522_v48 = vadd.f32 %v1518_v47, %v1281_v39  ;;  %v1950_v49 = vpop.f32.mrb[11].mxu1 }
 0xb50   : > { %v1529_v50 = vadd.f32 %v1828_v46, %v1522_v48 }
 0xb52   : > { %v2289_v51 = vadd.f32 %v1529_v50, %v2157_v0  ;;  %v1561_v0 = vld [vmem:[%s2367_s9 + $0x8] sm:$0xff] }
 0xb53   : > { %v1988_v58 = vpack.c.bf16 %v1561_v0, %v1560_v57 }
 0xb54   : > { %v1533_v52 = vsel %vm439_vm0, %v2289_v51, 0.0 }
 0xb55   : > { %1534 = vadd.xlane.f32.xlu1 %v1533_v52  ;;  %1989 = vmatpush3.bf16.msra.mxu0 %v1988_v58 }
 0xb56   : > { %1990 = vmatprep.subr.bf16.mxu0 %v2057_v10 }
 0xb59   : > { %1992 = vmatpush3.bf16.msra.mxu0 %v1991_v61 }
 0xbe2   : > { %v1535_v53 = vpop.xlane.xlu1 %1534 }
 0xbe3   : > { %v1536_v54 = vmul.f32 0.03125, %v1535_v53 }
 0xbe5   : > { %v1537_v55 = vsub.f32 %v2289_v51, %v1536_v54 }
 0xbe7   : > { %v1538_v13 = vmul.f32 %v1537_v55, %v1537_v55 }
 0xbe9   : > { %v1539_v56 = vsel %vm439_vm0, %v1538_v13, 0.0 }
 0xbea   : > { %1540 = vadd.xlane.f32.xlu1 %v1539_v56 }
 0xc77   : > { %v1541_v62 = vpop.xlane.xlu1 %1540 }
 0xc78   : > { %v1542_v63 = vmul.f32 0.03125, %v1541_v62 }
 0xc7a   : > { %v1543_v1 = vadd.f32 1e-05, %v1542_v63 }
 0xc7c   : > { %2045 = vrsqrt.f32 %v1543_v1 }
 0xc86   : > { %v2046_v2 = vpop.eup %2045 }
 0xc87   : > { %v1545_v4 = vmul.f32 %v2046_v2, %v1537_v55 }
 0xc89   : > { %v1552_v6 = vmul.f32 %v1829_v3, %v1545_v4 }
 0xc8b   : > { %v1559_v7 = vadd.f32 %v1830_v5, %v1552_v6 }
 0xc8d   : > { %1960 = vmatmul.mubr.msk.f32.vlgmr.msra.gmra.mrb[14].mxu0 %vm484_vm2, %v1559_v7 }
 0xd60   : > { %v1649_v23 = vpop.f32.mrb[14].mxu0 }
 0xd61   : > { %v1650_v24 = vadd.f32 %v1831_v22, %v1649_v23  ;;  %v1961_v25 = vpop.f32.mrb[15].mxu0 }
 0xd63   : > { %v1654_v27 = vmul.f32 0.044715, %v1650_v24  ;;  %v1653_v33 = vmul.f32 0.5, %v1650_v24 }
 0xd65   : > { %v1655_v28 = vmul.f32 %v1654_v27, %v1650_v24 }
 0xd67   : > { %v1656_v29 = vmul.f32 %v1655_v28, %v1650_v24 }
 0xd69   : > { %v1657_v30 = vadd.f32 %v1656_v29, %v1650_v24 }
 0xd6b   : > { %v1658_v31 = vmul.f32 0.7978846, %v1657_v30 }
 0xd6d   : > { %2047 = vtanh.f32 %v1658_v31 }
 0xd77   : > { %v2048_v32 = vpop.eup %2047 }
 0xd78   : > { %v1660_v34 = vadd.f32 1.0, %v2048_v32 }
 0xd7a   : > { %v1661_v10 = vmul.f32 %v1660_v34, %v1653_v33 }
 0xd7c   : > { %1979 = vmatmul.mubr.msk.f32.vlgmr.msra.gmra.mrb[12].mxu1 %vm1668_vm7, %v1661_v10 }
 0xe4f   : > { %v1738_v36 = vpop.f32.mrb[12].mxu1 }
 0xe50   : > { %v1739_v37 = vadd.f32 %v1833_v35, %v1738_v36  ;;  %v1980_v38 = vpop.f32.mrb[13].mxu1 }
 0xe52   : > { %v1742_v39 = vadd.f32 %v1739_v37, %v2289_v51 }
 0xe54   : > { %1743 = vst.msk [vmem:[%s435_s30] sm:$0x1f] %vm439_vm0, %v1742_v39 }
 0xe55 PF: > { %s23_s25 = sadd.s32 1, %s2055_s25  }
 0xe56   : > { %p20_p4 = scmp.ge.s32.totalorder %s23_s25, 4  }
 0xe58   :  { %22 = sbr.rel (!%p20_p4) target bundleno = 1 (0x1), region = 102 }

// kernel: transformer_pose_estimation_forward.5
= control target key start
LH: loop header
LB: loop body
LE: loop exit
PB: predicated region body
PF: predicated region fallthrough
CT: control target
= control target key end

     0   :  { %s2575_s25 = smov 0   ;;  %s2823_s0 = inlined_call_operand.vmem [shape: f32[2,9,32], index: 0, kind: input, shape index: {}]   ;;  %s2824_s1 = inlined_call_operand.vmem [shape: f32[1,32], index: 1, kind: input, shape index: {}]   ;;  %s2825_s2 = inlined_call_operand.vmem [shape: f32[1,32], index: 2, kind: input, shape index: {}]   ;;  %s2826_s3 = inlined_call_operand.vmem [shape: f32[32,96], index: 3, kind: input, shape index: {}]   ;;  %s2827_s4 = inlined_call_operand.vmem [shape: f32[1,96], index: 4, kind: input, shape index: {}]   ;;  %s2828_s5 = inlined_call_operand.vmem [shape: f32[32,32], index: 5, kind: input, shape index: {}]   ;;  %s2829_s6 = inlined_call_operand.vmem [shape: f32[1,32], index: 6, kind: input, shape index: {}]   ;;  %s2830_s7 = inlined_call_operand.vmem [shape: f32[1,32], index: 7, kind: input, shape index: {}]   ;;  %s2831_s8 = inlined_call_operand.vmem [shape: f32[1,32], index: 8, kind: input, shape index: {}]   ;;  %s2832_s9 = inlined_call_operand.vmem [shape: f32[32,64], index: 9, kind: input, shape index: {}]   ;;  %s2833_s10 = inlined_call_operand.vmem [shape: f32[1,64], index: 10, kind: input, shape index: {}]   ;;  %s2834_s11 = inlined_call_operand.vmem [shape: f32[64,32], index: 11, kind: input, shape index: {}]   ;;  %s2835_s12 = inlined_call_operand.vmem [shape: f32[1,32], index: 12, kind: input, shape index: {}]   ;;  %s2836_s13 = inlined_call_operand.vmem [shape: f32[2,9,32], index: 13, kind: output, shape index: {}]  }
   0x1 LB: > { %s2049_s26 = sadd.s32 4294967295, %s2491_s25   ;;  %p2053_p0 = scmp.ge.s32.totalorder %s2491_s25, 1  ;;  %s2491_s25 = sphi %s2575_s25, %s23_s25  }
   0x2   : > { %p387_p1 = scmp.lt.s32.totalorder %s2491_s25, 3 }
   0x4   : > { %p388_p2 = pnand %p2053_p0, %p387_p1 }
   0x5   : > { %p431_p3 = scmp.lt.s32.totalorder (!%p388_p2), %s2049_s26, 1  ;;  %vm445_vm0 = vcmask (!%p388_p2), 261120   ;;  %vm449_vm1 = vcmask (!%p388_p2), 253952   ;;  %v490_v14 = vld [vmem:[%s2826_s3] sm:$0xff] (!%p388_p2)  ;;  %v491_v15 = vld [vmem:[%s2826_s3 + $0x8] sm:$0xff] (!%p388_p2)  ;;  %v492_v16 = vld [vmem:[%s2826_s3 + $0x10] sm:$0xff] (!%p388_p2) }
   0x6   : > { %391 = sbr.rel (%p388_p2) target bundleno = 2969 (0xb99), region = 72  ;;  %v2295_v17 = vpack.c.bf16 (!%p388_p2), %v491_v15, %v490_v14  ;;  %v493_v18 = vld [vmem:[%s2826_s3 + $0x18] sm:$0xff] (!%p388_p2)  ;;  %v2058_v27 = vld [vmem:[%s2824_s1] ss:$0 sm:$0xff] (!%p388_p2)  ;;  %vm593_vm2 = vcmask (!%p388_p2), 64512   ;;  %s2493_s14 = smov (!%p388_p2), 88  }
   0x7   : > { %v2299_v19 = vpack.c.bf16 (!%p388_p2), %v493_v18, %v492_v16  ;;  %v2059_v29 = vld [vmem:[%s2825_s2] ss:$0 sm:$0xff] (!%p388_p2)  ;;  %s2494_s15 = smov (!%p388_p2), 96   ;;  %s2495_s16 = smov (!%p388_p2), 120   ;;  %vm2645_vm3 = vmpackc.low (!%p388_p2), %vm593_vm2, %vm593_vm2  ;;  %vm683_vm4 = vcmask (!%p388_p2), 65536   ;;  %vm679_vm5 = vcmask (!%p388_p2), 72704  }
   0x8   : > { %2296 = vmatprep.subr.bf16.mxu1 (!%p388_p2), %v2295_v17  ;;  %v2060_v36 = vld [vmem:[%s2827_s4] ss:$0 sm:$0xff] (!%p388_p2)  ;;  %s2496_s17 = smov (!%p388_p2), 80   ;;  %s2497_s18 = smov (!%p388_p2), 112   ;;  %vm714_vm6 = vcmask (!%p388_p2), 1040384   ;;  %vm2502_vm7 = vmmov (!%p388_p2), 1  }
   0x9   : > { %2298 = vmatpush3.bf16.msra.mxu1 (!%p388_p2), %v2295_v17  ;;  %s2498_s19 = smov (!%p388_p2), 64   ;;  %s2499_s20 = smov (!%p388_p2), 72   ;;  %vm2683_vm8 = vmpackc.low (!%p388_p2), %vm714_vm6, %vm2502_vm7  ;;  %vm1908_vm9 = vcmask (!%p388_p2), 523264  }
   0xa   : > { %2300 = vmatprep.subr.bf16.mxu1 (!%p388_p2), %v2299_v19  ;;  %s2500_s21 = smov (!%p388_p2), 104   ;;  %s2501_s22 = smov (!%p388_p2), 56  }
   0xd   : > { %s2842_s26 = smov (!%p431_p3, %s2049_s26), 1  ;;  %2302 = vmatpush3.bf16.msra.mxu1 %v2299_v19 }
   0xe   : > { %s2110_s27 = sshll.u32 %s2842_s26, 4 }
   0xf   : > { %s435_s30 = scalar_lea.vmem %s2823_s0, %s2110_s27 }
  0x10   : > { %v2591_v0 = vld [vmem:[%s435_s30] sm:$0xff]  ;;  %v2593_v1 = vld [vmem:[%s435_s30 + $0x8] sm:$0x1]  ;;  %s2503_s30 = smov 48  }
  0x11   : > { %v446_v2 = vsel %vm445_vm0, %v2591_v0, 0.0  ;;  %v450_v3 = vsel %vm449_vm1, %v2593_v1, 0.0 }
  0x12   : > { %447 = vadd.xlane.f32.xlu0 %v446_v2 }
  0x16   : > { %451 = vadd.xlane.f32.xlu0 %v450_v3 }
  0x9f   : > { %v448_v4 = vpop.xlane.xlu0 %447 }
  0xa0   : > { %v454_v5 = vmul.f32 0.03125, %v448_v4 }
  0xa2   : > { %v456_v6 = vsub.f32 %v2591_v0, %v454_v5 }
  0xa3   : > { %v452_v7 = vpop.xlane.xlu0 %451 }
  0xa4   : > { %v455_v8 = vmul.f32 0.03125, %v452_v7  ;;  %v458_v9 = vmul.f32 %v456_v6, %v456_v6 }
  0xa6   : > { %v457_v10 = vsub.f32 %v2593_v1, %v455_v8  ;;  %v460_v11 = vsel %vm445_vm0, %v458_v9, 0.0 }
  0xa7   : > { %461 = vadd.xlane.f32.xlu1 %v460_v11 }
  0xa8   : > { %v459_v12 = vmul.f32 %v457_v10, %v457_v10 }
  0xaa   : > { %v463_v13 = vsel %vm449_vm1, %v459_v12, 0.0 }
  0xab   : > { %464 = vadd.xlane.f32.xlu1 %v463_v13 }
 0x134   : > { %v462_v20 = vpop.xlane.xlu1 %461 }
 0x135   : > { %v466_v21 = vmul.f32 0.03125, %v462_v20 }
 0x137   : > { %v468_v22 = vadd.f32 1e-05, %v466_v21 }
 0x138   : > { %v465_v23 = vpop.xlane.xlu1 %464 }
 0x139   : > { %2441 = vrsqrt.f32 %v468_v22  ;;  %v467_v24 = vmul.f32 0.03125, %v465_v23 }
 0x13b   : > { %v469_v25 = vadd.f32 1e-05, %v467_v24 }
 0x13d   : > { %2443 = vrsqrt.f32 %v469_v25 }
 0x143   : > { %v2442_v26 = vpop.eup %2441 }
 0x144   : > { %v472_v28 = vmul.f32 %v2442_v26, %v456_v6 }
 0x146   : > { %v480_v30 = vmul.f32 %v2058_v27, %v472_v28 }
 0x147   : > { %v2444_v31 = vpop.eup %2443 }
 0x148   : > { %v473_v32 = vmul.f32 %v2444_v31, %v457_v10  ;;  %v488_v33 = vadd.f32 %v2059_v29, %v480_v30 }
 0x14a   : > { %v481_v34 = vmul.f32 %v2058_v27, %v473_v32  ;;  %2186 = vmatprep.mubr.msk.f32.mxu1 %vm445_vm0, %v488_v33 }
 0x14c   : > { %v489_v35 = vadd.f32 %v2059_v29, %v481_v34 }
 0x14e   : > { %2187 = vmatmul.mubr.msk.f32.vlgmr.msra.gmra.mrb[0].mxu1 %vm445_vm0, %v489_v35 }
 0x221   : > { %v2188_v37 = vpop.f32.mrb[0].mxu1 }
 0x222   : > { %v2626_v38 = vadd.f32 %v2188_v37, %v2060_v36  ;;  %v578_v39 = vpop.f32.mrb[1].mxu1 }
 0x223   : > { %v2628_v40 = vadd.f32 %v2060_v36, %v578_v39 }
 0x225   : > { %2193 = vmatprep.mubr.msk.f32.mxu1 %vm593_vm2, %v2628_v40  ;;  %v2634_v41 = vpack.i.bf16 %v2626_v38, %v2628_v40 }
 0x227   : > { %2407 = vrot.lane.b32.xlu1 %v2634_v41, %s2493_s14  ;;  %2402 = vrot.lane.b32.xlu0 %v2634_v41, %s2494_s15 }
 0x22b   : > { %792 = vrot.lane.b32.xlu1 %v2628_v40, %s2495_s16  ;;  %2412 = vrot.lane.b32.xlu0 %v2634_v41, %s2496_s17 }
 0x22f   : > { %794 = vrot.lane.b32.xlu1 %v2626_v38, %s2495_s16  ;;  %1159 = vrot.lane.b32.xlu0 %v2626_v38, %s2497_s18  ;;  %s2504_s16 = smov 40  }
 0x233   : > { %1157 = vrot.lane.b32.xlu1 %v2628_v40, %s2497_s18 }
 0x299   : > { %v2408_v42 = vpop.permute.xlu1 %2407  ;;  %v2403_v43 = vpop.permute.xlu0 %2402 }
 0x29a   : > { %v2410_v44 = vunpack.i.h.bf16 %v2408_v42  ;;  %v2409_v45 = vunpack.i.l.bf16 %v2408_v42  ;;  %v2405_v46 = vunpack.i.h.bf16 %v2403_v43  ;;  %v2404_v47 = vunpack.i.l.bf16 %v2403_v43 }
 0x29c   : > { %v2303_v49 = vpack.c.bf16 %v2405_v46, %v2404_v47  ;;  %v2315_v50 = vpack.c.bf16 %v2410_v44, %v2409_v45  ;;  %v2099_v45 = vld [vmem:[%s2829_s6] ss:$0 sm:$0xff] }
 0x29d   : > { %v2413_v51 = vpop.permute.xlu0 %2412  ;;  %v793_v52 = vpop.permute.xlu1 %792 }
 0x29e   : > { %2305 = vmatprep.subr.msk.bf16.mxu1 %vm2645_vm3, %v2303_v49  ;;  %v2415_v53 = vunpack.i.h.bf16 %v2413_v51  ;;  %v2414_v54 = vunpack.i.l.bf16 %v2413_v51 }
 0x29f   : > { %2308 = vmatpush3.bf16.xpose.msk.msra.mxu1 %vm2645_vm3, %v2303_v49 }
 0x2a0   : > { %2317 = vmatprep.subr.msk.bf16.mxu1 %vm2645_vm3, %v2315_v50  ;;  %v2327_v55 = vpack.c.bf16 %v2415_v53, %v2414_v54 }
 0x2a1   : > { %v795_v56 = vpop.permute.xlu1 %794  ;;  %v1160_v58 = vpop.permute.xlu0 %1159 }
 0x2a5   : > { %v1158_v57 = vpop.permute.xlu1 %1157 }
 0x2a6   : > { %2194 = vmatmul.mubr.msk.f32.vlgmr.msra.gmra.mrb[2].mxu1 %vm593_vm2, %v2626_v38 }
 0x2a7   : > { %2320 = vmatpush3.bf16.xpose.msk.msra.mxu1 %vm2645_vm3, %v2315_v50  ;;  %2207 = vmatprep.mubr.msk.f32.mxu1 %vm593_vm2, %v793_v52 }
 0x2a8   : > { %2329 = vmatprep.subr.msk.bf16.mxu1 %vm2645_vm3, %v2327_v55 }
 0x2ae   : > { %2208 = vmatmul.mubr.msk.f32.vlgmr.msra.gmra.mrb[4].mxu1 %vm593_vm2, %v795_v56 }
 0x2af   : > { %2332 = vmatpush3.bf16.xpose.msk.msra.mxu1 %vm2645_vm3, %v2327_v55  ;;  %2231 = vmatprep.mubr.msk.f32.mxu1 %vm593_vm2, %v1158_v57 }
 0x2b6   : > { %2232 = vmatmul.mubr.msk.f32.vlgmr.msra.gmra.mrb[6].mxu1 %vm593_vm2, %v1160_v58 }
 0x379   : > { %v2195_v59 = vpop.f32.mrb[2].mxu1 }
 0x37a   : > { %v678_v60 = vmul.f32 0.35355338, %v2195_v59  ;;  %v668_v61 = vpop.f32.mrb[3].mxu1 }
 0x37b   : > { %v677_v62 = vmul.f32 0.35355338, %v668_v61 }
 0x37c   : > { %v684_v63 = vsel %vm683_vm4, %v678_v60, -inf }
 0x37d   : > { %685 = vmax.xlane.f32.xlu0 %v684_v63  ;;  %v680_v2 = vsel %vm679_vm5, %v677_v62, -inf }
 0x37e   : > { %681 = vmax.xlane.f32.xlu1 %v680_v2 }
 0x381   : > { %v2209_v3 = vpop.f32.mrb[4].mxu1 }
 0x382   : > { %v874_v4 = vpop.f32.mrb[5].mxu1  ;;  %v884_v6 = vmul.f32 0.35355338, %v2209_v3 }
 0x383   : > { %v883_v5 = vmul.f32 0.35355338, %v874_v4 }
 0x384   : > { %v888_v9 = vsel %vm683_vm4, %v884_v6, -inf }
 0x385   : > { %v885_v7 = vsel %vm679_vm5, %v883_v5, -inf }
 0x386   : > { %886 = vmax.xlane.f32.xlu0 %v885_v7 }
 0x389   : > { %v2233_v8 = vpop.f32.mrb[6].mxu1 }
 0x38a   : > { %v1239_v10 = vpop.f32.mrb[7].mxu1  ;;  %889 = vmax.xlane.f32.xlu0 %v888_v9  ;;  %v1249_v33 = vmul.f32 0.35355338, %v2233_v8 }
 0x38b   : > { %v1248_v31 = vmul.f32 0.35355338, %v1239_v10 }
 0x38c   : > { %v1253_v34 = vsel %vm683_vm4, %v1249_v33, -inf }
 0x38d   : > { %v1250_v32 = vsel %vm679_vm5, %v1248_v31, -inf }
 0x40a   : > { %v686_v11 = vpop.xlane.xlu0 %685 }
 0x40b   : > { %v688_v12 = vsub.f32 %v678_v60, %v686_v11  ;;  %v682_v13 = vpop.xlane.xlu1 %681  ;;  %v496_v11 = vld [vmem:[%s2828_s5 + $0x8] sm:$0xff] }
 0x40c   : > { %v687_v14 = vsub.f32 %v677_v62, %v682_v13 }
 0x40d   : > { %v691_v15 = vmul.f32 1.442695, %v688_v12  ;;  %v495_v12 = vld [vmem:[%s2828_s5] sm:$0xff] }
 0x40e   : > { %v689_v16 = vmul.f32 1.442695, %v687_v14 }
 0x40f   : > { %2445 = vpow2.f32 %v691_v15 }
 0x410   : > { %2447 = vpow2.f32 %v689_v16 }
 0x413   : > { %v887_v17 = vpop.xlane.xlu0 %886 }
 0x414   : > { %v891_v18 = vsub.f32 %v883_v5, %v887_v17 }
 0x416   : > { %v893_v19 = vmul.f32 1.442695, %v891_v18 }
 0x417   : > { %v890_v20 = vpop.xlane.xlu0 %889 }
 0x418   : > { %2449 = vpow2.f32 %v893_v19  ;;  %v892_v21 = vsub.f32 %v884_v6, %v890_v20 }
 0x419   : > { %v2446_v22 = vpop.eup %2445 }
 0x41a   : > { %v2448_v23 = vpop.eup %2447  ;;  %v895_v24 = vmul.f32 1.442695, %v892_v21  ;;  %v696_v25 = vsel %vm683_vm4, %v2446_v22, 0.0 }
 0x41b   : > { %697 = vadd.xlane.f32.xlu0 %v696_v25  ;;  %v693_v26 = vsel %vm679_vm5, %v2448_v23, 0.0 }
 0x41c   : > { %2451 = vpow2.f32 %v895_v24  ;;  %694 = vadd.xlane.f32.xlu1 %v693_v26 }
 0x422   : > { %v2450_v27 = vpop.eup %2449 }
 0x423   : > { %v897_v28 = vsel %vm679_vm5, %v2450_v27, 0.0 }
 0x424   : > { %898 = vadd.xlane.f32.xlu1 %v897_v28 }
 0x426   : > { %v2452_v29 = vpop.eup %2451 }
 0x427   : > { %v900_v30 = vsel %vm683_vm4, %v2452_v29, 0.0 }
 0x428   : > { %901 = vadd.xlane.f32.xlu0 %v900_v30 }
 0x435   : > { %2417 = vrot.lane.b32.xlu1 %v2634_v41, %s2498_s19 }
 0x439   : > { %2427 = vrot.lane.b32.xlu1 %v2634_v41, %s2499_s20 }
 0x43d   : > { %1443 = vrot.lane.b32.xlu1 %v2628_v40, %s2500_s21 }
 0x43e   : > { %2422 = vrot.lane.b32.xlu0 %v2634_v41, %s2501_s22 }
 0x441   : > { %1445 = vrot.lane.b32.xlu1 %v2626_v38, %s2500_s21 }
 0x45d   : > { %1251 = vmax.xlane.f32.xlu0 %v1250_v32 }
 0x465   : > { %1254 = vmax.xlane.f32.xlu1 %v1253_v34 }
 0x4a8   : > { %v698_v36 = vpop.xlane.xlu0 %697 }
 0x4a9   : > { %v695_v35 = vpop.xlane.xlu1 %694 }
 0x4aa   : > { %2453 = vrcp.f32 %v695_v35 }
 0x4ab   : > { %2455 = vrcp.f32 %v698_v36 }
 0x4b1   : > { %v899_v37 = vpop.xlane.xlu1 %898 }
 0x4b2   : > { %2457 = vrcp.f32 %v899_v37 }
 0x4b4   : > { %v2454_v39 = vpop.eup %2453 }
 0x4b5   : > { %v902_v40 = vpop.xlane.xlu0 %901  ;;  %v2418_v42 = vpop.permute.xlu1 %2417  ;;  %v701_v43 = vmul.f32 %v2454_v39, %v2448_v23 }
 0x4b6   : > { %2459 = vrcp.f32 %v902_v40  ;;  %v2420_v38 = vunpack.i.h.bf16 %v2418_v42  ;;  %v2419_v44 = vunpack.i.l.bf16 %v2418_v42  ;;  %v2456_v47 = vpop.eup %2455 }
 0x4b7   : > { %2200 = vmatprep.mubr.msk.f32.mxu0 %vm679_vm5, %v701_v43  ;;  %v702_v58 = vmul.f32 %v2456_v47, %v2446_v22 }
 0x4b8   : > { %v2309_v46 = vpack.c.bf16 %v2420_v38, %v2419_v44 }
 0x4b9   : > { %v2423_v49 = vpop.permute.xlu0 %2422  ;;  %v2428_v50 = vpop.permute.xlu1 %2427 }
 0x4ba   : > { %v2425_v51 = vunpack.i.h.bf16 %v2423_v49  ;;  %v2424_v52 = vunpack.i.l.bf16 %v2423_v49  ;;  %v2430_v53 = vunpack.i.h.bf16 %v2428_v50  ;;  %v2429_v54 = vunpack.i.l.bf16 %v2428_v50  ;;  %2311 = vmatprep.subr.msk.bf16.mxu0 %vm2683_vm8, %v2309_v46 }
 0x4bb   : > { %2314 = vmatpush3.bf16.msk.msra.mxu0 %vm2683_vm8, %v2309_v46 }
 0x4bc   : > { %v2458_v55 = vpop.eup %2457  ;;  %v2321_v56 = vpack.c.bf16 %v2425_v51, %v2424_v52  ;;  %v2339_v57 = vpack.c.bf16 %v2430_v53, %v2429_v54 }
 0x4bd   : > { %v1444_v59 = vpop.permute.xlu1 %1443  ;;  %v905_v60 = vmul.f32 %v2458_v55, %v2450_v27  ;;  %v498_v55 = vld [vmem:[%s2828_s5 + $0x18] sm:$0xff] }
 0x4be   : > { %2201 = vmatmul.mubr.msk.f32.vlgmr.msra.gmra.mrb[0].mxu0 %vm679_vm5, %v702_v58  ;;  %2323 = vmatprep.subr.msk.bf16.mxu0 %vm2683_vm8, %v2321_v56 }
 0x4bf   : > { %2341 = vmatprep.subr.msk.bf16.mxu1 %vm2645_vm3, %v2339_v57  ;;  %2250 = vmatprep.mubr.msk.f32.mxu1 %vm593_vm2, %v1444_v59 }
 0x4c0   : > { %v2460_v61 = vpop.eup %2459  ;;  %2326 = vmatpush3.bf16.msk.msra.mxu0 %vm2683_vm8, %v2321_v56  ;;  %2214 = vmatprep.mubr.msk.f32.mxu0 %vm679_vm5, %v905_v60 }
 0x4c1   : > { %v906_v62 = vmul.f32 %v2460_v61, %v2452_v29  ;;  %2344 = vmatpush3.bf16.xpose.msk.msra.mxu1 %vm2645_vm3, %v2339_v57  ;;  %v1446_v63 = vpop.permute.xlu1 %1445  ;;  %2217 = vmatprep.subr.mxu0 %v496_v11 }
 0x4c3   : > { %2215 = vmatmul.mubr.msk.f32.vlgmr.msra.gmra.mrb[2].mxu0 %vm679_vm5, %v906_v62 }
 0x4c4   : > { %2218 = vmatpush3.msra.mxu0 %v496_v11 }
 0x4c5   : > { %2222 = vmatprep.subr.mxu0 %v495_v12 }
 0x4c8   : > { %2251 = vmatmul.mubr.msk.f32.vlgmr.msra.gmra.mrb[8].mxu1 %vm593_vm2, %v1446_v63 }
 0x4ea   : > { %v1252_v2 = vpop.xlane.xlu0 %1251 }
 0x4eb   : > { %v1256_v3 = vsub.f32 %v1248_v31, %v1252_v2 }
 0x4ed   : > { %v1258_v6 = vmul.f32 1.442695, %v1256_v3 }
 0x4f2   : > { %v1255_v4 = vpop.xlane.xlu1 %1254 }
 0x4f3   : > { %v1257_v5 = vsub.f32 %v1249_v33, %v1255_v4  ;;  %v497_v33 = vld [vmem:[%s2828_s5 + $0x10] sm:$0xff] }
 0x4f5   : > { %v1260_v7 = vmul.f32 1.442695, %v1257_v5 }
 0x4f7   : > { %2461 = vpow2.f32 %v1260_v7 }
 0x4f8   : > { %2463 = vpow2.f32 %v1258_v6 }
 0x501   : > { %v2462_v8 = vpop.eup %2461 }
 0x502   : > { %v1265_v9 = vsel %vm683_vm4, %v2462_v8, 0.0  ;;  %v2464_v10 = vpop.eup %2463 }
 0x503   : > { %1266 = vadd.xlane.f32.xlu0 %v1265_v9  ;;  %v1262_v48 = vsel %vm679_vm5, %v2464_v10, 0.0 }
 0x507   : > { %1263 = vadd.xlane.f32.xlu0 %v1262_v48 }
 0x51d   : > { %2432 = vrot.lane.b32.xlu0 %v2634_v41, %s2503_s30  ;;  %s440_s30 = scalar_lea.vmem %s2836_s13, %s2110_s27 }
 0x590   : > { %v1267_v13 = vpop.xlane.xlu0 %1266 }
 0x591   : > { %v2202_v14 = vpop.f32.mrb[0].mxu0 }
 0x592   : > { %v783_v15 = vpop.f32.mrb[1].mxu0 }
 0x594   : > { %v1264_v16 = vpop.xlane.xlu0 %1263 }
 0x595   : > { %2465 = vrcp.f32 %v1264_v16 }
 0x596   : > { %2467 = vrcp.f32 %v1267_v13  ;;  %v2216_v17 = vpop.f32.mrb[2].mxu0 }
 0x597   : > { %v986_v18 = vpop.f32.mrb[3].mxu0 }
 0x598   : > { %v2433_v19 = vpop.permute.xlu0 %2432  ;;  %2219 = vmatprep.mubr.msk.f32.mxu0 %vm593_vm2, %v986_v18  ;;  %v1786_v18 = vld [vmem:[%s2832_s9 + $0x18] sm:$0xff] }
 0x599   : > { %v2435_v20 = vunpack.i.h.bf16 %v2433_v19  ;;  %v2434_v21 = vunpack.i.l.bf16 %v2433_v19  ;;  %2220 = vmatmul.mubr.msk.f32.vlgmr.msra.gmra.mrb[4].mxu0 %vm593_vm2, %v2216_v17  ;;  %v1785_v17 = vld [vmem:[%s2832_s9 + $0x10] sm:$0xff] }
 0x59a   : > { %2224 = vmatprep.mubr.msk.f32.mxu0 %vm593_vm2, %v783_v15  ;;  %2223 = vmatpush3.msra.mxu0 %v495_v12  ;;  %v1784_v15 = vld [vmem:[%s2832_s9 + $0x8] sm:$0xff]  ;;  %v2355_v19 = vpack.c.bf16 %v1786_v18, %v1785_v17 }
 0x59b   : > { %v2333_v22 = vpack.c.bf16 %v2435_v20, %v2434_v21  ;;  %v2252_v23 = vpop.f32.mrb[8].mxu1 }
 0x59c   : > { %v1525_v24 = vpop.f32.mrb[9].mxu1  ;;  %v1535_v27 = vmul.f32 0.35355338, %v2252_v23 }
 0x59d   : > { %v1534_v25 = vmul.f32 0.35355338, %v1525_v24  ;;  %2335 = vmatprep.subr.msk.bf16.mxu0 %vm2683_vm8, %v2333_v22 }
 0x59e   : > { %v1539_v32 = vsel %vm683_vm4, %v1535_v27, -inf }
 0x59f   : > { %v2466_v26 = vpop.eup %2465  ;;  %v1536_v28 = vsel %vm679_vm5, %v1534_v25, -inf }
 0x5a0   : > { %v2468_v29 = vpop.eup %2467  ;;  %1537 = vmax.xlane.f32.xlu1 %v1536_v28  ;;  %v1270_v30 = vmul.f32 %v2466_v26, %v2464_v10 }
 0x5a1   : > { %2225 = vmatmul.mubr.msk.f32.vlgmr.msra.gmra.mrb[4].mxu0 %vm593_vm2, %v2202_v14  ;;  %v1271_v31 = vmul.f32 %v2468_v29, %v2462_v8  ;;  %v1783_v14 = vld [vmem:[%s2832_s9] sm:$0xff] }
 0x5a2   : > { %2338 = vmatpush3.bf16.msk.msra.mxu0 %vm2683_vm8, %v2333_v22  ;;  %2238 = vmatprep.mubr.msk.f32.mxu0 %vm679_vm5, %v1270_v30  ;;  %v2351_v16 = vpack.c.bf16 %v1784_v15, %v1783_v14  ;;  %v2101_v29 = vld [vmem:[%s2831_s8] ss:$0 sm:$0xff] }
 0x5a3   : > { %2241 = vmatprep.subr.mxu0 %v497_v33 }
 0x5a4   : > { %1540 = vmax.xlane.f32.xlu1 %v1539_v32  ;;  %2352 = vmatprep.subr.bf16.mxu1 %v2351_v16 }
 0x5a5   : > { %2239 = vmatmul.mubr.msk.f32.vlgmr.msra.gmra.mrb[6].mxu0 %vm679_vm5, %v1271_v31  ;;  %2354 = vmatpush3.bf16.msra.mxu1 %v2351_v16 }
 0x5a6   : > { %2242 = vmatpush3.msra.mxu0 %v497_v33  ;;  %2356 = vmatprep.subr.bf16.mxu1 %v2355_v19 }
 0x5a9   : > { %2358 = vmatpush3.bf16.msra.mxu1 %v2355_v19 }
 0x62d   : > { %v1538_v34 = vpop.xlane.xlu1 %1537 }
 0x62e   : > { %v1542_v35 = vsub.f32 %v1534_v25, %v1538_v34 }
 0x630   : > { %v1544_v39 = vmul.f32 1.442695, %v1542_v35 }
 0x631   : > { %v1541_v36 = vpop.xlane.xlu1 %1540 }
 0x632   : > { %v1543_v37 = vsub.f32 %v1535_v27, %v1541_v36  ;;  %v2100_v27 = vld [vmem:[%s2830_s7] ss:$0 sm:$0xff] }
 0x633   : > { %v1788_v36 = vld [vmem:[%s2834_s11] sm:$0xff] }
 0x634   : > { %v1546_v40 = vmul.f32 1.442695, %v1543_v37  ;;  %v1789_v37 = vld [vmem:[%s2834_s11 + $0x8] sm:$0xff] }
 0x636   : > { %2469 = vpow2.f32 %v1546_v40  ;;  %v1790_v40 = vld [vmem:[%s2834_s11 + $0x10] sm:$0xff] }
 0x637   : > { %2471 = vpow2.f32 %v1544_v39  ;;  %v2359_v39 = vpack.c.bf16 %v1789_v37, %v1788_v36 }
 0x640   : > { %v2470_v42 = vpop.eup %2469 }
 0x641   : > { %v1551_v43 = vsel %vm683_vm4, %v2470_v42, 0.0  ;;  %v2472_v38 = vpop.eup %2471 }
 0x642   : > { %1552 = vadd.xlane.f32.xlu1 %v1551_v43  ;;  %v1548_v44 = vsel %vm679_vm5, %v2472_v38, 0.0  ;;  %v1792_v43 = vld [vmem:[%s2834_s11 + $0x20] sm:$0xff] }
 0x646   : > { %1549 = vadd.xlane.f32.xlu1 %v1548_v44  ;;  %v1793_v44 = vld [vmem:[%s2834_s11 + $0x28] sm:$0xff] }
 0x657   : > { %2437 = vrot.lane.b32.xlu1 %v2634_v41, %s2504_s16 }
 0x678   : > { %v2240_v46 = vpop.f32.mrb[6].mxu0 }
 0x679   : > { %v1351_v47 = vpop.f32.mrb[7].mxu0 }
 0x67a   : > { %2243 = vmatprep.mubr.msk.f32.mxu0 %vm593_vm2, %v1351_v47  ;;  %v1794_v47 = vld [vmem:[%s2834_s11 + $0x30] sm:$0xff] }
 0x67b   : > { %2244 = vmatmul.mubr.msk.f32.vlgmr.msra.gmra.mrb[4].mxu0 %vm593_vm2, %v2240_v46  ;;  %v2367_v46 = vpack.c.bf16 %v1793_v44, %v1792_v43 }
 0x6cf   : > { %v1553_v49 = vpop.xlane.xlu1 %1552 }
 0x6d0   : > { %2473 = vrcp.f32 %v1553_v49  ;;  %v1795_v49 = vld [vmem:[%s2834_s11 + $0x38] sm:$0xff] }
 0x6d3   : > { %v1550_v50 = vpop.xlane.xlu1 %1549 }
 0x6d4   : > { %2475 = vrcp.f32 %v1550_v50  ;;  %v2371_v50 = vpack.c.bf16 %v1795_v49, %v1794_v47 }
 0x6d7   : > { %v2438_v51 = vpop.permute.xlu1 %2437 }
 0x6d8   : > { %v2440_v52 = vunpack.i.h.bf16 %v2438_v51  ;;  %v2439_v53 = vunpack.i.l.bf16 %v2438_v51  ;;  %v2102_v51 = vld [vmem:[%s2833_s10] ss:$0 sm:$0xff] }
 0x6da   : > { %v2345_v54 = vpack.c.bf16 %v2440_v52, %v2439_v53  ;;  %v2474_v41 = vpop.eup %2473 }
 0x6db   : > { %v1557_v58 = vmul.f32 %v2474_v41, %v2470_v42  ;;  %v1791_v42 = vld [vmem:[%s2834_s11 + $0x18] sm:$0xff] }
 0x6dc   : > { %2347 = vmatprep.subr.msk.bf16.mxu0 %vm2683_vm8, %v2345_v54 }
 0x6dd   : > { %2350 = vmatpush3.bf16.msk.msra.mxu0 %vm2683_vm8, %v2345_v54 }
 0x6de   : > { %v2476_v56 = vpop.eup %2475  ;;  %2260 = vmatprep.subr.mxu0 %v498_v55 }
 0x6df   : > { %v1556_v57 = vmul.f32 %v2476_v56, %v2472_v38  ;;  %v2363_v38 = vpack.c.bf16 %v1791_v42, %v1790_v40 }
 0x6e1   : > { %2257 = vmatprep.mubr.msk.f32.mxu0 %vm679_vm5, %v1556_v57 }
 0x6e2   : > { %2258 = vmatmul.mubr.msk.f32.vlgmr.msra.gmra.mrb[8].mxu0 %vm679_vm5, %v1557_v58 }
 0x6e3   : > { %2261 = vmatpush3.msra.mxu0 %v498_v55 }
 0x6e4   : > { %2360 = vmatprep.subr.bf16.mxu0 %v2359_v39 }
 0x7b5   : > { %v2259_v59 = vpop.f32.mrb[8].mxu0 }
 0x7b6   : > { %v1637_v60 = vpop.f32.mrb[9].mxu0 }
 0x7b7   : > { %2262 = vmatprep.mubr.msk.f32.mxu0 %vm593_vm2, %v1637_v60 }
 0x7b8   : > { %2263 = vmatmul.mubr.msk.f32.vlgmr.msra.gmra.mrb[4].mxu0 %vm593_vm2, %v2259_v59 }
 0x7b9   : > { %2362 = vmatpush3.bf16.msra.mxu0 %v2359_v39 }
 0x7ba   : > { %2364 = vmatprep.subr.bf16.mxu0 %v2363_v38 }
 0x7bd   : > { %2366 = vmatpush3.bf16.msra.mxu0 %v2363_v38 }
 0x7be   : > { %2368 = vmatprep.subr.bf16.mxu0 %v2367_v46 }
 0x7c1   : > { %2370 = vmatpush3.bf16.msra.mxu0 %v2367_v46 }
 0x7c2   : > { %2372 = vmatprep.subr.bf16.mxu0 %v2371_v50 }
 0x7c5   : > { %2374 = vmatpush3.bf16.msra.mxu0 %v2371_v50 }
 0x88b   : > { %v2264_v61 = vpop.f32.mrb[4].mxu0 }
 0x88c   : > { %v1736_v62 = vadd.f32 %v2264_v61, %v2099_v45  ;;  %v1718_v63 = vpop.f32.mrb[5].mxu0 }
 0x88d   : > { %v1735_v2 = vadd.f32 %v2099_v45, %v1718_v63 }
 0x88e   : > { %v2748_v3 = vadd.f32 %v1736_v62, %v2593_v1 }
 0x88f   : > { %v2751_v4 = vadd.f32 %v1735_v2, %v2591_v0 }
 0x890   : > { %v1744_v5 = vsel %vm449_vm1, %v2748_v3, 0.0 }
 0x891   : > { %1745 = vadd.xlane.f32.xlu1 %v1744_v5  ;;  %v1741_v6 = vsel %vm445_vm0, %v2751_v4, 0.0 }
 0x892   : > { %1742 = vadd.xlane.f32.xlu0 %v1741_v6 }
 0x91e   : > { %v1746_v7 = vpop.xlane.xlu1 %1745 }
 0x91f   : > { %v1748_v8 = vmul.f32 0.03125, %v1746_v7  ;;  %v1743_v9 = vpop.xlane.xlu0 %1742 }
 0x920   : > { %v1747_v10 = vmul.f32 0.03125, %v1743_v9 }
 0x921   : > { %v1750_v48 = vsub.f32 %v2748_v3, %v1748_v8 }
 0x922   : > { %v1749_v1 = vsub.f32 %v2751_v4, %v1747_v10 }
 0x923   : > { %v1752_v12 = vmul.f32 %v1750_v48, %v1750_v48 }
 0x924   : > { %v1751_v11 = vmul.f32 %v1749_v1, %v1749_v1 }
 0x925   : > { %v1756_v13 = vsel %vm449_vm1, %v1752_v12, 0.0 }
 0x926   : > { %v1753_v0 = vsel %vm445_vm0, %v1751_v11, 0.0 }
 0x927   : > { %1754 = vadd.xlane.f32.xlu0 %v1753_v0 }
 0x92b   : > { %1757 = vadd.xlane.f32.xlu0 %v1756_v13 }
 0x9b4   : > { %v1755_v20 = vpop.xlane.xlu0 %1754 }
 0x9b5   : > { %v1759_v21 = vmul.f32 0.03125, %v1755_v20 }
 0x9b7   : > { %v1761_v22 = vadd.f32 1e-05, %v1759_v21 }
 0x9b8   : > { %v1758_v23 = vpop.xlane.xlu0 %1757 }
 0x9b9   : > { %2477 = vrsqrt.f32 %v1761_v22  ;;  %v1760_v24 = vmul.f32 0.03125, %v1758_v23 }
 0x9bb   : > { %v1762_v25 = vadd.f32 1e-05, %v1760_v24 }
 0x9bd   : > { %2479 = vrsqrt.f32 %v1762_v25 }
 0x9c3   : > { %v2478_v26 = vpop.eup %2477 }
 0x9c4   : > { %v1765_v28 = vmul.f32 %v2478_v26, %v1749_v1  ;;  %v2105_v1 = vld [vmem:[%s2835_s12] ss:$0 sm:$0xff] }
 0x9c6   : > { %v1773_v30 = vmul.f32 %v2100_v27, %v1765_v28 }
 0x9c7   : > { %v2480_v31 = vpop.eup %2479 }
 0x9c8   : > { %v1766_v32 = vmul.f32 %v2480_v31, %v1750_v48  ;;  %v1781_v33 = vadd.f32 %v2101_v29, %v1773_v30 }
 0x9ca   : > { %v1774_v34 = vmul.f32 %v2100_v27, %v1766_v32  ;;  %2273 = vmatprep.mubr.msk.f32.mxu1 %vm445_vm0, %v1781_v33 }
 0x9cc   : > { %v1782_v35 = vadd.f32 %v2101_v29, %v1774_v34 }
 0x9ce   : > { %2274 = vmatmul.mubr.msk.f32.vlgmr.msra.gmra.mrb[10].mxu1 %vm445_vm0, %v1782_v35 }
 0xaa1   : > { %v2275_v52 = vpop.f32.mrb[10].mxu1 }
 0xaa2   : > { %v1881_v53 = vadd.f32 %v2275_v52, %v2102_v51  ;;  %v1875_v54 = vpop.f32.mrb[11].mxu1 }
 0xaa3   : > { %v1876_v55 = vadd.f32 %v2102_v51, %v1875_v54 }
 0xaa4   : > { %v1887_v41 = vmul.f32 0.044715, %v1881_v53  ;;  %v1885_v9 = vmul.f32 0.5, %v1881_v53 }
 0xaa5   : > { %v1886_v56 = vmul.f32 0.044715, %v1876_v55  ;;  %v1884_v7 = vmul.f32 0.5, %v1876_v55 }
 0xaa6   : > { %v1889_v57 = vmul.f32 %v1887_v41, %v1881_v53 }
 0xaa7   : > { %v1888_v58 = vmul.f32 %v1886_v56, %v1876_v55 }
 0xaa8   : > { %v1891_v59 = vmul.f32 %v1889_v57, %v1881_v53 }
 0xaa9   : > { %v1890_v60 = vmul.f32 %v1888_v58, %v1876_v55 }
 0xaaa   : > { %v1893_v45 = vadd.f32 %v1891_v59, %v1881_v53 }
 0xaab   : > { %v1892_v61 = vadd.f32 %v1890_v60, %v1876_v55 }
 0xaac   : > { %v1895_v62 = vmul.f32 0.7978846, %v1893_v45 }
 0xaad   : > { %v1894_v63 = vmul.f32 0.7978846, %v1892_v61 }
 0xaae   : > { %2481 = vtanh.f32 %v1895_v62 }
 0xaaf   : > { %2483 = vtanh.f32 %v1894_v63 }
 0xab8   : > { %v2482_v2 = vpop.eup %2481 }
 0xab9   : > { %v2484_v5 = vpop.eup %2483  ;;  %v1899_v6 = vadd.f32 1.0, %v2482_v2 }
 0xaba   : > { %v1898_v8 = vadd.f32 1.0, %v2484_v5 }
 0xabb   : > { %v1901_v48 = vmul.f32 %v1899_v6, %v1885_v9 }
 0xabc   : > { %v1900_v10 = vmul.f32 %v1898_v8, %v1884_v7 }
 0xabe   : > { %2292 = vmatprep.mubr.msk.f32.mxu0 %vm1908_vm9, %v1900_v10 }
 0xabf   : > { %2293 = vmatmul.mubr.msk.f32.vlgmr.msra.gmra.mrb[10].mxu0 %vm1908_vm9, %v1901_v48 }
 0xb92   : > { %v2294_v11 = vpop.f32.mrb[10].mxu0 }
 0xb93   : > { %v1987_v0 = vadd.f32 %v2294_v11, %v2105_v1  ;;  %v1981_v12 = vpop.f32.mrb[11].mxu0 }
 0xb94   : > { %v1982_v13 = vadd.f32 %v2105_v1, %v1981_v12 }
 0xb95   : > { %v1991_v14 = vadd.f32 %v1987_v0, %v2748_v3 }
 0xb96   : > { %v1990_v15 = vadd.f32 %v1982_v13, %v2751_v4 }
 0xb97   : > { %1993 = vst.msk [vmem:[%s440_s30 + $0x8] sm:$0x1] %vm449_vm1, %v1991_v14 }
 0xb98   : > { %1992 = vst.msk [vmem:[%s440_s30] sm:$0xff] %vm445_vm0, %v1990_v15 }
 0xb99 PF: > { %s23_s25 = sadd.s32 1, %s2491_s25  }
 0xb9a   : > { %p20_p4 = scmp.ge.s32.totalorder %s23_s25, 4  }
 0xb9c   :  { %22 = sbr.rel (!%p20_p4) target bundleno = 1 (0x1), region = 102 }

// kernel: transformer_pose_estimation_forward.4
= control target key start
LH: loop header
LB: loop body
LE: loop exit
PB: predicated region body
PF: predicated region fallthrough
CT: control target
= control target key end

     0   :  { %s4512_s6 = smov 1   ;;  %s4513_s10 = smov 2   ;;  %s5069_s0 = inlined_call_operand.smem [shape: u32[32], index: -1, kind: input, shape index: {}] }
   0x1   :  { %s4561_s5 = sld [smem:[%s5069_s0]]   ;;  %s4514_s14 = smov 3  }
   0x2   :  { %s4566_s9 = sld [smem:[%s5069_s0 + %s4512_s6]]   ;;  %s4515_s18 = smov 4  }
   0x3   :  { %s4571_s13 = sld [smem:[%s5069_s0 + %s4513_s10]]   ;;  %s4516_s22 = smov 5  }
   0x4   :  { %s4576_s17 = sld [smem:[%s5069_s0 + %s4514_s14]]   ;;  %s4517_s26 = smov 6  }
   0x5   :  { %s4581_s21 = sld [smem:[%s5069_s0 + %s4515_s18]]   ;;  %s4518_s30 = smov 7  }
   0x6   :  { %s4586_s25 = sld [smem:[%s5069_s0 + %s4516_s22]]   ;;  %s4519_s4 = smov 8  }
   0x7   :  { %s4591_s29 = sld [smem:[%s5069_s0 + %s4517_s26]]   ;;  %s4520_s10 = smov 9  }
   0x8   :  { %s4596_s3 = sld [smem:[%s5069_s0 + %s4518_s30]]   ;;  %s4521_s15 = smov 10  }
   0x9   :  { %s4601_s8 = sld [smem:[%s5069_s0 + %s4519_s4]]   ;;  %s4522_s20 = smov 11  }
   0xa   :  { %s4606_s14 = sld [smem:[%s5069_s0 + %s4520_s10]]   ;;  %s4523_s26 = smov 12  }
   0xb   :  { %s4611_s19 = sld [smem:[%s5069_s0 + %s4521_s15]]   ;;  %s4524_s1 = smov 13  }
   0xc   :  { %s4616_s24 = sld [smem:[%s5069_s0 + %s4522_s20]]   ;;  %s4525_s7 = smov 14  }
   0xd   :  { %s4621_s30 = sld [smem:[%s5069_s0 + %s4523_s26]]   ;;  %s4526_s15 = smov 15  }
   0xe   :  { %s4626_s6 = sld [smem:[%s5069_s0 + %s4524_s1]]   ;;  %s4527_s22 = smov 16  }
   0xf   :  { %s4631_s12 = sld [smem:[%s5069_s0 + %s4525_s7]]   ;;  %s4528_s28 = smov 17  }
  0x10   :  { %s4636_s20 = sld [smem:[%s5069_s0 + %s4526_s15]]   ;;  %s4529_s7 = smov 18  }
  0x11   :  { %s4641_s27 = sld [smem:[%s5069_s0 + %s4527_s22]]   ;;  %s4530_s15 = smov 19  }
  0x12   :  { %s4646_s4 = sld [smem:[%s5069_s0 + %s4528_s28]]   ;;  %s4531_s22 = smov 20  }
  0x13   :  { %5074 = sst [smem:[#allocation2_spill]] %s4621_s30  ;;  %s4532_s28 = smov 21  }
  0x14   :  { %5075 = sst [smem:[#allocation3_spill]] %s4626_s6 }
  0x15   :  { %s4651_s6 = sld [smem:[%s5069_s0 + %s4529_s7]]   ;;  %s4533_s7 = smov 22  }
  0x16   :  { %s4656_s30 = sld [smem:[%s5069_s0 + %s4530_s15]]   ;;  %s4534_s15 = smov 23  }
  0x17   :  { %5076 = sst [smem:[#allocation4_spill]] %s4641_s27 }
  0x18   :  { %5077 = sst [smem:[#allocation5_spill]] %s4646_s4 }
  0x19   :  { %s4661_s27 = sld [smem:[%s5069_s0 + %s4531_s22]]   ;;  %s4535_s22 = smov 24  }
  0x1a   :  { %s4666_s4 = sld [smem:[%s5069_s0 + %s4532_s28]]   ;;  %s4536_s28 = smov 25  }
  0x1b   :  { %5078 = sst [smem:[#allocation6_spill]] %s4651_s6 }
  0x1c   :  { %5079 = sst [smem:[#allocation7_spill]] %s4656_s30 }
  0x1d   :  { %s4671_s6 = sld [smem:[%s5069_s0 + %s4533_s7]]   ;;  %s4537_s7 = smov 26  }
  0x1e   :  { %s4676_s30 = sld [smem:[%s5069_s0 + %s4534_s15]]   ;;  %s4538_s15 = smov 27  }
  0x1f   :  { %5080 = sst [smem:[#allocation8_spill]] %s4661_s27 }
  0x20   :  { %5081 = sst [smem:[#allocation9_spill]] %s4666_s4 }
  0x21   :  { %s4681_s27 = sld [smem:[%s5069_s0 + %s4535_s22]]   ;;  %s4539_s22 = smov 28  }
  0x22   :  { %s4686_s4 = sld [smem:[%s5069_s0 + %s4536_s28]]   ;;  %s4540_s28 = smov 29  }
  0x23   :  { %5082 = sst [smem:[#allocation10_spill]] %s4671_s6 }
  0x24   :  { %5083 = sst [smem:[#allocation11_spill]] %s4676_s30 }
  0x25   :  { %s4691_s6 = sld [smem:[%s5069_s0 + %s4537_s7]]   ;;  %s4541_s7 = smov 30  }
  0x26   :  { %s4696_s30 = sld [smem:[%s5069_s0 + %s4538_s15]]   ;;  %s4542_s15 = smov 31  }
  0x27   :  { %5084 = sst [smem:[#allocation12_spill]] %s4681_s27 }
  0x28   :  { %5085 = sst [smem:[#allocation13_spill]] %s4686_s4 }
  0x29   :  { %s4701_s27 = sld [smem:[%s5069_s0 + %s4539_s22]]   ;;  %s4718_s22 = smov 0  }
  0x2a   :  { %s4706_s4 = sld [smem:[%s5069_s0 + %s4540_s28]]  }
  0x2b   :  { %5086 = sst [smem:[#allocation14_spill]] %s4691_s6 }
  0x2c   :  { %5087 = sst [smem:[#allocation15_spill]] %s4696_s30 }
  0x2d   :  { %s4711_s6 = sld [smem:[%s5069_s0 + %s4541_s7]]  }
  0x2e   :  { %s4716_s30 = sld [smem:[%s5069_s0 + %s4542_s15]]  }
  0x2f LB: > { %s3931_s23 = sadd.s32 4294967295, %s4510_s22   ;;  %p3935_p0 = scmp.ge.s32.totalorder %s4510_s22, 1  ;;  %s4510_s22 = sphi %s4718_s22, %s74_s22  }
  0x30   : > { %p880_p1 = scmp.lt.s32.totalorder %s4510_s22, 3 }
  0x32   : > { %p881_p2 = pnand %p3935_p0, %p880_p1 }
  0x33   : > { %p966_p3 = scmp.lt.s32.totalorder (!%p881_p2), %s3931_s23, 1  ;;  %vm986_vm0 = vcmask (!%p881_p2), 257024   ;;  %v1044_v4 = vld [vmem:[%s4591_s29] sm:$0xff] (!%p881_p2)  ;;  %v1045_v5 = vld [vmem:[%s4591_s29 + $0x8] sm:$0xff] (!%p881_p2)  ;;  %s4543_s1 = smov (!%p881_p2), 96   ;;  %v1046_v17 = vld [vmem:[%s4591_s29 + $0x10] sm:$0xff] (!%p881_p2) }
  0x34   : > { %884 = sbr.rel (%p881_p2) target bundleno = 6598 (0x19c6), region = 140  ;;  %v4439_v6 = vpack.i.bf16 (!%p881_p2), %v1045_v5, %v1044_v4  ;;  %v1047_v18 = vld [vmem:[%s4591_s29 + $0x18] sm:$0xff] (!%p881_p2)  ;;  %v4331_v20 = vpack.c.bf16 (!%p881_p2), %v1045_v5, %v1044_v4  ;;  %v4544_v21 = vmov (!%p881_p2), 0.0|0.0   ;;  %vm4545_vm1 = vmmov (!%p881_p2), 0   ;;  %v3944_v24 = vld [vmem:[%s4596_s3] ss:$0 sm:$0xff] (!%p881_p2) }
  0x35   : > { %v4444_v19 = vpack.i.bf16 (!%p881_p2), %v1047_v18, %v1046_v17  ;;  %4330 = vmatprep.subr.bf16.mxu1 (!%p881_p2), %v4544_v21  ;;  %v4334_v22 = vpack.c.bf16 (!%p881_p2), %v1047_v18, %v1046_v17  ;;  %v4546_v23 = vmov (!%p881_p2), 0.0   ;;  %v3940_v35 = vld [vmem:[%s4571_s13] ss:$0 sm:$0xff] (!%p881_p2)  ;;  %vm1060_vm2 = vcmask (!%p881_p2), 261120   ;;  %s4547_s2 = smov (!%p881_p2), 120   ;;  %s4548_s7 = smov (!%p881_p2), 112  }
  0x36   : > { %4332 = vmatpush3.bf16.msra.mxu1 (!%p881_p2), %v4331_v20  ;;  %4114 = vmatprep.mubr.msk.f32.mxu1 (!%p881_p2), %vm4545_vm1, %v4546_v23  ;;  %v3941_v38 = vld [vmem:[%s4576_s17] ss:$0 sm:$0xff] (!%p881_p2)  ;;  %vm1226_vm3 = vcmask (!%p881_p2), 64512   ;;  %vm1304_vm4 = vcmask (!%p881_p2), 27648   ;;  %vm1322_vm5 = vcmask (!%p881_p2), 1043456   ;;  %s4549_s10 = smov (!%p881_p2), 88  }
  0x37   : > { %4333 = vmatprep.subr.bf16.mxu1 (!%p881_p2), %v4544_v21  ;;  %4128 = vmatprep.subr.mxu0 (!%p881_p2), %v4546_v23  ;;  %v3942_v46 = vld [vmem:[%s4581_s21] ss:$0 sm:$0xff] (!%p881_p2)  ;;  %vm1318_vm6 = vcmask (!%p881_p2), 31744   ;;  %s4550_s11 = smov (!%p881_p2), 104   ;;  %s4551_s15 = smov (!%p881_p2), 80   ;;  %vm3516_vm7 = vcmask (!%p881_p2), 523264  }
  0x38   : > { %4130 = vmatprep.mubr.msk.f32.mxu0 (!%p881_p2), %vm4545_vm1, %v4546_v23  ;;  %v3943_v49 = vld [vmem:[%s4586_s25] ss:$0 sm:$0xff] (!%p881_p2)  ;;  %s4552_s16 = smov (!%p881_p2), 72   ;;  %s5088_s18 = sld [smem:[#allocation2_spill]] (!%p881_p2) }
  0x3a   : > { %4335 = vmatpush3.bf16.msra.mxu1 (!%p881_p2), %v4334_v22 }
  0x3b   : > { %s5103_s23 = smov (!%p966_p3, %s3931_s23), 1  ;;  %4336 = vmatprep.subr.bf16.mxu1 %v4544_v21 }
  0x3c   : > { %s4726_s0 = sshll.u32 %s5103_s23, 2  ;;  %s5089_s23 = sld [smem:[#allocation3_spill]] }
  0x3d   : > { %s969_s26 = scalar_lea.vmem %s4561_s5, %s4726_s0  ;;  %s4732_s28 = scalar_lea.vmem %s4566_s9, %s4726_s0 }
  0x3e   : > { %v4734_v0 = vld [vmem:[%s969_s26] sm:$0xf]  ;;  %s5090_s26 = sld [smem:[#allocation4_spill]] }
  0x3f   : > { %v983_v1 = vld [vmem:[%s4732_s28] sm:$0xf]  ;;  %v987_v2 = vsel %vm986_vm0, %v4734_v0, 0.0 }
  0x40   : > { %988 = vadd.xlane.f32.xlu0 %v987_v2  ;;  %v1017_v3 = vsel %vm986_vm0, %v983_v1, 0.0 }
  0x44   : > { %1018 = vadd.xlane.f32.xlu0 %v1017_v3 }
  0x5a   : > { %4440 = vrot.lane.b32.xlu0 %v4439_v6, %s4543_s1 }
  0xcd   : > { %v989_v7 = vpop.xlane.xlu0 %988 }
  0xce   : > { %v991_v8 = vmul.f32 0.03125, %v989_v7 }
  0xd0   : > { %v992_v9 = vsub.f32 %v4734_v0, %v991_v8 }
  0xd1   : > { %v1019_v10 = vpop.xlane.xlu0 %1018 }
  0xd2   : > { %v1020_v11 = vmul.f32 0.03125, %v1019_v10  ;;  %v993_v12 = vmul.f32 %v992_v9, %v992_v9 }
  0xd4   : > { %v1021_v13 = vsub.f32 %v983_v1, %v1020_v11  ;;  %v994_v14 = vsel %vm986_vm0, %v993_v12, 0.0 }
  0xd5   : > { %995 = vadd.xlane.f32.xlu1 %v994_v14  ;;  %v4441_v31 = vpop.permute.xlu0 %4440 }
  0xd6   : > { %v1022_v15 = vmul.f32 %v1021_v13, %v1021_v13  ;;  %v4443_v33 = vunpack.i.h.bf16 %v4441_v31  ;;  %v4442_v34 = vunpack.i.l.bf16 %v4441_v31 }
  0xd8   : > { %v1023_v16 = vsel %vm986_vm0, %v1022_v15, 0.0  ;;  %v4337_v41 = vpack.c.bf16 %v4443_v33, %v4442_v34 }
  0xd9   : > { %1024 = vadd.xlane.f32.xlu1 %v1023_v16 }
  0xea   : > { %4445 = vrot.lane.b32.xlu1 %v4444_v19, %s4543_s1  ;;  %v1050_v19 = vld [vmem:[%s4601_s8 + $0x8] sm:$0xff] }
  0xee   : > { %1150 = vrot.lane.b32.xlu1 %v3944_v24, %s4543_s1 }
 0x162   : > { %v996_v25 = vpop.xlane.xlu1 %995 }
 0x163   : > { %v997_v26 = vmul.f32 0.03125, %v996_v25 }
 0x165   : > { %v998_v27 = vadd.f32 1e-05, %v997_v26  ;;  %v1049_v26 = vld [vmem:[%s4601_s8] sm:$0xff] }
 0x166   : > { %v1025_v28 = vpop.xlane.xlu1 %1024 }
 0x167   : > { %4459 = vrsqrt.f32 %v998_v27  ;;  %v1026_v29 = vmul.f32 0.03125, %v1025_v28 }
 0x169   : > { %v1027_v30 = vadd.f32 1e-05, %v1026_v29 }
 0x16a   : > { %v4446_v36 = vpop.permute.xlu1 %4445 }
 0x16b   : > { %4461 = vrsqrt.f32 %v1027_v30  ;;  %v4448_v42 = vunpack.i.h.bf16 %v4446_v36  ;;  %v4447_v43 = vunpack.i.l.bf16 %v4446_v36 }
 0x16d   : > { %v4340_v47 = vpack.c.bf16 %v4448_v42, %v4447_v43 }
 0x16e   : > { %v1151_v54 = vpop.permute.xlu1 %1150 }
 0x171   : > { %v4460_v32 = vpop.eup %4459 }
 0x172   : > { %v1000_v37 = vmul.f32 %v4460_v32, %v992_v9 }
 0x174   : > { %v1007_v39 = vmul.f32 %v3940_v35, %v1000_v37 }
 0x175   : > { %v4462_v40 = vpop.eup %4461 }
 0x176   : > { %v4761_v44 = vmul.f32 %v4462_v40, %v1021_v13  ;;  %v1014_v45 = vadd.f32 %v3941_v38, %v1007_v39 }
 0x178   : > { %4115 = vmatmul.mubr.msk.f32.vlgmr.msra.gmra.mrb[0].mxu1 %vm1060_vm2, %v1014_v45  ;;  %v1036_v48 = vmul.f32 %v3942_v46, %v4761_v44 }
 0x179   : > { %4338 = vmatpush3.bf16.msra.mxu1 %v4337_v41  ;;  %4125 = vmatprep.mubr.msk.f32.mxu1 %vm4545_vm1, %v4546_v23 }
 0x17a   : > { %4339 = vmatprep.subr.bf16.mxu1 %v4544_v21  ;;  %v1043_v50 = vadd.f32 %v3943_v49, %v1036_v48 }
 0x17d   : > { %4341 = vmatpush3.bf16.msra.mxu1 %v4340_v47 }
 0x17e   : > { %4133 = vmatprep.subr.mxu1 %v4546_v23 }
 0x180   : > { %4126 = vmatmul.mubr.msk.f32.vlgmr.msra.gmra.mrb[2].mxu1 %vm1060_vm2, %v1043_v50 }
 0x181   : > { %4135 = vmatprep.mubr.msk.f32.mxu1 %vm4545_vm1, %v4546_v23 }
 0x24b   : > { %v1130_v51 = vpop.f32.mrb[0].mxu1 }
 0x24c   : > { %v4774_v52 = vadd.f32 %v3944_v24, %v1130_v51  ;;  %v4116_v53 = vpop.f32.mrb[1].mxu1 }
 0x24e   : > { %1395 = vrot.lane.b32.xlu0 %v4774_v52, %s4547_s2 }
 0x253   : > { %v1222_v55 = vpop.f32.mrb[2].mxu1 }
 0x254   : > { %v4778_v56 = vadd.f32 %v1222_v55, %v1151_v54  ;;  %v4127_v57 = vpop.f32.mrb[3].mxu1  ;;  %v1051_v54 = vld [vmem:[%s4601_s8 + $0x10] sm:$0xff] }
 0x256   : > { %1397 = vrot.lane.b32.xlu1 %v4778_v56, %s4547_s2  ;;  %4129 = vmatpush3.xpose.msk.msra.mxu0 %vm1226_vm3, %v4778_v56 }
 0x257   : > { %4138 = vmatprep.subr.mxu0 %v4546_v23 }
 0x259   : > { %4131 = vmatmul.mubr.msk.f32.vlgmr.msra.gmra.mrb[0].mxu0 %vm1226_vm3, %v4774_v52 }
 0x25a   : > { %4140 = vmatprep.mubr.msk.f32.mxu0 %vm4545_vm1, %v4546_v23 }
 0x2c0   : > { %v1396_v59 = vpop.permute.xlu0 %1395 }
 0x2c8   : > { %v1398_v58 = vpop.permute.xlu1 %1397 }
 0x2c9   : > { %4139 = vmatpush3.xpose.msk.msra.mxu0 %vm1226_vm3, %v1398_v58 }
 0x2ca   : > { %4148 = vmatprep.subr.mxu0 %v4546_v23 }
 0x2cc   : > { %4141 = vmatmul.mubr.msk.f32.vlgmr.msra.gmra.mrb[2].mxu0 %vm1226_vm3, %v1396_v59 }
 0x2cd   : > { %4150 = vmatprep.mubr.msk.f32.mxu0 %vm4545_vm1, %v4546_v23  ;;  %4149 = vmatpush3.msra.mxu0 %v1050_v19  ;;  %v3969_v19 = vld [vmem:[%s4616_s24] ss:$0 sm:$0xff] }
 0x2ce   : > { %4158 = vmatprep.subr.mxu0 %v4546_v23 }
 0x32c   : > { %v1299_v60 = vpop.f32.mrb[0].mxu0 }
 0x32d   : > { %v1303_v61 = vmul.f32 0.35355338, %v1299_v60  ;;  %v4132_v62 = vpop.f32.mrb[1].mxu0 }
 0x32f   : > { %v1305_v63 = vsel %vm1304_vm4, %v1303_v61, -inf }
 0x330   : > { %1306 = vmax.xlane.f32.xlu1 %v1305_v63 }
 0x341   : > { %1316 = vrot.lane.b32.xlu1 %v4778_v56, %s4543_s1 }
 0x345   : > { %1710 = vrot.lane.b32.xlu1 %v4778_v56, %s4548_s7 }
 0x349   : > { %1708 = vrot.lane.b32.xlu1 %v4774_v52, %s4548_s7 }
 0x39f   : > { %v1469_v1 = vpop.f32.mrb[2].mxu0 }
 0x3a0   : > { %v1473_v2 = vmul.f32 0.35355338, %v1469_v1  ;;  %v4142_v3 = vpop.f32.mrb[3].mxu0 }
 0x3a2   : > { %v1474_v4 = vsel %vm1304_vm4, %v1473_v2, -inf }
 0x3a3   : > { %1475 = vmax.xlane.f32.xlu0 %v1474_v4 }
 0x3bd   : > { %v1307_v5 = vpop.xlane.xlu1 %1306 }
 0x3be   : > { %v1308_v6 = vsub.f32 %v1303_v61, %v1307_v5  ;;  %v1052_v5 = vld [vmem:[%s4601_s8 + $0x18] sm:$0xff] }
 0x3c0   : > { %v1309_v7 = vmul.f32 1.442695, %v1308_v6 }
 0x3c1   : > { %v1317_v8 = vpop.permute.xlu1 %1316 }
 0x3c2   : > { %4463 = vpow2.f32 %v1309_v7  ;;  %4134 = vmatpush3.msk.msra.mxu1 %vm1322_vm5, %v1317_v8 }
 0x3c3   : > { %4143 = vmatprep.subr.mxu1 %v4546_v23 }
 0x3c5   : > { %v1711_v29 = vpop.permute.xlu1 %1710 }
 0x3c9   : > { %v1709_v32 = vpop.permute.xlu1 %1708 }
 0x3cc   : > { %v4464_v9 = vpop.eup %4463 }
 0x3cd   : > { %v1311_v10 = vsel %vm1304_vm4, %v4464_v9, 0.0 }
 0x3ce   : > { %1312 = vadd.xlane.f32.xlu0 %v1311_v10  ;;  %v2244_v10 = vld [vmem:[%s4631_s12 + $0x8] sm:$0xff] }
 0x430   : > { %v1476_v11 = vpop.xlane.xlu0 %1475 }
 0x431   : > { %v1477_v12 = vsub.f32 %v1473_v2, %v1476_v11 }
 0x433   : > { %v1478_v13 = vmul.f32 1.442695, %v1477_v12 }
 0x435   : > { %4465 = vpow2.f32 %v1478_v13 }
 0x43f   : > { %v4466_v14 = vpop.eup %4465 }
 0x440   : > { %v1480_v15 = vsel %vm1304_vm4, %v4466_v14, 0.0 }
 0x441   : > { %1481 = vadd.xlane.f32.xlu0 %v1480_v15  ;;  %v2246_v15 = vld [vmem:[%s4631_s12 + $0x18] sm:$0xff] }
 0x457   : > { %1485 = vrot.lane.b32.xlu0 %v4778_v56, %s4549_s10 }
 0x45b   : > { %v1313_v16 = vpop.xlane.xlu0 %1312 }
 0x45c   : > { %4467 = vrcp.f32 %v1313_v16  ;;  %v3968_v16 = vld [vmem:[%s4611_s19] ss:$0 sm:$0xff] }
 0x466   : > { %v4468_v17 = vpop.eup %4467 }
 0x467   : > { %v1315_v18 = vmul.f32 %v4468_v17, %v4464_v9  ;;  %v2243_v9 = vld [vmem:[%s4631_s12] sm:$0xff] }
 0x468   : > { %v4343_v12 = vpack.c.bf16 %v2244_v10, %v2243_v9 }
 0x469   : > { %4136 = vmatmul.mubr.msk.f32.vlgmr.msra.gmra.mrb[4].mxu1 %vm1318_vm6, %v1315_v18  ;;  %v2206_v18 = vmul.f32 %v3968_v16, %v4761_v44 }
 0x46a   : > { %4145 = vmatprep.mubr.msk.f32.mxu1 %vm4545_vm1, %v4546_v23 }
 0x4ce   : > { %v1482_v20 = vpop.xlane.xlu0 %1481 }
 0x4cf   : > { %4469 = vrcp.f32 %v1482_v20  ;;  %v2213_v20 = vadd.f32 %v3969_v19, %v2206_v18 }
 0x4d2   : > { %v1486_v22 = vpop.permute.xlu0 %1485 }
 0x4d3   : > { %4144 = vmatpush3.msk.msra.mxu1 %vm1322_vm5, %v1486_v22 }
 0x4d4   : > { %4153 = vmatprep.subr.mxu1 %v4546_v23 }
 0x4d9   : > { %v4470_v24 = vpop.eup %4469 }
 0x4da   : > { %v1484_v25 = vmul.f32 %v4470_v24, %v4466_v14  ;;  %v2245_v14 = vld [vmem:[%s4631_s12 + $0x10] sm:$0xff] }
 0x4db   : > { %v4346_v17 = vpack.c.bf16 %v2246_v15, %v2245_v14 }
 0x4dc   : > { %4146 = vmatmul.mubr.msk.f32.vlgmr.msra.gmra.mrb[6].mxu1 %vm1318_vm6, %v1484_v25 }
 0x4dd   : > { %4154 = vmatpush3.msra.mxu1 %v1049_v26  ;;  %4155 = vmatprep.mubr.msk.f32.mxu1 %vm4545_vm1, %v4546_v23  ;;  %v3967_v26 = vld [vmem:[%s4606_s14] ss:$0 sm:$0xff] }
 0x4de   : > { %4163 = vmatprep.subr.mxu1 %v4546_v23 }
 0x53c   : > { %v1391_v27 = vpop.f32.mrb[4].mxu1 }
 0x53d   : > { %v4137_v28 = vpop.f32.mrb[5].mxu1  ;;  %4156 = vmatmul.mubr.msk.f32.vlgmr.msra.gmra.mrb[8].mxu1 %vm1226_vm3, %v1391_v27 }
 0x53e   : > { %4165 = vmatprep.mubr.msk.f32.mxu1 %vm4545_vm1, %v4546_v23 }
 0x5af   : > { %v1558_v30 = vpop.f32.mrb[6].mxu1 }
 0x5b0   : > { %v4147_v31 = vpop.f32.mrb[7].mxu1  ;;  %4151 = vmatmul.mubr.msk.f32.vlgmr.msra.gmra.mrb[4].mxu0 %vm1226_vm3, %v1558_v30 }
 0x5b1   : > { %4159 = vmatpush3.xpose.msk.msra.mxu0 %vm1226_vm3, %v1711_v29  ;;  %4160 = vmatprep.mubr.msk.f32.mxu0 %vm4545_vm1, %v4546_v23 }
 0x5b2   : > { %4168 = vmatprep.subr.mxu0 %v4546_v23 }
 0x5b4   : > { %4161 = vmatmul.mubr.msk.f32.vlgmr.msra.gmra.mrb[6].mxu0 %vm1226_vm3, %v1709_v32 }
 0x5b5   : > { %4170 = vmatprep.mubr.msk.f32.mxu0 %vm4545_vm1, %v4546_v23  ;;  %4169 = vmatpush3.msra.mxu0 %v1051_v54  ;;  %v3970_v54 = vld [vmem:[%s5088_s18] ss:$0 sm:$0xff]  ;;  %s5098_s18 = sld [smem:[#allocation14_spill]] }
 0x5b6   : > { %4178 = vmatprep.subr.mxu0 %v4546_v23 }
 0x610   : > { %v1704_v33 = vpop.f32.mrb[8].mxu1 }
 0x611   : > { %v4157_v34 = vpop.f32.mrb[9].mxu1 }
 0x612   : > { %v3972_v34 = vld [vmem:[%s4636_s20] ss:$0 sm:$0xff] }
 0x683   : > { %v1631_v35 = vpop.f32.mrb[4].mxu0 }
 0x684   : > { %v1705_v36 = vadd.f32 %v1704_v33, %v1631_v35  ;;  %v4152_v37 = vpop.f32.mrb[5].mxu0  ;;  %v4454_v33 = vpack.i.bf16 %v2246_v15, %v2245_v14 }
 0x687   : > { %v1782_v38 = vpop.f32.mrb[6].mxu0 }
 0x688   : > { %v1786_v39 = vmul.f32 0.35355338, %v1782_v38  ;;  %v4162_v40 = vpop.f32.mrb[7].mxu0 }
 0x68a   : > { %v1787_v41 = vsel %vm1304_vm4, %v1786_v39, -inf }
 0x68b   : > { %1788 = vmax.xlane.f32.xlu1 %v1787_v41 }
 0x69c   : > { %1951 = vrot.lane.b32.xlu1 %v4778_v56, %s4550_s11 }
 0x6a0   : > { %1949 = vrot.lane.b32.xlu1 %v4774_v52, %s4550_s11 }
 0x718   : > { %v1789_v42 = vpop.xlane.xlu1 %1788 }
 0x719   : > { %v1790_v43 = vsub.f32 %v1786_v39, %v1789_v42 }
 0x71b   : > { %v1791_v45 = vmul.f32 1.442695, %v1790_v43 }
 0x71c   : > { %v1952_v51 = vpop.permute.xlu1 %1951 }
 0x71d   : > { %4471 = vpow2.f32 %v1791_v45 }
 0x720   : > { %v1950_v53 = vpop.permute.xlu1 %1949 }
 0x727   : > { %v4472_v46 = vpop.eup %4471 }
 0x728   : > { %v1793_v47 = vsel %vm1304_vm4, %v4472_v46, 0.0 }
 0x729   : > { %1794 = vadd.xlane.f32.xlu0 %v1793_v47 }
 0x73f   : > { %1798 = vrot.lane.b32.xlu0 %v4778_v56, %s4551_s15 }
 0x7b6   : > { %v1795_v48 = vpop.xlane.xlu0 %1794 }
 0x7b7   : > { %4473 = vrcp.f32 %v1795_v48 }
 0x7ba   : > { %v1799_v49 = vpop.permute.xlu0 %1798 }
 0x7bb   : > { %4164 = vmatpush3.msk.msra.mxu1 %vm1322_vm5, %v1799_v49 }
 0x7bc   : > { %4173 = vmatprep.subr.mxu1 %v4546_v23 }
 0x7c1   : > { %v4474_v50 = vpop.eup %4473 }
 0x7c2   : > { %v1797_v52 = vmul.f32 %v4474_v50, %v4472_v46 }
 0x7c4   : > { %4166 = vmatmul.mubr.msk.f32.vlgmr.msra.gmra.mrb[10].mxu1 %vm1318_vm6, %v1797_v52 }
 0x7c5   : > { %4174 = vmatpush3.xpose.msk.msra.mxu1 %vm1226_vm3, %v1952_v51  ;;  %4175 = vmatprep.mubr.msk.f32.mxu1 %vm4545_vm1, %v4546_v23 }
 0x7c6   : > { %4183 = vmatprep.subr.mxu1 %v4546_v23 }
 0x7c8   : > { %4176 = vmatmul.mubr.msk.f32.vlgmr.msra.gmra.mrb[12].mxu1 %vm1226_vm3, %v1950_v53 }
 0x7c9   : > { %4185 = vmatprep.mubr.msk.f32.mxu1 %vm4545_vm1, %v4546_v23  ;;  %4184 = vmatpush3.msra.mxu1 %v1052_v5 }
 0x7ca   : > { %4348 = vmatprep.subr.bf16.mxu1 %v4544_v21 }
 0x897   : > { %v1871_v55 = vpop.f32.mrb[10].mxu1 }
 0x898   : > { %v4167_v57 = vpop.f32.mrb[11].mxu1  ;;  %4171 = vmatmul.mubr.msk.f32.vlgmr.msra.gmra.mrb[8].mxu0 %vm1226_vm3, %v1871_v55 }
 0x899   : > { %4180 = vmatprep.mubr.msk.f32.mxu0 %vm4545_vm1, %v4546_v23  ;;  %v3971_v57 = vld [vmem:[%s5089_s23] ss:$0 sm:$0xff]  ;;  %s977_s23 = scalar_lea.vmem %s4711_s6, %s4726_s0 }
 0x89b   : > { %v2023_v58 = vpop.f32.mrb[12].mxu1 }
 0x89c   : > { %v2027_v59 = vmul.f32 0.35355338, %v2023_v58  ;;  %v4177_v60 = vpop.f32.mrb[13].mxu1 }
 0x89e   : > { %v2028_v61 = vsel %vm1304_vm4, %v2027_v59, -inf }
 0x89f   : > { %2029 = vmax.xlane.f32.xlu0 %v2028_v61 }
 0x8b5   : > { %2039 = vrot.lane.b32.xlu0 %v4778_v56, %s4552_s16 }
 0x8b9   : > { %4455 = vrot.lane.b32.xlu0 %v4454_v33, %s4543_s1 }
 0x8bd   : > { %2348 = vrot.lane.b32.xlu0 %v3972_v34, %s4543_s1 }
 0x92c   : > { %v2030_v62 = vpop.xlane.xlu0 %2029 }
 0x92d   : > { %v2031_v63 = vsub.f32 %v2027_v59, %v2030_v62 }
 0x92f   : > { %v2032_v1 = vmul.f32 1.442695, %v2031_v63 }
 0x930   : > { %v2040_v2 = vpop.permute.xlu0 %2039 }
 0x931   : > { %4475 = vpow2.f32 %v2032_v1  ;;  %4179 = vmatpush3.msk.msra.mxu0 %vm1322_vm5, %v2040_v2 }
 0x932   : > { %4342 = vmatprep.subr.bf16.mxu0 %v4544_v21 }
 0x934   : > { %v4456_v43 = vpop.permute.xlu0 %4455 }
 0x935   : > { %v4458_v47 = vunpack.i.h.bf16 %v4456_v43  ;;  %v4457_v50 = vunpack.i.l.bf16 %v4456_v43 }
 0x937   : > { %v4352_v52 = vpack.c.bf16 %v4458_v47, %v4457_v50 }
 0x938   : > { %v2349_v60 = vpop.permute.xlu0 %2348 }
 0x93b   : > { %v4476_v3 = vpop.eup %4475 }
 0x93c   : > { %v2034_v4 = vsel %vm1304_vm4, %v4476_v3, 0.0 }
 0x93d   : > { %2035 = vadd.xlane.f32.xlu1 %v2034_v4 }
 0x96b   : > { %v1944_v56 = vpop.f32.mrb[8].mxu0 }
 0x96c   : > { %v1948_v6 = vadd.f32 %v1944_v56, %v1705_v36  ;;  %v4172_v7 = vpop.f32.mrb[9].mxu0 }
 0x9ca   : > { %v2036_v8 = vpop.xlane.xlu1 %2035 }
 0x9cb   : > { %4477 = vrcp.f32 %v2036_v8 }
 0x9d5   : > { %v4478_v11 = vpop.eup %4477 }
 0x9d6   : > { %v2038_v13 = vmul.f32 %v4478_v11, %v4476_v3 }
 0x9d8   : > { %4181 = vmatmul.mubr.msk.f32.vlgmr.msra.gmra.mrb[10].mxu0 %vm1318_vm6, %v2038_v13 }
 0x9d9   : > { %4344 = vmatpush3.bf16.msra.mxu0 %v4343_v12  ;;  %4196 = vmatprep.mubr.msk.f32.mxu0 %vm4545_vm1, %v4546_v23 }
 0x9da   : > { %4345 = vmatprep.subr.bf16.mxu0 %v4544_v21 }
 0x9dd   : > { %4347 = vmatpush3.bf16.msra.mxu0 %v4346_v17 }
 0x9de   : > { %4210 = vmatprep.subr.mxu0 %v4546_v23 }
 0x9e0   : > { %4197 = vmatmul.mubr.msk.f32.vlgmr.msra.gmra.mrb[12].mxu0 %vm1060_vm2, %v2213_v20 }
 0x9e1   : > { %4212 = vmatprep.mubr.msk.f32.mxu0 %vm4545_vm1, %v4546_v23 }
 0xaab   : > { %v2112_v22 = vpop.f32.mrb[10].mxu0 }
 0xaac   : > { %v4182_v24 = vpop.f32.mrb[11].mxu0  ;;  %4186 = vmatmul.mubr.msk.f32.vlgmr.msra.gmra.mrb[14].mxu1 %vm1226_vm3, %v2112_v22 }
 0xaad   : > { %4207 = vmatprep.mubr.msk.f32.mxu1 %vm4545_vm1, %v4546_v23 }
 0xab3   : > { %v2328_v25 = vpop.f32.mrb[12].mxu0 }
 0xab4   : > { %v4198_v44 = vpop.f32.mrb[13].mxu0  ;;  %v4892_v40 = vadd.f32 %v3972_v34, %v2328_v25 }
 0xb7f   : > { %v2185_v27 = vpop.f32.mrb[14].mxu1 }
 0xb80   : > { %v2189_v28 = vadd.f32 %v2185_v27, %v1948_v6  ;;  %v4187_v29 = vpop.f32.mrb[15].mxu1 }
 0xb81   : > { %v2248_v29 = vld [vmem:[%s5090_s26] sm:$0xff] }
 0xb82   : > { %v2196_v30 = vadd.f32 %v3967_v26, %v2189_v28 }
 0xb84   : > { %v4882_v31 = vadd.f32 %v2196_v30, %v4734_v0  ;;  %v4449_v0 = vpack.i.bf16 %v2244_v10, %v2243_v9  ;;  %v2249_v30 = vld [vmem:[%s5090_s26 + $0x8] sm:$0xff] }
 0xb86   : > { %v2216_v32 = vsel %vm986_vm0, %v4882_v31, 0.0 }
 0xb87   : > { %2217 = vadd.xlane.f32.xlu1 %v2216_v32 }
 0xc14   : > { %v2218_v35 = vpop.xlane.xlu1 %2217 }
 0xc15   : > { %v2219_v36 = vmul.f32 0.03125, %v2218_v35 }
 0xc17   : > { %v2220_v37 = vsub.f32 %v4882_v31, %v2219_v36 }
 0xc19   : > { %v2221_v38 = vmul.f32 %v2220_v37, %v2220_v37 }
 0xc1b   : > { %v2222_v39 = vsel %vm986_vm0, %v2221_v38, 0.0 }
 0xc1c   : > { %2223 = vadd.xlane.f32.xlu1 %v2222_v39 }
 0xc2d   : > { %4450 = vrot.lane.b32.xlu1 %v4449_v0, %s4543_s1 }
 0xc31   : > { %2589 = vrot.lane.b32.xlu1 %v4892_v40, %s4547_s2 }
 0xca9   : > { %v2224_v41 = vpop.xlane.xlu1 %2223 }
 0xcaa   : > { %v2225_v42 = vmul.f32 0.03125, %v2224_v41 }
 0xcac   : > { %v2226_v45 = vadd.f32 1e-05, %v2225_v42 }
 0xcad   : > { %v4451_v46 = vpop.permute.xlu1 %4450 }
 0xcae   : > { %4479 = vrsqrt.f32 %v2226_v45  ;;  %v4453_v48 = vunpack.i.h.bf16 %v4451_v46  ;;  %v4452_v49 = vunpack.i.l.bf16 %v4451_v46 }
 0xcb0   : > { %v4349_v51 = vpack.c.bf16 %v4453_v48, %v4452_v49 }
 0xcb1   : > { %v2590_v2 = vpop.permute.xlu1 %2589 }
 0xcb2   : > { %4350 = vmatpush3.bf16.msra.mxu1 %v4349_v51 }
 0xcb3   : > { %4351 = vmatprep.subr.bf16.mxu1 %v4544_v21 }
 0xcb6   : > { %4353 = vmatpush3.bf16.msra.mxu1 %v4352_v52 }
 0xcb7   : > { %4215 = vmatprep.subr.mxu1 %v4546_v23 }
 0xcb8   : > { %v4480_v53 = vpop.eup %4479 }
 0xcb9   : > { %v4899_v55 = vmul.f32 %v4480_v53, %v2220_v37 }
 0xcbb   : > { %v2235_v58 = vmul.f32 %v3970_v54, %v4899_v55 }
 0xcbd   : > { %v2242_v59 = vadd.f32 %v3971_v57, %v2235_v58 }
 0xcbf   : > { %4208 = vmatmul.mubr.msk.f32.vlgmr.msra.gmra.mrb[16].mxu1 %vm1060_vm2, %v2242_v59 }
 0xcc0   : > { %4217 = vmatprep.mubr.msk.f32.mxu1 %vm4545_vm1, %v4546_v23 }
 0xd92   : > { %v2420_v61 = vpop.f32.mrb[16].mxu1 }
 0xd93   : > { %v4906_v62 = vadd.f32 %v2420_v61, %v2349_v60  ;;  %v4209_v63 = vpop.f32.mrb[17].mxu1  ;;  %v2250_v60 = vld [vmem:[%s5090_s26 + $0x10] sm:$0xff] }
 0xd95   : > { %2591 = vrot.lane.b32.xlu0 %v4906_v62, %s4547_s2  ;;  %4211 = vmatpush3.xpose.msk.msra.mxu0 %vm1226_vm3, %v4906_v62  ;;  %s5092_s2 = sld [smem:[#allocation6_spill]] }
 0xd96   : > { %4220 = vmatprep.subr.mxu0 %v4546_v23 }
 0xd98   : > { %4213 = vmatmul.mubr.msk.f32.vlgmr.msra.gmra.mrb[14].mxu0 %vm1226_vm3, %v4892_v40 }
 0xd99   : > { %4222 = vmatprep.mubr.msk.f32.mxu0 %vm4545_vm1, %v4546_v23 }
 0xe07   : > { %v2592_v1 = vpop.permute.xlu0 %2591 }
 0xe08   : > { %4221 = vmatpush3.xpose.msk.msra.mxu0 %vm1226_vm3, %v2592_v1 }
 0xe09   : > { %4230 = vmatprep.subr.mxu0 %v4546_v23 }
 0xe0b   : > { %4223 = vmatmul.mubr.msk.f32.vlgmr.msra.gmra.mrb[16].mxu0 %vm1226_vm3, %v2590_v2 }
 0xe0c   : > { %4232 = vmatprep.mubr.msk.f32.mxu0 %vm4545_vm1, %v4546_v23  ;;  %4231 = vmatpush3.msra.mxu0 %v2249_v30 }
 0xe0d   : > { %4240 = vmatprep.subr.mxu0 %v4546_v23 }
 0xe6b   : > { %v2496_v3 = vpop.f32.mrb[14].mxu0 }
 0xe6c   : > { %v2500_v4 = vmul.f32 0.35355338, %v2496_v3  ;;  %v4214_v5 = vpop.f32.mrb[15].mxu0 }
 0xe6e   : > { %v2501_v56 = vsel %vm1304_vm4, %v2500_v4, -inf }
 0xe6f   : > { %2502 = vmax.xlane.f32.xlu0 %v2501_v56 }
 0xede   : > { %v2663_v6 = vpop.f32.mrb[16].mxu0 }
 0xedf   : > { %v2667_v7 = vmul.f32 0.35355338, %v2663_v6  ;;  %v4224_v8 = vpop.f32.mrb[17].mxu0 }
 0xee1   : > { %v2668_v9 = vsel %vm1304_vm4, %v2667_v7, -inf }
 0xee2   : > { %2669 = vmax.xlane.f32.xlu1 %v2668_v9  ;;  %v2251_v9 = vld [vmem:[%s5090_s26 + $0x18] sm:$0xff] }
 0xef3   : > { %2679 = vrot.lane.b32.xlu1 %v4906_v62, %s4549_s10  ;;  %s5094_s10 = sld [smem:[#allocation10_spill]] }
 0xef7   : > { %2904 = vrot.lane.b32.xlu1 %v4906_v62, %s4548_s7 }
 0xef9   : > { %v3415_v30 = vld [vmem:[%s5094_s10 + $0x10] sm:$0xff] }
 0xefb   : > { %2902 = vrot.lane.b32.xlu1 %v4892_v40, %s4548_s7  ;;  %s5093_s7 = sld [smem:[#allocation7_spill]] }
 0xefc   : > { %v2503_v10 = vpop.xlane.xlu0 %2502 }
 0xefd   : > { %v2504_v11 = vsub.f32 %v2500_v4, %v2503_v10 }
 0xeff   : > { %v2505_v12 = vmul.f32 1.442695, %v2504_v11 }
 0xf01   : > { %4481 = vpow2.f32 %v2505_v12 }
 0xf0b   : > { %v4482_v13 = vpop.eup %4481 }
 0xf0c   : > { %v2507_v14 = vsel %vm1304_vm4, %v4482_v13, 0.0 }
 0xf0d   : > { %2508 = vadd.xlane.f32.xlu0 %v2507_v14 }
 0xf6f   : > { %v2670_v15 = vpop.xlane.xlu1 %2669 }
 0xf70   : > { %v2671_v16 = vsub.f32 %v2667_v7, %v2670_v15 }
 0xf72   : > { %v2672_v17 = vmul.f32 1.442695, %v2671_v16 }
 0xf73   : > { %v2680_v26 = vpop.permute.xlu1 %2679 }
 0xf74   : > { %4483 = vpow2.f32 %v2672_v17 }
 0xf77   : > { %v2905_v34 = vpop.permute.xlu1 %2904 }
 0xf7b   : > { %v2903_v37 = vpop.permute.xlu1 %2902 }
 0xf7e   : > { %v4484_v18 = vpop.eup %4483 }
 0xf7f   : > { %v2674_v19 = vsel %vm1304_vm4, %v4484_v18, 0.0 }
 0xf80   : > { %2675 = vadd.xlane.f32.xlu0 %v2674_v19 }
 0xf96   : > { %2512 = vrot.lane.b32.xlu0 %v4906_v62, %s4543_s1  ;;  %s5091_s1 = sld [smem:[#allocation8_spill]] }
 0xf9a   : > { %v2509_v20 = vpop.xlane.xlu0 %2508 }
 0xf9b   : > { %4485 = vrcp.f32 %v2509_v20 }
 0xf9c   : > { %v3409_v15 = vld [vmem:[%s5091_s1 + $0x8] sm:$0xff]  ;;  %v3410_v19 = vld [vmem:[%s5091_s1 + $0x10] sm:$0xff]  ;;  %v3411_v20 = vld [vmem:[%s5091_s1 + $0x18] sm:$0xff] }
 0xfa5   : > { %v4486_v24 = vpop.eup %4485 }
 0xfa6   : > { %v2511_v25 = vmul.f32 %v4486_v24, %v4482_v13  ;;  %v4358_v24 = vpack.c.bf16 %v3411_v20, %v3410_v19 }
0x100d   : > { %v2676_v22 = vpop.xlane.xlu0 %2675 }
0x100e   : > { %4487 = vrcp.f32 %v2676_v22  ;;  %v3996_v22 = vld [vmem:[%s5092_s2] ss:$0 sm:$0xff]  ;;  %s5100_s2 = sld [smem:[#allocation13_spill]] }
0x1011   : > { %v2513_v44 = vpop.permute.xlu0 %2512 }
0x1012   : > { %4216 = vmatpush3.msk.msra.mxu1 %vm1322_vm5, %v2513_v44  ;;  %v3997_v44 = vld [vmem:[%s5093_s7] ss:$0 sm:$0xff]  ;;  %s5101_s7 = sld [smem:[#allocation15_spill]] }
0x1013   : > { %4218 = vmatmul.mubr.msk.f32.vlgmr.msra.gmra.mrb[18].mxu1 %vm1318_vm6, %v2511_v25  ;;  %4225 = vmatprep.subr.mxu1 %v4546_v23  ;;  %v3400_v25 = vmul.f32 %v3996_v22, %v4899_v55  ;;  %v3416_v55 = vld [vmem:[%s5094_s10 + $0x18] sm:$0xff] }
0x1014   : > { %4226 = vmatpush3.msk.msra.mxu1 %vm1322_vm5, %v2680_v26  ;;  %4227 = vmatprep.mubr.msk.f32.mxu1 %vm4545_vm1, %v4546_v23  ;;  %v4003_v22 = vld [vmem:[%s5100_s2] ss:$0 sm:$0xff] }
0x1015   : > { %4235 = vmatprep.subr.mxu1 %v4546_v23  ;;  %v3407_v26 = vadd.f32 %v3997_v44, %v3400_v25  ;;  %v3625_v44 = vld [vmem:[%s4701_s27] sm:$0xff] }
0x1018   : > { %v4488_v27 = vpop.eup %4487 }
0x1019   : > { %v2678_v28 = vmul.f32 %v4488_v27, %v4484_v18  ;;  %v3413_v27 = vld [vmem:[%s5094_s10] sm:$0xff] }
0x101b   : > { %4228 = vmatmul.mubr.msk.f32.vlgmr.msra.gmra.mrb[20].mxu1 %vm1318_vm6, %v2678_v28  ;;  %v3414_v28 = vld [vmem:[%s5094_s10 + $0x8] sm:$0xff] }
0x101c   : > { %4237 = vmatprep.mubr.msk.f32.mxu1 %vm4545_vm1, %v4546_v23  ;;  %4236 = vmatpush3.msra.mxu1 %v2248_v29  ;;  %v4361_v29 = vpack.c.bf16 %v3414_v28, %v3413_v27  ;;  %v3627_v28 = vld [vmem:[%s4701_s27 + $0x10] sm:$0xff] }
0x101d   : > { %4245 = vmatprep.subr.mxu1 %v4546_v23 }
0x10e6   : > { %v2585_v32 = vpop.f32.mrb[18].mxu1 }
0x10e7   : > { %v4219_v33 = vpop.f32.mrb[19].mxu1  ;;  %4238 = vmatmul.mubr.msk.f32.vlgmr.msra.gmra.mrb[22].mxu1 %vm1226_vm3, %v2585_v32 }
0x10e8   : > { %4247 = vmatprep.mubr.msk.f32.mxu1 %vm4545_vm1, %v4546_v23 }
0x10ee   : > { %v2752_v35 = vpop.f32.mrb[20].mxu1 }
0x10ef   : > { %v4229_v36 = vpop.f32.mrb[21].mxu1  ;;  %4233 = vmatmul.mubr.msk.f32.vlgmr.msra.gmra.mrb[18].mxu0 %vm1226_vm3, %v2752_v35  ;;  %v3417_v35 = vld [vmem:[%s5094_s10 + $0x20] sm:$0xff] }
0x10f0   : > { %4241 = vmatpush3.xpose.msk.msra.mxu0 %vm1226_vm3, %v2905_v34  ;;  %4242 = vmatprep.mubr.msk.f32.mxu0 %vm4545_vm1, %v4546_v23  ;;  %v4364_v34 = vpack.c.bf16 %v3416_v55, %v3415_v30  ;;  %v3418_v36 = vld [vmem:[%s5094_s10 + $0x28] sm:$0xff]  ;;  %v3629_v55 = vld [vmem:[%s4701_s27 + $0x20] sm:$0xff] }
0x10f1   : > { %4250 = vmatprep.subr.mxu0 %v4546_v23 }
0x10f3   : > { %4243 = vmatmul.mubr.msk.f32.vlgmr.msra.gmra.mrb[20].mxu0 %vm1226_vm3, %v2903_v37 }
0x10f4   : > { %4252 = vmatprep.mubr.msk.f32.mxu0 %vm4545_vm1, %v4546_v23  ;;  %4251 = vmatpush3.msra.mxu0 %v2250_v60 }
0x10f5   : > { %4260 = vmatprep.subr.mxu0 %v4546_v23 }
0x11ba   : > { %v2898_v38 = vpop.f32.mrb[22].mxu1 }
0x11bb   : > { %v4239_v39 = vpop.f32.mrb[23].mxu1 }
0x11bc   : > { %v3419_v39 = vld [vmem:[%s5094_s10 + $0x30] sm:$0xff] }
0x11c2   : > { %v2825_v0 = vpop.f32.mrb[18].mxu0 }
0x11c3   : > { %v2899_v41 = vadd.f32 %v2898_v38, %v2825_v0  ;;  %v4234_v42 = vpop.f32.mrb[19].mxu0  ;;  %v4367_v38 = vpack.c.bf16 %v3418_v36, %v3417_v35  ;;  %v3420_v0 = vld [vmem:[%s5094_s10 + $0x38] sm:$0xff]  ;;  %v4004_v36 = vld [vmem:[%s5101_s7] ss:$0 sm:$0xff] }
0x11c4   : > { %v3632_v35 = vld [vmem:[%s4701_s27 + $0x38] sm:$0xff] }
0x11c6   : > { %v2976_v43 = vpop.f32.mrb[20].mxu0 }
0x11c7   : > { %v2980_v45 = vmul.f32 0.35355338, %v2976_v43  ;;  %v4244_v46 = vpop.f32.mrb[21].mxu0 }
0x11c9   : > { %v2981_v47 = vsel %vm1304_vm4, %v2980_v45, -inf }
0x11ca   : > { %2982 = vmax.xlane.f32.xlu0 %v2981_v47 }
0x11e0   : > { %2992 = vrot.lane.b32.xlu0 %v4906_v62, %s4551_s15  ;;  %s5096_s15 = sld [smem:[#allocation5_spill]] }
0x11e4   : > { %3143 = vrot.lane.b32.xlu0 %v4892_v40, %s4550_s11 }
0x1257   : > { %v2983_v48 = vpop.xlane.xlu0 %2982 }
0x1258   : > { %v2984_v49 = vsub.f32 %v2980_v45, %v2983_v48  ;;  %v4370_v45 = vpack.c.bf16 %v3420_v0, %v3419_v39 }
0x125a   : > { %v2985_v50 = vmul.f32 1.442695, %v2984_v49 }
0x125b   : > { %v2993_v51 = vpop.permute.xlu0 %2992 }
0x125c   : > { %4489 = vpow2.f32 %v2985_v50  ;;  %4246 = vmatpush3.msk.msra.mxu1 %vm1322_vm5, %v2993_v51 }
0x125d   : > { %4255 = vmatprep.subr.mxu1 %v4546_v23 }
0x125f   : > { %v3144_v59 = vpop.permute.xlu0 %3143 }
0x1266   : > { %v4490_v52 = vpop.eup %4489 }
0x1267   : > { %v2987_v53 = vsel %vm1304_vm4, %v4490_v52, 0.0 }
0x1268   : > { %2988 = vadd.xlane.f32.xlu1 %v2987_v53 }
0x1279   : > { %3145 = vrot.lane.b32.xlu1 %v4906_v62, %s4550_s11  ;;  %s5095_s11 = sld [smem:[#allocation9_spill]] }
0x127f   : > { %v3998_v37 = vld [vmem:[%s5095_s11] ss:$0 sm:$0xff]  ;;  %s981_s11 = scalar_lea.vmem %s4716_s30, %s4726_s0 }
0x12f5   : > { %v2989_v54 = vpop.xlane.xlu1 %2988 }
0x12f6   : > { %4491 = vrcp.f32 %v2989_v54 }
0x12f9   : > { %v3146_v58 = vpop.permute.xlu1 %3145 }
0x1300   : > { %v4492_v40 = vpop.eup %4491 }
0x1301   : > { %v2991_v57 = vmul.f32 %v4492_v40, %v4490_v52  ;;  %v3995_v40 = vld [vmem:[%s5096_s15] ss:$0 sm:$0xff] }
0x1303   : > { %4248 = vmatmul.mubr.msk.f32.vlgmr.msra.gmra.mrb[24].mxu1 %vm1318_vm6, %v2991_v57 }
0x1304   : > { %4256 = vmatpush3.xpose.msk.msra.mxu1 %vm1226_vm3, %v3146_v58  ;;  %4257 = vmatprep.mubr.msk.f32.mxu1 %vm4545_vm1, %v4546_v23 }
0x1305   : > { %4265 = vmatprep.subr.mxu1 %v4546_v23 }
0x1307   : > { %4258 = vmatmul.mubr.msk.f32.vlgmr.msra.gmra.mrb[26].mxu1 %vm1226_vm3, %v3144_v59 }
0x1308   : > { %4267 = vmatprep.mubr.msk.f32.mxu1 %vm4545_vm1, %v4546_v23  ;;  %4266 = vmatpush3.msra.mxu1 %v2251_v9 }
0x1309   : > { %4360 = vmatprep.subr.bf16.mxu1 %v4544_v21 }
0x13d6   : > { %v3065_v61 = vpop.f32.mrb[24].mxu1 }
0x13d7   : > { %v4249_v63 = vpop.f32.mrb[25].mxu1  ;;  %4253 = vmatmul.mubr.msk.f32.vlgmr.msra.gmra.mrb[22].mxu0 %vm1226_vm3, %v3065_v61  ;;  %v4503_v61 = vld [vmem:[%s4732_s28] sm:$0xf]  ;;  %s5099_s28 = sld [smem:[#allocation12_spill]] }
0x13d8   : > { %4262 = vmatprep.mubr.msk.f32.mxu0 %vm4545_vm1, %v4546_v23 }
0x13da   : > { %v3217_v1 = vpop.f32.mrb[26].mxu1 }
0x13db   : > { %v3221_v2 = vmul.f32 0.35355338, %v3217_v1  ;;  %v4259_v3 = vpop.f32.mrb[27].mxu1 }
0x13dd   : > { %v3222_v4 = vsel %vm1304_vm4, %v3221_v2, -inf  ;;  %v4002_v19 = vld [vmem:[%s5099_s28] ss:$0 sm:$0xff] }
0x13de   : > { %3223 = vmax.xlane.f32.xlu1 %v3222_v4 }
0x146b   : > { %v3224_v5 = vpop.xlane.xlu1 %3223 }
0x146c   : > { %v3225_v56 = vsub.f32 %v3221_v2, %v3224_v5 }
0x146e   : > { %v3226_v6 = vmul.f32 1.442695, %v3225_v56 }
0x1470   : > { %4493 = vpow2.f32 %v3226_v6 }
0x147a   : > { %v4494_v7 = vpop.eup %4493 }
0x147b   : > { %v3228_v8 = vsel %vm1304_vm4, %v4494_v7, 0.0 }
0x147c   : > { %3229 = vadd.xlane.f32.xlu0 %v3228_v8 }
0x1492   : > { %3233 = vrot.lane.b32.xlu0 %v4906_v62, %s4552_s16  ;;  %v3408_v62 = vld [vmem:[%s5091_s1] sm:$0xff]  ;;  %s5097_s16 = sld [smem:[#allocation11_spill]] }
0x1493   : > { %v4355_v17 = vpack.c.bf16 %v3409_v15, %v3408_v62 }
0x1498   : > { %v4000_v2 = vld [vmem:[%s5097_s16] ss:$0 sm:$0xff] }
0x14aa   : > { %v3138_v10 = vpop.f32.mrb[22].mxu0 }
0x14ab   : > { %v4988_v11 = vadd.f32 %v3138_v10, %v2899_v41  ;;  %v4254_v12 = vpop.f32.mrb[23].mxu0 }
0x14ac   : > { %v3621_v12 = vld [vmem:[%s5098_s18 + $0x8] sm:$0xff] }
0x1509   : > { %v3230_v13 = vpop.xlane.xlu0 %3229 }
0x150a   : > { %4495 = vrcp.f32 %v3230_v13 }
0x150d   : > { %v3234_v14 = vpop.permute.xlu0 %3233 }
0x150e   : > { %4261 = vmatpush3.msk.msra.mxu0 %vm1322_vm5, %v3234_v14  ;;  %v3622_v14 = vld [vmem:[%s5098_s18 + $0x10] sm:$0xff] }
0x150f   : > { %4354 = vmatprep.subr.bf16.mxu0 %v4544_v21 }
0x1514   : > { %v4496_v16 = vpop.eup %4495 }
0x1515   : > { %v3232_v18 = vmul.f32 %v4496_v16, %v4494_v7 }
0x1517   : > { %4263 = vmatmul.mubr.msk.f32.vlgmr.msra.gmra.mrb[24].mxu0 %vm1318_vm6, %v3232_v18 }
0x1518   : > { %4356 = vmatpush3.bf16.msra.mxu0 %v4355_v17  ;;  %4278 = vmatprep.mubr.msk.f32.mxu0 %vm4545_vm1, %v4546_v23 }
0x1519   : > { %4357 = vmatprep.subr.bf16.mxu0 %v4544_v21 }
0x151c   : > { %4359 = vmatpush3.bf16.msra.mxu0 %v4358_v24 }
0x151d   : > { %4372 = vmatprep.subr.bf16.mxu0 %v4544_v21 }
0x151f   : > { %4279 = vmatmul.mubr.msk.f32.vlgmr.msra.gmra.mrb[26].mxu0 %vm1060_vm2, %v3407_v26  ;;  %v3626_v26 = vld [vmem:[%s4701_s27 + $0x8] sm:$0xff] }
0x1520   : > { %4308 = vmatprep.mubr.msk.f32.mxu0 %vm4545_vm1, %v4546_v23  ;;  %v4379_v27 = vpack.c.bf16 %v3626_v26, %v3625_v44 }
0x15ea   : > { %v3306_v32 = vpop.f32.mrb[24].mxu0 }
0x15eb   : > { %v4264_v33 = vpop.f32.mrb[25].mxu0  ;;  %4268 = vmatmul.mubr.msk.f32.vlgmr.msra.gmra.mrb[28].mxu1 %vm1226_vm3, %v3306_v32  ;;  %v3630_v32 = vld [vmem:[%s4701_s27 + $0x28] sm:$0xff] }
0x15ec   : > { %4362 = vmatpush3.bf16.msra.mxu1 %v4361_v29  ;;  %4297 = vmatprep.mubr.msk.f32.mxu1 %vm4545_vm1, %v4546_v23  ;;  %v3628_v29 = vld [vmem:[%s4701_s27 + $0x18] sm:$0xff]  ;;  %v4385_v33 = vpack.c.bf16 %v3630_v32, %v3629_v55 }
0x15ed   : > { %4363 = vmatprep.subr.bf16.mxu1 %v4544_v21  ;;  %v4382_v30 = vpack.c.bf16 %v3628_v29, %v3627_v28 }
0x15f0   : > { %4365 = vmatpush3.bf16.msra.mxu1 %v4364_v34  ;;  %v3631_v34 = vld [vmem:[%s4701_s27 + $0x30] sm:$0xff] }
0x15f1   : > { %4366 = vmatprep.subr.bf16.mxu1 %v4544_v21 }
0x15f2   : > { %v3497_v41 = vpop.f32.mrb[26].mxu0 }
0x15f3   : > { %v3498_v42 = vadd.f32 %v3998_v37, %v3497_v41  ;;  %v4280_v43 = vpop.f32.mrb[27].mxu0 }
0x15f4   : > { %4368 = vmatpush3.bf16.msra.mxu1 %v4367_v38 }
0x15f5   : > { %v3502_v46 = vmul.f32 0.044715, %v3498_v42  ;;  %4369 = vmatprep.subr.bf16.mxu1 %v4544_v21  ;;  %v3501_v52 = vmul.f32 0.5, %v3498_v42 }
0x15f7   : > { %v3503_v47 = vmul.f32 %v3502_v46, %v3498_v42 }
0x15f8   : > { %4371 = vmatpush3.bf16.msra.mxu1 %v4370_v45 }
0x15f9   : > { %v3504_v48 = vmul.f32 %v3503_v47, %v3498_v42 }
0x15fb   : > { %v3505_v49 = vadd.f32 %v3504_v48, %v3498_v42 }
0x15fd   : > { %v3506_v50 = vmul.f32 0.7978846, %v3505_v49 }
0x15ff   : > { %4497 = vtanh.f32 %v3506_v50 }
0x1609   : > { %v4498_v51 = vpop.eup %4497 }
0x160a   : > { %v3508_v53 = vadd.f32 1.0, %v4498_v51 }
0x160c   : > { %v3509_v54 = vmul.f32 %v3508_v53, %v3501_v52 }
0x160e   : > { %4298 = vmatmul.mubr.msk.f32.vlgmr.msra.gmra.mrb[30].mxu1 %vm3516_vm7, %v3509_v54 }
0x16be   : > { %v3379_v57 = vpop.f32.mrb[28].mxu1 }
0x16bf   : > { %v3383_v58 = vadd.f32 %v3379_v57, %v4988_v11  ;;  %v4269_v59 = vpop.f32.mrb[29].mxu1  ;;  %v3620_v11 = vld [vmem:[%s5098_s18] sm:$0xff] }
0x16c0   : > { %v4373_v13 = vpack.c.bf16 %v3621_v12, %v3620_v11 }
0x16c1   : > { %v3390_v60 = vadd.f32 %v3995_v40, %v3383_v58 }
0x16c2   : > { %4374 = vmatpush3.bf16.msra.mxu0 %v4373_v13 }
0x16c3   : > { %v5026_v63 = vadd.f32 %v4503_v61, %v3390_v60  ;;  %4375 = vmatprep.subr.bf16.mxu0 %v4544_v21 }
0x16c5   : > { %v3593_v1 = vsel %vm986_vm0, %v5026_v63, 0.0 }
0x16c6   : > { %3594 = vadd.xlane.f32.xlu1 %v3593_v1 }
0x16e1   : > { %v3586_v3 = vpop.f32.mrb[30].mxu1 }
0x16e2   : > { %v3587_v4 = vadd.f32 %v4000_v2, %v3586_v3  ;;  %v4299_v5 = vpop.f32.mrb[31].mxu1 }
0x16e4   : > { %v3590_v56 = vadd.f32 %v3587_v4, %v4882_v31  ;;  %v3623_v31 = vld [vmem:[%s5098_s18 + $0x18] sm:$0xff] }
0x16e5   : > { %v4376_v62 = vpack.c.bf16 %v3623_v31, %v3622_v14 }
0x16e6   : > { %3802 = vst.msk [vmem:[%s977_s23] sm:$0xf] %vm986_vm0, %v3590_v56 }
0x16e7   : > { %4377 = vmatpush3.bf16.msra.mxu0 %v4376_v62 }
0x16e8   : > { %4378 = vmatprep.subr.bf16.mxu0 %v4544_v21 }
0x1753   : > { %v3595_v6 = vpop.xlane.xlu1 %3594 }
0x1754   : > { %v3596_v7 = vmul.f32 0.03125, %v3595_v6 }
0x1756   : > { %v3597_v8 = vsub.f32 %v5026_v63, %v3596_v7 }
0x1758   : > { %v3598_v9 = vmul.f32 %v3597_v8, %v3597_v8 }
0x175a   : > { %v3599_v10 = vsel %vm986_vm0, %v3598_v9, 0.0 }
0x175b   : > { %3600 = vadd.xlane.f32.xlu1 %v3599_v10 }
0x17e8   : > { %v3601_v15 = vpop.xlane.xlu1 %3600 }
0x17e9   : > { %v3602_v16 = vmul.f32 0.03125, %v3601_v15 }
0x17eb   : > { %v3603_v17 = vadd.f32 1e-05, %v3602_v16 }
0x17ed   : > { %4499 = vrsqrt.f32 %v3603_v17 }
0x17f7   : > { %v4500_v18 = vpop.eup %4499 }
0x17f8   : > { %v3605_v20 = vmul.f32 %v4500_v18, %v3597_v8 }
0x17fa   : > { %v3612_v24 = vmul.f32 %v4002_v19, %v3605_v20 }
0x17fc   : > { %v3619_v25 = vadd.f32 %v4003_v22, %v3612_v24 }
0x17fe   : > { %4309 = vmatmul.mubr.msk.f32.vlgmr.msra.gmra.mrb[28].mxu0 %vm1060_vm2, %v3619_v25 }
0x17ff   : > { %4327 = vmatprep.mubr.msk.f32.mxu0 %vm4545_vm1, %v4546_v23  ;;  %4380 = vmatpush3.bf16.msra.mxu0 %v4379_v27  ;;  %v4388_v23 = vpack.c.bf16 %v3632_v35, %v3631_v34 }
0x1800   : > { %4381 = vmatprep.subr.bf16.mxu0 %v4544_v21 }
0x1803   : > { %4383 = vmatpush3.bf16.msra.mxu0 %v4382_v30 }
0x1804   : > { %4384 = vmatprep.subr.bf16.mxu0 %v4544_v21 }
0x1807   : > { %4386 = vmatpush3.bf16.msra.mxu0 %v4385_v33 }
0x1808   : > { %4387 = vmatprep.subr.bf16.mxu0 %v4544_v21  ;;  %v4006_v21 = vld [vmem:[%s4706_s4] ss:$0 sm:$0xff] }
0x180b   : > { %4389 = vmatpush3.bf16.msra.mxu0 %v4388_v23 }
0x18d1   : > { %v3709_v37 = vpop.f32.mrb[28].mxu0 }
0x18d2   : > { %v3710_v38 = vadd.f32 %v4004_v36, %v3709_v37  ;;  %v4310_v39 = vpop.f32.mrb[29].mxu0 }
0x18d4   : > { %v3714_v0 = vmul.f32 0.044715, %v3710_v38  ;;  %v3713_v47 = vmul.f32 0.5, %v3710_v38 }
0x18d6   : > { %v3715_v41 = vmul.f32 %v3714_v0, %v3710_v38 }
0x18d8   : > { %v3716_v42 = vmul.f32 %v3715_v41, %v3710_v38 }
0x18da   : > { %v3717_v43 = vadd.f32 %v3716_v42, %v3710_v38 }
0x18dc   : > { %v3718_v45 = vmul.f32 0.7978846, %v3717_v43 }
0x18de   : > { %4501 = vtanh.f32 %v3718_v45 }
0x18e8   : > { %v4502_v46 = vpop.eup %4501 }
0x18e9   : > { %v3720_v48 = vadd.f32 1.0, %v4502_v46 }
0x18eb   : > { %v3721_v49 = vmul.f32 %v3720_v48, %v3713_v47 }
0x18ed   : > { %4328 = vmatmul.mubr.msk.f32.vlgmr.msra.gmra.mrb[30].mxu0 %vm3516_vm7, %v3721_v49 }
0x19c0   : > { %v3797_v50 = vpop.f32.mrb[30].mxu0 }
0x19c1   : > { %v3798_v51 = vadd.f32 %v4006_v21, %v3797_v50  ;;  %v4329_v52 = vpop.f32.mrb[31].mxu0 }
0x19c3   : > { %v3801_v53 = vadd.f32 %v3798_v51, %v5026_v63 }
0x19c5   : > { %3803 = vst.msk [vmem:[%s981_s11] sm:$0xf] %vm986_vm0, %v3801_v53 }
0x19c6 PF: > { %s74_s22 = sadd.s32 1, %s4510_s22  }
0x19c7   : > { %p71_p4 = scmp.ge.s32.totalorder %s74_s22, 4  }
0x19c9   :  { %73 = sbr.rel (!%p71_p4) target bundleno = 47 (0x2f), region = 216 }

</bundles_post_ra>
